<compile_context>
chip_gen: v5e
topology: v5e:2x2
jax: 0.10.0
libtpu: 0.0.40
codegen_flags: <defaults>
</compile_context>

<pallas_src>
import jax
import jax.numpy as jnp
from jax.experimental import pallas as pl
from jax.experimental.pallas import tpu as pltpu

LANE = 128   # lane width (last-dim tile)
SUB = 8      # sublane width (second-minor tile)


def _round_up(x, m):
    return (x + m - 1) // m * m


# ---------------- Pallas kernels ----------------

def conv_relu_pool_kernel(p_ref, w_ref, b_ref, o_ref):
    """Fused conv (as one big matmul) + 2x2 max-pool + bias + ReLU.

      p_ref: (1, 4*TM, Kp)  im2col patches; rows are pool-offset-major
      w_ref: (Kp, Cp)       flattened, zero-padded conv weights
      b_ref: (1, Cp)        zero-padded bias
      o_ref: (TM, Cp)       pooled activations (lane-dense, Cp = 128)
    """
    tm = o_ref.shape[0]
    y = jnp.dot(p_ref[0], w_ref[...], preferred_element_type=jnp.float32)
    # max over the 4 pixels of each 2x2 pool window (4 contiguous row slabs)
    m = jnp.maximum(jnp.maximum(y[0 * tm:1 * tm], y[1 * tm:2 * tm]),
                    jnp.maximum(y[2 * tm:3 * tm], y[3 * tm:4 * tm]))
    # ReLU(max_g y_g + b) == max_g ReLU(y_g + b): bias/ReLU applied once.
    o_ref[...] = jnp.maximum(m + b_ref[...], 0.0)


def linear_kernel(x_ref, w_ref, b_ref, o_ref):
    o_ref[...] = (jnp.dot(x_ref[...], w_ref[...],
                          preferred_element_type=jnp.float32) + b_ref[...])


# ---------------- wrappers (XLA glue: patch extraction, padding) -------------

def _pool_offset_patches(x_nhwc, k, pad):
    """(B,H,W,C) -> (4, M, k*k*C): im2col patches grouped by 2x2 pool offset.

    Built directly at the pooled resolution (no full-resolution (B,H,W,Kd)
    patch tensor is materialized).  Per-pixel flatten order is (kh, kw, c).
    """
    B, H, W, C = x_nhwc.shape
    Hh, Wh = H // 2, W // 2
    xp = jnp.pad(x_nhwc, ((0, 0), (pad, pad), (pad, pad), (0, 0)))
    offs = []
    for di in range(2):
        for dj in range(2):
            taps = []
            for kh in range(k):
                for kw in range(k):
                    taps.append(xp[:, di + kh:di + kh + H:2,
                                   dj + kw:dj + kw + W:2, :])
            offs.append(jnp.stack(taps, axis=3).reshape(B * Hh * Wh, k * k * C))
    return jnp.stack(offs, axis=0)                         # (4, M, Kd)


def conv_relu_pool(x_nhwc, w_oihw, b, *, k=5, pad=2, max_tile_m=512):
    B, H, W, Cin = x_nhwc.shape
    Cout = w_oihw.shape[0]
    Hh, Wh = H // 2, W // 2
    M = B * Hh * Wh
    Kd = k * k * Cin
    Kp = _round_up(Kd, LANE)                # padded contraction dim
    Cp = _round_up(Cout, LANE)              # lane-dense output channels
    tile_m = min(max_tile_m, _round_up(M, SUB))
    M_pad = _round_up(M, tile_m)
    gm = M_pad // tile_m

    # (4, M, Kd) -> zero-pad -> tile-major (gm, 4*tile_m, Kp)
    p = _pool_offset_patches(x_nhwc, k, pad)
    p = jnp.pad(p, ((0, 0), (0, M_pad - M), (0, Kp - Kd)))
    p = (p.reshape(4, gm, tile_m, Kp)
          .transpose(1, 0, 2, 3)
          .reshape(gm, 4 * tile_m, Kp))

    # torch weight (Cout, Cin, KH, KW) -> (KH, KW, Cin, Cout) -> (Kp, Cp)
    w_mat = jnp.transpose(w_oihw, (2, 3, 1, 0)).reshape(Kd, Cout)
    w_mat = jnp.pad(w_mat, ((0, Kp - Kd), (0, Cp - Cout)))
    bias = jnp.pad(b.reshape(1, Cout), ((0, 0), (0, Cp - Cout)))

    out = pl.pallas_call(
        conv_relu_pool_kernel,
        out_shape=jax.ShapeDtypeStruct((M_pad, Cp), jnp.float32),
        grid_spec=pltpu.PrefetchScalarGridSpec(
            num_scalar_prefetch=0,
            grid=(gm,),
            in_specs=[
                pl.BlockSpec((1, 4 * tile_m, Kp), lambda i: (i, 0, 0)),
                pl.BlockSpec((Kp, Cp), lambda i: (0, 0)),
                pl.BlockSpec((1, Cp), lambda i: (0, 0)),
            ],
            out_specs=pl.BlockSpec((tile_m, Cp), lambda i: (i, 0)),
        ),
        compiler_params=pltpu.CompilerParams(
            dimension_semantics=("parallel",)),
    )(p, w_mat, bias)
    return out[:M, :Cout].reshape(B, Hh, Wh, Cout)


def linear_nhwc_flatten(x_nhwc, fc_w, fc_b):
    """Linear layer; torch's NCHW flatten order folded into the weight."""
    B, Hh, Wh, C = x_nhwc.shape
    Din = Hh * Wh * C
    Dout = fc_w.shape[0]
    Dp = _round_up(Din, LANE)
    Op = _round_up(Dout, LANE)
    Bp = _round_up(B, SUB)

    x = x_nhwc.reshape(B, Din)                              # NHWC flatten (no transpose)
    x = jnp.pad(x, ((0, Bp - B), (0, Dp - Din)))

    # fc_w is (Dout, C*H*W) in (c, h, w) order -> permute columns to (h, w, c)
    w = fc_w.reshape(Dout, C, Hh, Wh).transpose(2, 3, 1, 0).reshape(Din, Dout)
    w = jnp.pad(w, ((0, Dp - Din), (0, Op - Dout)))
    bias = jnp.pad(fc_b.reshape(1, Dout), ((0, 0), (0, Op - Dout)))

    out = pl.pallas_call(
        linear_kernel,
        out_shape=jax.ShapeDtypeStruct((Bp, Op), jnp.float32),
        grid_spec=pltpu.PrefetchScalarGridSpec(
            num_scalar_prefetch=0,
            grid=(1,),
            in_specs=[
                pl.BlockSpec((Bp, Dp), lambda i: (0, 0)),
                pl.BlockSpec((Dp, Op), lambda i: (0, 0)),
                pl.BlockSpec((1, Op), lambda i: (0, 0)),
            ],
            out_specs=pl.BlockSpec((Bp, Op), lambda i: (0, 0)),
        ),
    )(x, w, bias)
    return out[:B, :Dout]


@jax.jit
def cnn_forward(x_nchw, params):
    x = jnp.transpose(x_nchw, (0, 2, 3, 1))                         # NCHW->NHWC
    x = conv_relu_pool(x, params["conv1_w"], params["conv1_b"])     # (B,14,14,16)
    x = conv_relu_pool(x, params["conv2_w"], params["conv2_b"])     # (B,7,7,32)
    return linear_nhwc_flatten(x, params["fc_w"], params["fc_b"])   # (B,10)


# ---------------- pure-JAX reference (for sanity check) ----------------

def cnn_reference(x_nchw, params):
    def conv(x, w, b):
        y = jax.lax.conv_general_dilated(
            x, w, window_strides=(1, 1), padding=((2, 2), (2, 2)),
            dimension_numbers=("NCHW", "OIHW", "NCHW"),
            precision=jax.lax.Precision.HIGHEST)
        return y + b.reshape(1, -1, 1, 1)

    def pool2(x):
        B, C, H, W = x.shape
        return jnp.max(x.reshape(B, C, H // 2, 2, W // 2, 2), axis=(3, 5))

    x = pool2(jax.nn.relu(conv(x_nchw, params["conv1_w"], params["conv1_b"])))
    x = pool2(jax.nn.relu(conv(x, params["conv2_w"], params["conv2_b"])))
    x = x.reshape(x.shape[0], -1)
    return x @ params["fc_w"].T + params["fc_b"]


def init_params(key):
    ks = jax.random.split(key, 6)

    def unif(k, shape, fan_in):
        bound = 1.0 / (fan_in ** 0.5)
        return jax.random.uniform(k, shape, jnp.float32, -bound, bound)

    return {
        "conv1_w": unif(ks[0], (16, 1, 5, 5), 1 * 5 * 5),
        "conv1_b": unif(ks[1], (16,), 1 * 5 * 5),
        "conv2_w": unif(ks[2], (32, 16, 5, 5), 16 * 5 * 5),
        "conv2_b": unif(ks[3], (32,), 16 * 5 * 5),
        "fc_w": unif(ks[4], (10, 32 * 7 * 7), 32 * 7 * 7),
        "fc_b": unif(ks[5], (10,), 32 * 7 * 7),
    }


if __name__ == "__main__":
    key = jax.random.PRNGKey(0)
    k_x, k_p = jax.random.split(key)
    params = init_params(k_p)

    # The Linear(32*7*7, 10) layer fixes the spatial size to 28x28 (MNIST-like).
    x = jax.random.normal(k_x, (2, 1, 28, 28), jnp.float32)

    out = jax.block_until_ready(cnn_forward(x, params))
    assert out.shape == (2, 10) and out.dtype == jnp.float32

    ref = cnn_reference(x, params)
    max_diff = float(jnp.max(jnp.abs(out - ref)))
    assert jnp.allclose(out, ref, atol=1e-2, rtol=1e-2), f"max abs diff {max_diff}"

    print("KERNEL_OK")
</pallas_src>

<mosaic_0001>
module attributes {stable_mosaic.version = 11 : i64} {
  func.func @conv_relu_pool_kernel(%arg0: i32, %arg1: memref<1x1568x128xf32, #tpu.memory_space<vmem>>, %arg2: memref<128x128xf32, #tpu.memory_space<vmem>>, %arg3: memref<1x128xf32, #tpu.memory_space<vmem>>, %arg4: memref<392x128xf32, #tpu.memory_space<vmem>>) attributes {dimension_semantics = [#tpu.dimension_semantics<parallel>], iteration_bounds = array<i64: 1>, scalar_prefetch = 0 : i64, scratch_operands = 0 : i64, tpu.core_type = #tpu.core_type<tc>, window_params = [{transform_indices = @transform_0, window_bounds = array<i64: 1, 1568, 128>}, {pipeline_mode = #tpu.pipeline_mode<synchronous>, transform_indices = @transform_1, window_bounds = array<i64: 128, 128>}, {pipeline_mode = #tpu.pipeline_mode<synchronous>, transform_indices = @transform_2, window_bounds = array<i64: 1, 128>}, {transform_indices = @transform_3, window_bounds = array<i64: 392, 128>}]} {
    %c0 = arith.constant 0 : index
    %c0_0 = arith.constant 0 : index
    %c0_1 = arith.constant 0 : index
    %0 = vector.load %arg1[%c0, %c0_0, %c0_1] : memref<1x1568x128xf32, #tpu.memory_space<vmem>>, vector<1x1568x128xf32>
    %1 = vector.shape_cast %0 : vector<1x1568x128xf32> to vector<1568x128xf32>
    %c0_2 = arith.constant 0 : index
    %c0_3 = arith.constant 0 : index
    %2 = vector.load %arg2[%c0_2, %c0_3] : memref<128x128xf32, #tpu.memory_space<vmem>>, vector<128x128xf32>
    %cst = arith.constant dense<0.000000e+00> : vector<1568x128xf32>
    %3 = tpu.matmul %1, %2, %cst {dimension_numbers = #tpu.dot_dimension_numbers<[1], [0], [0], [1], [0, 0, 1, 1], [], []>} : vector<1568x128xf32>, vector<128x128xf32>, vector<1568x128xf32> -> vector<1568x128xf32>
    %4 = vector.extract_strided_slice %3 {offsets = [0, 0], sizes = [392, 128], strides = [1, 1]} : vector<1568x128xf32> to vector<392x128xf32>
    %5 = vector.extract_strided_slice %3 {offsets = [392, 0], sizes = [392, 128], strides = [1, 1]} : vector<1568x128xf32> to vector<392x128xf32>
    %6 = arith.maximumf %4, %5 : vector<392x128xf32>
    %7 = vector.extract_strided_slice %3 {offsets = [784, 0], sizes = [392, 128], strides = [1, 1]} : vector<1568x128xf32> to vector<392x128xf32>
    %8 = vector.extract_strided_slice %3 {offsets = [1176, 0], sizes = [392, 128], strides = [1, 1]} : vector<1568x128xf32> to vector<392x128xf32>
    %9 = arith.maximumf %7, %8 : vector<392x128xf32>
    %10 = arith.maximumf %6, %9 : vector<392x128xf32>
    %c0_4 = arith.constant 0 : index
    %c0_5 = arith.constant 0 : index
    %11 = vector.load %arg3[%c0_4, %c0_5] : memref<1x128xf32, #tpu.memory_space<vmem>>, vector<1x128xf32>
    %12 = vector.broadcast %11 : vector<1x128xf32> to vector<392x128xf32>
    %13 = arith.addf %10, %12 : vector<392x128xf32>
    %cst_6 = arith.constant 0.000000e+00 : f32
    %14 = vector.broadcast %cst_6 : f32 to vector<392x128xf32>
    %15 = arith.maximumf %13, %14 : vector<392x128xf32>
    %c0_7 = arith.constant 0 : index
    %c0_8 = arith.constant 0 : index
    %16 = vector.load %arg4[%c0_7, %c0_8] : memref<392x128xf32, #tpu.memory_space<vmem>>, vector<392x128xf32>
    tpu.vector_store %arg4[%c0_7, %c0_8], %15 {strides = array<i32>} : memref<392x128xf32, #tpu.memory_space<vmem>>, vector<392x128xf32>,
    return
  }
  func.func @transform_0(%arg0: i32) -> (i32, i32, i32) {
    %c0_i32 = arith.constant 0 : i32
    %c0_i32_0 = arith.constant 0 : i32
    %c0_i32_1 = arith.constant 0 : i32
    return %arg0, %c0_i32, %c0_i32_0 : i32, i32, i32
  }
  func.func @transform_1(%arg0: i32) -> (i32, i32) {
    %c0_i32 = arith.constant 0 : i32
    %c0_i32_0 = arith.constant 0 : i32
    %c0_i32_1 = arith.constant 0 : i32
    return %c0_i32, %c0_i32_0 : i32, i32
  }
  func.func @transform_2(%arg0: i32) -> (i32, i32) {
    %c0_i32 = arith.constant 0 : i32
    %c0_i32_0 = arith.constant 0 : i32
    %c0_i32_1 = arith.constant 0 : i32
    return %c0_i32, %c0_i32_0 : i32, i32
  }
  func.func @transform_3(%arg0: i32) -> (i32, i32) {
    %c0_i32 = arith.constant 0 : i32
    %c0_i32_0 = arith.constant 0 : i32
    return %arg0, %c0_i32 : i32, i32
  }
}

module attributes {stable_mosaic.version = 11 : i64} {
  func.func @conv_relu_pool_kernel(%arg0: i32, %arg1: memref<1x416x512xf32, #tpu.memory_space<vmem>>, %arg2: memref<512x128xf32, #tpu.memory_space<vmem>>, %arg3: memref<1x128xf32, #tpu.memory_space<vmem>>, %arg4: memref<104x128xf32, #tpu.memory_space<vmem>>) attributes {dimension_semantics = [#tpu.dimension_semantics<parallel>], iteration_bounds = array<i64: 1>, scalar_prefetch = 0 : i64, scratch_operands = 0 : i64, tpu.core_type = #tpu.core_type<tc>, window_params = [{transform_indices = @transform_0, window_bounds = array<i64: 1, 416, 512>}, {pipeline_mode = #tpu.pipeline_mode<synchronous>, transform_indices = @transform_1, window_bounds = array<i64: 512, 128>}, {pipeline_mode = #tpu.pipeline_mode<synchronous>, transform_indices = @transform_2, window_bounds = array<i64: 1, 128>}, {transform_indices = @transform_3, window_bounds = array<i64: 104, 128>}]} {
    %c0 = arith.constant 0 : index
    %c0_0 = arith.constant 0 : index
    %c0_1 = arith.constant 0 : index
    %0 = vector.load %arg1[%c0, %c0_0, %c0_1] : memref<1x416x512xf32, #tpu.memory_space<vmem>>, vector<1x416x512xf32>
    %1 = vector.shape_cast %0 : vector<1x416x512xf32> to vector<416x512xf32>
    %c0_2 = arith.constant 0 : index
    %c0_3 = arith.constant 0 : index
    %2 = vector.load %arg2[%c0_2, %c0_3] : memref<512x128xf32, #tpu.memory_space<vmem>>, vector<512x128xf32>
    %cst = arith.constant dense<0.000000e+00> : vector<416x128xf32>
    %3 = tpu.matmul %1, %2, %cst {dimension_numbers = #tpu.dot_dimension_numbers<[1], [0], [0], [1], [0, 0, 1, 1], [], []>} : vector<416x512xf32>, vector<512x128xf32>, vector<416x128xf32> -> vector<416x128xf32>
    %4 = vector.extract_strided_slice %3 {offsets = [0, 0], sizes = [104, 128], strides = [1, 1]} : vector<416x128xf32> to vector<104x128xf32>
    %5 = vector.extract_strided_slice %3 {offsets = [104, 0], sizes = [104, 128], strides = [1, 1]} : vector<416x128xf32> to vector<104x128xf32>
    %6 = arith.maximumf %4, %5 : vector<104x128xf32>
    %7 = vector.extract_strided_slice %3 {offsets = [208, 0], sizes = [104, 128], strides = [1, 1]} : vector<416x128xf32> to vector<104x128xf32>
    %8 = vector.extract_strided_slice %3 {offsets = [312, 0], sizes = [104, 128], strides = [1, 1]} : vector<416x128xf32> to vector<104x128xf32>
    %9 = arith.maximumf %7, %8 : vector<104x128xf32>
    %10 = arith.maximumf %6, %9 : vector<104x128xf32>
    %c0_4 = arith.constant 0 : index
    %c0_5 = arith.constant 0 : index
    %11 = vector.load %arg3[%c0_4, %c0_5] : memref<1x128xf32, #tpu.memory_space<vmem>>, vector<1x128xf32>
    %12 = vector.broadcast %11 : vector<1x128xf32> to vector<104x128xf32>
    %13 = arith.addf %10, %12 : vector<104x128xf32>
    %cst_6 = arith.constant 0.000000e+00 : f32
    %14 = vector.broadcast %cst_6 : f32 to vector<104x128xf32>
    %15 = arith.maximumf %13, %14 : vector<104x128xf32>
    %c0_7 = arith.constant 0 : index
    %c0_8 = arith.constant 0 : index
    %16 = vector.load %arg4[%c0_7, %c0_8] : memref<104x128xf32, #tpu.memory_space<vmem>>, vector<104x128xf32>
    tpu.vector_store %arg4[%c0_7, %c0_8], %15 {strides = array<i32>} : memref<104x128xf32, #tpu.memory_space<vmem>>, vector<104x128xf32>,
    return
  }
  func.func @transform_0(%arg0: i32) -> (i32, i32, i32) {
    %c0_i32 = arith.constant 0 : i32
    %c0_i32_0 = arith.constant 0 : i32
    %c0_i32_1 = arith.constant 0 : i32
    return %arg0, %c0_i32, %c0_i32_0 : i32, i32, i32
  }
  func.func @transform_1(%arg0: i32) -> (i32, i32) {
    %c0_i32 = arith.constant 0 : i32
    %c0_i32_0 = arith.constant 0 : i32
    %c0_i32_1 = arith.constant 0 : i32
    return %c0_i32, %c0_i32_0 : i32, i32
  }
  func.func @transform_2(%arg0: i32) -> (i32, i32) {
    %c0_i32 = arith.constant 0 : i32
    %c0_i32_0 = arith.constant 0 : i32
    %c0_i32_1 = arith.constant 0 : i32
    return %c0_i32, %c0_i32_0 : i32, i32
  }
  func.func @transform_3(%arg0: i32) -> (i32, i32) {
    %c0_i32 = arith.constant 0 : i32
    %c0_i32_0 = arith.constant 0 : i32
    return %arg0, %c0_i32 : i32, i32
  }
}

module attributes {stable_mosaic.version = 11 : i64} {
  func.func @linear_kernel(%arg0: i32, %arg1: memref<8x1664xf32, #tpu.memory_space<vmem>>, %arg2: memref<1664x128xf32, #tpu.memory_space<vmem>>, %arg3: memref<1x128xf32, #tpu.memory_space<vmem>>, %arg4: memref<8x128xf32, #tpu.memory_space<vmem>>) attributes {dimension_semantics = [#tpu.dimension_semantics<arbitrary>], iteration_bounds = array<i64: 1>, scalar_prefetch = 0 : i64, scratch_operands = 0 : i64, tpu.core_type = #tpu.core_type<tc>, window_params = [{pipeline_mode = #tpu.pipeline_mode<synchronous>, transform_indices = @transform_0, window_bounds = array<i64: 8, 1664>}, {pipeline_mode = #tpu.pipeline_mode<synchronous>, transform_indices = @transform_1, window_bounds = array<i64: 1664, 128>}, {pipeline_mode = #tpu.pipeline_mode<synchronous>, transform_indices = @transform_2, window_bounds = array<i64: 1, 128>}, {pipeline_mode = #tpu.pipeline_mode<synchronous>, transform_indices = @transform_3, window_bounds = array<i64: 8, 128>}]} {
    %c0 = arith.constant 0 : index
    %c0_0 = arith.constant 0 : index
    %0 = vector.load %arg1[%c0, %c0_0] : memref<8x1664xf32, #tpu.memory_space<vmem>>, vector<8x1664xf32>
    %c0_1 = arith.constant 0 : index
    %c0_2 = arith.constant 0 : index
    %1 = vector.load %arg2[%c0_1, %c0_2] : memref<1664x128xf32, #tpu.memory_space<vmem>>, vector<1664x128xf32>
    %cst = arith.constant dense<0.000000e+00> : vector<8x128xf32>
    %2 = tpu.matmul %0, %1, %cst {dimension_numbers = #tpu.dot_dimension_numbers<[1], [0], [0], [1], [0, 0, 1, 1], [], []>} : vector<8x1664xf32>, vector<1664x128xf32>, vector<8x128xf32> -> vector<8x128xf32>
    %c0_3 = arith.constant 0 : index
    %c0_4 = arith.constant 0 : index
    %3 = vector.load %arg3[%c0_3, %c0_4] : memref<1x128xf32, #tpu.memory_space<vmem>>, vector<1x128xf32>
    %4 = vector.broadcast %3 : vector<1x128xf32> to vector<8x128xf32>
    %5 = arith.addf %2, %4 : vector<8x128xf32>
    %c0_5 = arith.constant 0 : index
    %c0_6 = arith.constant 0 : index
    %6 = vector.load %arg4[%c0_5, %c0_6] : memref<8x128xf32, #tpu.memory_space<vmem>>, vector<8x128xf32>
    tpu.vector_store %arg4[%c0_5, %c0_6], %5 {strides = array<i32>} : memref<8x128xf32, #tpu.memory_space<vmem>>, vector<8x128xf32>,
    return
  }
  func.func @transform_0(%arg0: i32) -> (i32, i32) {
    %c0_i32 = arith.constant 0 : i32
    %c0_i32_0 = arith.constant 0 : i32
    %c0_i32_1 = arith.constant 0 : i32
    return %c0_i32, %c0_i32_0 : i32, i32
  }
  func.func @transform_1(%arg0: i32) -> (i32, i32) {
    %c0_i32 = arith.constant 0 : i32
    %c0_i32_0 = arith.constant 0 : i32
    %c0_i32_1 = arith.constant 0 : i32
    return %c0_i32, %c0_i32_0 : i32, i32
  }
  func.func @transform_2(%arg0: i32) -> (i32, i32) {
    %c0_i32 = arith.constant 0 : i32
    %c0_i32_0 = arith.constant 0 : i32
    %c0_i32_1 = arith.constant 0 : i32
    return %c0_i32, %c0_i32_0 : i32, i32
  }
  func.func @transform_3(%arg0: i32) -> (i32, i32) {
    %c0_i32 = arith.constant 0 : i32
    %c0_i32_0 = arith.constant 0 : i32
    %c0_i32_1 = arith.constant 0 : i32
    return %c0_i32, %c0_i32_0 : i32, i32
  }
}

</mosaic_0001>

<bundles_post_ra>
// kernel: cnn_forward.3
= control target key start
LH: loop header
LB: loop body
LE: loop exit
PB: predicated region body
PF: predicated region fallthrough
CT: control target
= control target key end

     0   :  { %s2045_s1 = inlined_call_operand.vmem [shape: f32[128,128], index: 1, kind: input, shape index: {}]   ;;  %s2046_s0 = inlined_call_operand.vmem [shape: f32[1,1568,128], index: 0, kind: input, shape index: {}]   ;;  %s2047_s2 = inlined_call_operand.vmem [shape: f32[1,128], index: 2, kind: input, shape index: {}]   ;;  %s2048_s3 = inlined_call_operand.vmem [shape: f32[392,128], index: 3, kind: output, shape index: {}]  }
   0x1   :  { %v225_v0 = vld [vmem:[%s2045_s1 + $0x78] sm:$0xff]  ;;  %v224_v1 = vld [vmem:[%s2045_s1 + $0x70] sm:$0xff]  ;;  %v223_v2 = vld [vmem:[%s2045_s1 + $0x68] sm:$0xff] }
   0x2   :  { %1134 = vmatpush.msra.mxu2 %v225_v0  ;;  %1135 = vmatpush.msra.mxu3 %v225_v0  ;;  %v222_v3 = vld [vmem:[%s2045_s1 + $0x60] sm:$0xff]  ;;  %v221_v4 = vld [vmem:[%s2045_s1 + $0x58] sm:$0xff]  ;;  %v220_v5 = vld [vmem:[%s2045_s1 + $0x50] sm:$0xff] }
   0x3   :  { %226 = vmatpush.msra.mxu0 %v225_v0  ;;  %1133 = vmatpush.msra.mxu1 %v225_v0  ;;  %v219_v6 = vld [vmem:[%s2045_s1 + $0x48] sm:$0xff]  ;;  %v218_v7 = vld [vmem:[%s2045_s1 + $0x40] sm:$0xff]  ;;  %v217_v8 = vld [vmem:[%s2045_s1 + $0x38] sm:$0xff] }
   0x4   :  { %1137 = vmatpush.msra.mxu2 %v224_v1  ;;  %1138 = vmatpush.msra.mxu3 %v224_v1  ;;  %v216_v9 = vld [vmem:[%s2045_s1 + $0x30] sm:$0xff]  ;;  %v215_v10 = vld [vmem:[%s2045_s1 + $0x28] sm:$0xff]  ;;  %v214_v11 = vld [vmem:[%s2045_s1 + $0x20] sm:$0xff] }
   0x5   :  { %227 = vmatpush.msra.mxu0 %v224_v1  ;;  %1136 = vmatpush.msra.mxu1 %v224_v1  ;;  %v213_v12 = vld [vmem:[%s2045_s1 + $0x18] sm:$0xff]  ;;  %v212_v13 = vld [vmem:[%s2045_s1 + $0x10] sm:$0xff]  ;;  %v211_v14 = vld [vmem:[%s2045_s1 + $0x8] sm:$0xff] }
   0x6   :  { %1140 = vmatpush.msra.mxu2 %v223_v2  ;;  %1141 = vmatpush.msra.mxu3 %v223_v2  ;;  %v210_v15 = vld [vmem:[%s2045_s1] sm:$0xff]  ;;  %v112_v16 = vld [vmem:[%s2046_s0 + $0x310] sm:$0xff]  ;;  %v161_v17 = vld [vmem:[%s2046_s0 + $0x498] sm:$0xff] }
   0x7   :  { %228 = vmatpush.msra.mxu0 %v223_v2  ;;  %1139 = vmatpush.msra.mxu1 %v223_v2  ;;  %v14_v18 = vld [vmem:[%s2046_s0] sm:$0xff]  ;;  %v63_v19 = vld [vmem:[%s2046_s0 + $0x188] sm:$0xff]  ;;  %v113_v20 = vld [vmem:[%s2046_s0 + $0x318] sm:$0xff] }
   0x8   :  { %1143 = vmatpush.msra.mxu2 %v222_v3  ;;  %1144 = vmatpush.msra.mxu3 %v222_v3  ;;  %v162_v21 = vld [vmem:[%s2046_s0 + $0x4a0] sm:$0xff]  ;;  %v15_v22 = vld [vmem:[%s2046_s0 + $0x8] sm:$0xff]  ;;  %v64_v23 = vld [vmem:[%s2046_s0 + $0x190] sm:$0xff] }
   0x9   :  { %229 = vmatpush.msra.mxu0 %v222_v3  ;;  %1142 = vmatpush.msra.mxu1 %v222_v3  ;;  %v114_v24 = vld [vmem:[%s2046_s0 + $0x320] sm:$0xff]  ;;  %v163_v25 = vld [vmem:[%s2046_s0 + $0x4a8] sm:$0xff]  ;;  %v16_v26 = vld [vmem:[%s2046_s0 + $0x10] sm:$0xff] }
   0xa   :  { %1146 = vmatpush.msra.mxu2 %v221_v4  ;;  %1147 = vmatpush.msra.mxu3 %v221_v4  ;;  %v65_v27 = vld [vmem:[%s2046_s0 + $0x198] sm:$0xff]  ;;  %v115_v28 = vld [vmem:[%s2046_s0 + $0x328] sm:$0xff]  ;;  %v164_v29 = vld [vmem:[%s2046_s0 + $0x4b0] sm:$0xff] }
   0xb   :  { %230 = vmatpush.msra.mxu0 %v221_v4  ;;  %1145 = vmatpush.msra.mxu1 %v221_v4  ;;  %v17_v30 = vld [vmem:[%s2046_s0 + $0x18] sm:$0xff]  ;;  %v66_v31 = vld [vmem:[%s2046_s0 + $0x1a0] sm:$0xff]  ;;  %v116_v32 = vld [vmem:[%s2046_s0 + $0x330] sm:$0xff] }
   0xc   :  { %1149 = vmatpush.msra.mxu2 %v220_v5  ;;  %1150 = vmatpush.msra.mxu3 %v220_v5  ;;  %v165_v33 = vld [vmem:[%s2046_s0 + $0x4b8] sm:$0xff]  ;;  %v18_v34 = vld [vmem:[%s2046_s0 + $0x20] sm:$0xff]  ;;  %v67_v35 = vld [vmem:[%s2046_s0 + $0x1a8] sm:$0xff] }
   0xd   :  { %231 = vmatpush.msra.mxu0 %v220_v5  ;;  %1148 = vmatpush.msra.mxu1 %v220_v5  ;;  %v117_v36 = vld [vmem:[%s2046_s0 + $0x338] sm:$0xff]  ;;  %v166_v37 = vld [vmem:[%s2046_s0 + $0x4c0] sm:$0xff]  ;;  %v19_v38 = vld [vmem:[%s2046_s0 + $0x28] sm:$0xff] }
   0xe   :  { %1152 = vmatpush.msra.mxu2 %v219_v6  ;;  %1153 = vmatpush.msra.mxu3 %v219_v6  ;;  %v68_v39 = vld [vmem:[%s2046_s0 + $0x1b0] sm:$0xff]  ;;  %v118_v40 = vld [vmem:[%s2046_s0 + $0x340] sm:$0xff]  ;;  %v167_v41 = vld [vmem:[%s2046_s0 + $0x4c8] sm:$0xff] }
   0xf   :  { %232 = vmatpush.msra.mxu0 %v219_v6  ;;  %1151 = vmatpush.msra.mxu1 %v219_v6  ;;  %v20_v42 = vld [vmem:[%s2046_s0 + $0x30] sm:$0xff]  ;;  %v69_v43 = vld [vmem:[%s2046_s0 + $0x1b8] sm:$0xff]  ;;  %v119_v44 = vld [vmem:[%s2046_s0 + $0x348] sm:$0xff] }
  0x10   :  { %1155 = vmatpush.msra.mxu2 %v218_v7  ;;  %1156 = vmatpush.msra.mxu3 %v218_v7  ;;  %v168_v45 = vld [vmem:[%s2046_s0 + $0x4d0] sm:$0xff]  ;;  %v21_v46 = vld [vmem:[%s2046_s0 + $0x38] sm:$0xff]  ;;  %v70_v47 = vld [vmem:[%s2046_s0 + $0x1c0] sm:$0xff] }
  0x11   :  { %233 = vmatpush.msra.mxu0 %v218_v7  ;;  %1154 = vmatpush.msra.mxu1 %v218_v7  ;;  %v120_v48 = vld [vmem:[%s2046_s0 + $0x350] sm:$0xff]  ;;  %v169_v49 = vld [vmem:[%s2046_s0 + $0x4d8] sm:$0xff]  ;;  %v22_v50 = vld [vmem:[%s2046_s0 + $0x40] sm:$0xff] }
  0x12   :  { %1158 = vmatpush.msra.mxu2 %v217_v8  ;;  %1159 = vmatpush.msra.mxu3 %v217_v8  ;;  %v71_v51 = vld [vmem:[%s2046_s0 + $0x1c8] sm:$0xff]  ;;  %v121_v52 = vld [vmem:[%s2046_s0 + $0x358] sm:$0xff]  ;;  %v170_v53 = vld [vmem:[%s2046_s0 + $0x4e0] sm:$0xff] }
  0x13   :  { %234 = vmatpush.msra.mxu0 %v217_v8  ;;  %1157 = vmatpush.msra.mxu1 %v217_v8  ;;  %v23_v54 = vld [vmem:[%s2046_s0 + $0x48] sm:$0xff]  ;;  %v72_v55 = vld [vmem:[%s2046_s0 + $0x1d0] sm:$0xff]  ;;  %v122_v56 = vld [vmem:[%s2046_s0 + $0x360] sm:$0xff] }
  0x14   :  { %1161 = vmatpush.msra.mxu2 %v216_v9  ;;  %1162 = vmatpush.msra.mxu3 %v216_v9  ;;  %v171_v57 = vld [vmem:[%s2046_s0 + $0x4e8] sm:$0xff]  ;;  %v24_v58 = vld [vmem:[%s2046_s0 + $0x50] sm:$0xff]  ;;  %v73_v59 = vld [vmem:[%s2046_s0 + $0x1d8] sm:$0xff] }
  0x15   :  { %235 = vmatpush.msra.mxu0 %v216_v9  ;;  %1160 = vmatpush.msra.mxu1 %v216_v9  ;;  %v123_v60 = vld [vmem:[%s2046_s0 + $0x368] sm:$0xff]  ;;  %v172_v61 = vld [vmem:[%s2046_s0 + $0x4f0] sm:$0xff]  ;;  %v25_v62 = vld [vmem:[%s2046_s0 + $0x58] sm:$0xff] }
  0x16   :  { %1164 = vmatpush.msra.mxu2 %v215_v10  ;;  %1165 = vmatpush.msra.mxu3 %v215_v10  ;;  %v74_v63 = vld [vmem:[%s2046_s0 + $0x1e0] sm:$0xff]  ;;  %v124_v0 = vld [vmem:[%s2046_s0 + $0x370] sm:$0xff]  ;;  %v173_v1 = vld [vmem:[%s2046_s0 + $0x4f8] sm:$0xff] }
  0x17   :  { %236 = vmatpush.msra.mxu0 %v215_v10  ;;  %1163 = vmatpush.msra.mxu1 %v215_v10  ;;  %v26_v2 = vld [vmem:[%s2046_s0 + $0x60] sm:$0xff]  ;;  %v75_v3 = vld [vmem:[%s2046_s0 + $0x1e8] sm:$0xff]  ;;  %v125_v4 = vld [vmem:[%s2046_s0 + $0x378] sm:$0xff] }
  0x18   :  { %1167 = vmatpush.msra.mxu2 %v214_v11  ;;  %1168 = vmatpush.msra.mxu3 %v214_v11  ;;  %v174_v5 = vld [vmem:[%s2046_s0 + $0x500] sm:$0xff]  ;;  %v27_v6 = vld [vmem:[%s2046_s0 + $0x68] sm:$0xff]  ;;  %v76_v7 = vld [vmem:[%s2046_s0 + $0x1f0] sm:$0xff] }
  0x19   :  { %237 = vmatpush.msra.mxu0 %v214_v11  ;;  %1166 = vmatpush.msra.mxu1 %v214_v11  ;;  %v126_v8 = vld [vmem:[%s2046_s0 + $0x380] sm:$0xff]  ;;  %v175_v9 = vld [vmem:[%s2046_s0 + $0x508] sm:$0xff]  ;;  %v28_v10 = vld [vmem:[%s2046_s0 + $0x70] sm:$0xff] }
  0x1a   :  { %1170 = vmatpush.msra.mxu2 %v213_v12  ;;  %1171 = vmatpush.msra.mxu3 %v213_v12  ;;  %v77_v11 = vld [vmem:[%s2046_s0 + $0x1f8] sm:$0xff] }
  0x1b   :  { %238 = vmatpush.msra.mxu0 %v213_v12  ;;  %1169 = vmatpush.msra.mxu1 %v213_v12  ;;  %v127_v12 = vld [vmem:[%s2046_s0 + $0x388] sm:$0xff] }
  0x1c   :  { %1173 = vmatpush.msra.mxu2 %v212_v13  ;;  %1174 = vmatpush.msra.mxu3 %v212_v13 }
  0x1d   :  { %239 = vmatpush.msra.mxu0 %v212_v13  ;;  %1172 = vmatpush.msra.mxu1 %v212_v13  ;;  %v176_v13 = vld [vmem:[%s2046_s0 + $0x510] sm:$0xff] }
  0x1e   :  { %1176 = vmatpush.msra.mxu2 %v211_v14  ;;  %1177 = vmatpush.msra.mxu3 %v211_v14 }
  0x1f   :  { %240 = vmatpush.msra.mxu0 %v211_v14  ;;  %1175 = vmatpush.msra.mxu1 %v211_v14  ;;  %v29_v14 = vld [vmem:[%s2046_s0 + $0x78] sm:$0xff] }
  0x20   :  { %1179 = vmatpush.msra.mxu2 %v210_v15  ;;  %1180 = vmatpush.msra.mxu3 %v210_v15 }
  0x21   :  { %536 = vmatmul.f32.vlgmr.msra.gmra.mxu2 %v112_v16  ;;  %683 = vmatmul.f32.vlgmr.msra.gmra.mxu3 %v161_v17  ;;  %v128_v16 = vld [vmem:[%s2046_s0 + $0x390] sm:$0xff]  ;;  %v177_v17 = vld [vmem:[%s2046_s0 + $0x518] sm:$0xff] }
  0x22   :  { %241 = vmatpush.msra.mxu0 %v210_v15  ;;  %1178 = vmatpush.msra.mxu1 %v210_v15  ;;  %v78_v15 = vld [vmem:[%s2046_s0 + $0x200] sm:$0xff] }
  0x23   :  { %242 = vmatmul.f32.vlgmr.msra.gmra.mxu0 %v14_v18  ;;  %389 = vmatmul.f32.vlgmr.msra.gmra.mxu1 %v63_v19 }
  0x29   :  { %539 = vmatmul.f32.gmra.mxu2 %v113_v20  ;;  %686 = vmatmul.f32.gmra.mxu3 %v162_v21  ;;  %v30_v20 = vld [vmem:[%s2046_s0 + $0x80] sm:$0xff]  ;;  %v79_v21 = vld [vmem:[%s2046_s0 + $0x208] sm:$0xff] }
  0x2b   :  { %245 = vmatmul.f32.gmra.mxu0 %v15_v22  ;;  %392 = vmatmul.f32.gmra.mxu1 %v64_v23 }
  0x31   :  { %542 = vmatmul.f32.gmra.mxu2 %v114_v24  ;;  %689 = vmatmul.f32.gmra.mxu3 %v163_v25 }
  0x33   :  { %248 = vmatmul.f32.gmra.mxu0 %v16_v26  ;;  %395 = vmatmul.f32.gmra.mxu1 %v65_v27  ;;  %v1458_v26 = vld [vmem:[%s2047_s2] ss:$0 sm:$0xff]  ;;  %v129_v27 = vld [vmem:[%s2046_s0 + $0x398] sm:$0xff] }
  0x39   :  { %545 = vmatmul.f32.gmra.mxu2 %v115_v28  ;;  %692 = vmatmul.f32.gmra.mxu3 %v164_v29  ;;  %v178_v28 = vld [vmem:[%s2046_s0 + $0x520] sm:$0xff] }
  0x3b   :  { %251 = vmatmul.f32.gmra.mxu0 %v17_v30  ;;  %398 = vmatmul.f32.gmra.mxu1 %v66_v31 }
  0x41   :  { %548 = vmatmul.f32.gmra.mxu2 %v116_v32  ;;  %695 = vmatmul.f32.gmra.mxu3 %v165_v33  ;;  %v31_v32 = vld [vmem:[%s2046_s0 + $0x88] sm:$0xff]  ;;  %v80_v33 = vld [vmem:[%s2046_s0 + $0x210] sm:$0xff] }
  0x43   :  { %254 = vmatmul.f32.gmra.mxu0 %v18_v34  ;;  %401 = vmatmul.f32.gmra.mxu1 %v67_v35 }
  0x49   :  { %551 = vmatmul.f32.gmra.mxu2 %v117_v36  ;;  %698 = vmatmul.f32.gmra.mxu3 %v166_v37 }
  0x4b   :  { %257 = vmatmul.f32.gmra.mxu0 %v19_v38  ;;  %404 = vmatmul.f32.gmra.mxu1 %v68_v39 }
  0x51   :  { %554 = vmatmul.f32.gmra.mxu2 %v118_v40  ;;  %701 = vmatmul.f32.gmra.mxu3 %v167_v41  ;;  %v130_v40 = vld [vmem:[%s2046_s0 + $0x3a0] sm:$0xff]  ;;  %v179_v41 = vld [vmem:[%s2046_s0 + $0x528] sm:$0xff] }
  0x53   :  { %260 = vmatmul.f32.gmra.mxu0 %v20_v42  ;;  %407 = vmatmul.f32.gmra.mxu1 %v69_v43 }
  0x59   :  { %557 = vmatmul.f32.gmra.mxu2 %v119_v44  ;;  %704 = vmatmul.f32.gmra.mxu3 %v168_v45  ;;  %v32_v45 = vld [vmem:[%s2046_s0 + $0x90] sm:$0xff] }
  0x5b   :  { %263 = vmatmul.f32.gmra.mxu0 %v21_v46  ;;  %410 = vmatmul.f32.gmra.mxu1 %v70_v47  ;;  %v81_v46 = vld [vmem:[%s2046_s0 + $0x218] sm:$0xff] }
  0x61   :  { %560 = vmatmul.f32.gmra.mxu2 %v120_v48  ;;  %707 = vmatmul.f32.gmra.mxu3 %v169_v49 }
  0x63   :  { %266 = vmatmul.f32.gmra.mxu0 %v22_v50  ;;  %413 = vmatmul.f32.gmra.mxu1 %v71_v51 }
  0x69   :  { %563 = vmatmul.f32.gmra.mxu2 %v121_v52  ;;  %710 = vmatmul.f32.gmra.mxu3 %v170_v53  ;;  %v131_v53 = vld [vmem:[%s2046_s0 + $0x3a8] sm:$0xff] }
  0x6b   :  { %269 = vmatmul.f32.gmra.mxu0 %v23_v54  ;;  %416 = vmatmul.f32.gmra.mxu1 %v72_v55  ;;  %v180_v54 = vld [vmem:[%s2046_s0 + $0x530] sm:$0xff] }
  0x71   :  { %566 = vmatmul.f32.gmra.mxu2 %v122_v56  ;;  %713 = vmatmul.f32.gmra.mxu3 %v171_v57 }
  0x73   :  { %272 = vmatmul.f32.gmra.mxu0 %v24_v58  ;;  %419 = vmatmul.f32.gmra.mxu1 %v73_v59  ;;  %v33_v58 = vld [vmem:[%s2046_s0 + $0x98] sm:$0xff]  ;;  %v82_v59 = vld [vmem:[%s2046_s0 + $0x220] sm:$0xff] }
  0x79   :  { %569 = vmatmul.f32.gmra.mxu2 %v123_v60  ;;  %716 = vmatmul.f32.gmra.mxu3 %v172_v61 }
  0x7b   :  { %275 = vmatmul.f32.gmra.mxu0 %v25_v62  ;;  %422 = vmatmul.f32.gmra.mxu1 %v74_v63 }
  0x81   :  { %572 = vmatmul.f32.gmra.mxu2 %v124_v0  ;;  %719 = vmatmul.f32.gmra.mxu3 %v173_v1 }
  0x83   :  { %278 = vmatmul.f32.gmra.mxu0 %v26_v2  ;;  %425 = vmatmul.f32.gmra.mxu1 %v75_v3  ;;  %v132_v2 = vld [vmem:[%s2046_s0 + $0x3b0] sm:$0xff]  ;;  %v181_v3 = vld [vmem:[%s2046_s0 + $0x538] sm:$0xff] }
  0x89   :  { %575 = vmatmul.f32.gmra.mxu2 %v125_v4  ;;  %722 = vmatmul.f32.gmra.mxu3 %v174_v5 }
  0x8b   :  { %281 = vmatmul.f32.gmra.mxu0 %v27_v6  ;;  %428 = vmatmul.f32.gmra.mxu1 %v76_v7  ;;  %v34_v7 = vld [vmem:[%s2046_s0 + $0xa0] sm:$0xff] }
  0x91   :  { %578 = vmatmul.f32.gmra.mxu2 %v126_v8  ;;  %725 = vmatmul.f32.gmra.mxu3 %v175_v9  ;;  %v83_v8 = vld [vmem:[%s2046_s0 + $0x228] sm:$0xff] }
  0x93   :  { %284 = vmatmul.f32.gmra.mxu0 %v28_v10  ;;  %431 = vmatmul.f32.gmra.mxu1 %v77_v11 }
  0x99   :  { %581 = vmatmul.f32.gmra.mxu2 %v127_v12  ;;  %728 = vmatmul.f32.gmra.mxu3 %v176_v13 }
  0x9b   :  { %287 = vmatmul.f32.gmra.mxu0 %v29_v14  ;;  %434 = vmatmul.f32.gmra.mxu1 %v78_v15  ;;  %v133_v15 = vld [vmem:[%s2046_s0 + $0x3b8] sm:$0xff] }
  0xa0   :  { %v243_v18 = vpop.f32.mrf.mxu0  ;;  %v390_v19 = vpop.f32.mrf.mxu1 }
  0xa1   :  { %584 = vmatmul.f32.gmra.mxu2 %v128_v16  ;;  %731 = vmatmul.f32.gmra.mxu3 %v177_v17  ;;  %v831_v22 = vmax.f32 %v243_v18, %v390_v19  ;;  %v182_v16 = vld [vmem:[%s2046_s0 + $0x540] sm:$0xff] }
  0xa3   :  { %290 = vmatmul.f32.gmra.mxu0 %v30_v20  ;;  %437 = vmatmul.f32.gmra.mxu1 %v79_v21  ;;  %v35_v20 = vld [vmem:[%s2046_s0 + $0xa8] sm:$0xff]  ;;  %v84_v21 = vld [vmem:[%s2046_s0 + $0x230] sm:$0xff] }
  0xa4   :  { %v537_v23 = vpop.f32.mrf.mxu2  ;;  %v684_v24 = vpop.f32.mrf.mxu3 }
  0xa5   :  { %v880_v25 = vmax.f32 %v537_v23, %v684_v24 }
  0xa7   :  { %v929_v29 = vmax.f32 %v831_v22, %v880_v25 }
  0xa8   :  { %v246_v30 = vpop.f32.mrf.mxu0  ;;  %v393_v31 = vpop.f32.mrf.mxu1 }
  0xa9   :  { %v982_v34 = vadd.f32 %v1458_v26, %v929_v29  ;;  %587 = vmatmul.f32.gmra.mxu2 %v129_v27  ;;  %734 = vmatmul.f32.gmra.mxu3 %v178_v28  ;;  %v832_v36 = vmax.f32 %v246_v30, %v393_v31  ;;  %v134_v29 = vld [vmem:[%s2046_s0 + $0x3c0] sm:$0xff]  ;;  %v183_v30 = vld [vmem:[%s2046_s0 + $0x548] sm:$0xff] }
  0xab   :  { %v1031_v35 = vmax.f32 %v982_v34, 0.0  ;;  %293 = vmatmul.f32.gmra.mxu0 %v31_v32  ;;  %440 = vmatmul.f32.gmra.mxu1 %v80_v33  ;;  %v36_v34 = vld [vmem:[%s2046_s0 + $0xb0] sm:$0xff] }
  0xac   :  { %v540_v37 = vpop.f32.mrf.mxu2  ;;  %v687_v38 = vpop.f32.mrf.mxu3 }
  0xad   :  { %1080 = vst [vmem:[%s2048_s3] sm:$0xff] %v1031_v35  ;;  %v881_v39 = vmax.f32 %v540_v37, %v687_v38  ;;  %v85_v35 = vld [vmem:[%s2046_s0 + $0x238] sm:$0xff] }
  0xaf   :  { %v930_v42 = vmax.f32 %v832_v36, %v881_v39 }
  0xb0   :  { %v249_v43 = vpop.f32.mrf.mxu0  ;;  %v396_v44 = vpop.f32.mrf.mxu1 }
  0xb1   :  { %v983_v47 = vadd.f32 %v1458_v26, %v930_v42  ;;  %590 = vmatmul.f32.gmra.mxu2 %v130_v40  ;;  %737 = vmatmul.f32.gmra.mxu3 %v179_v41  ;;  %v833_v49 = vmax.f32 %v249_v43, %v396_v44  ;;  %v135_v42 = vld [vmem:[%s2046_s0 + $0x3c8] sm:$0xff]  ;;  %v184_v43 = vld [vmem:[%s2046_s0 + $0x550] sm:$0xff] }
  0xb3   :  { %v1032_v48 = vmax.f32 %v983_v47, 0.0  ;;  %296 = vmatmul.f32.gmra.mxu0 %v32_v45  ;;  %443 = vmatmul.f32.gmra.mxu1 %v81_v46  ;;  %v37_v47 = vld [vmem:[%s2046_s0 + $0xb8] sm:$0xff] }
  0xb4   :  { %v543_v50 = vpop.f32.mrf.mxu2  ;;  %v690_v51 = vpop.f32.mrf.mxu3 }
  0xb5   :  { %1081 = vst [vmem:[%s2048_s3 + $0x8] sm:$0xff] %v1032_v48  ;;  %v882_v52 = vmax.f32 %v543_v50, %v690_v51  ;;  %v86_v48 = vld [vmem:[%s2046_s0 + $0x240] sm:$0xff] }
  0xb7   :  { %v931_v55 = vmax.f32 %v833_v49, %v882_v52 }
  0xb8   :  { %v252_v56 = vpop.f32.mrf.mxu0  ;;  %v399_v57 = vpop.f32.mrf.mxu1 }
  0xb9   :  { %v984_v60 = vadd.f32 %v1458_v26, %v931_v55  ;;  %593 = vmatmul.f32.gmra.mxu2 %v131_v53  ;;  %740 = vmatmul.f32.gmra.mxu3 %v180_v54  ;;  %v834_v62 = vmax.f32 %v252_v56, %v399_v57  ;;  %v136_v55 = vld [vmem:[%s2046_s0 + $0x3d0] sm:$0xff]  ;;  %v185_v56 = vld [vmem:[%s2046_s0 + $0x558] sm:$0xff] }
  0xbb   :  { %v1033_v61 = vmax.f32 %v984_v60, 0.0  ;;  %299 = vmatmul.f32.gmra.mxu0 %v33_v58  ;;  %446 = vmatmul.f32.gmra.mxu1 %v82_v59  ;;  %v38_v60 = vld [vmem:[%s2046_s0 + $0xc0] sm:$0xff] }
  0xbc   :  { %v546_v63 = vpop.f32.mrf.mxu2  ;;  %v693_v0 = vpop.f32.mrf.mxu3 }
  0xbd   :  { %1082 = vst [vmem:[%s2048_s3 + $0x10] sm:$0xff] %v1033_v61  ;;  %v883_v1 = vmax.f32 %v546_v63, %v693_v0  ;;  %v87_v61 = vld [vmem:[%s2046_s0 + $0x248] sm:$0xff] }
  0xbf   :  { %v932_v4 = vmax.f32 %v834_v62, %v883_v1 }
  0xc0   :  { %v255_v5 = vpop.f32.mrf.mxu0  ;;  %v402_v6 = vpop.f32.mrf.mxu1 }
  0xc1   :  { %v985_v9 = vadd.f32 %v1458_v26, %v932_v4  ;;  %596 = vmatmul.f32.gmra.mxu2 %v132_v2  ;;  %743 = vmatmul.f32.gmra.mxu3 %v181_v3  ;;  %v835_v11 = vmax.f32 %v255_v5, %v402_v6  ;;  %v137_v4 = vld [vmem:[%s2046_s0 + $0x3d8] sm:$0xff]  ;;  %v186_v5 = vld [vmem:[%s2046_s0 + $0x560] sm:$0xff] }
  0xc3   :  { %v1034_v10 = vmax.f32 %v985_v9, 0.0  ;;  %302 = vmatmul.f32.gmra.mxu0 %v34_v7  ;;  %449 = vmatmul.f32.gmra.mxu1 %v83_v8  ;;  %v39_v9 = vld [vmem:[%s2046_s0 + $0xc8] sm:$0xff] }
  0xc4   :  { %v549_v12 = vpop.f32.mrf.mxu2  ;;  %v696_v13 = vpop.f32.mrf.mxu3 }
  0xc5   :  { %1083 = vst [vmem:[%s2048_s3 + $0x18] sm:$0xff] %v1034_v10  ;;  %v884_v14 = vmax.f32 %v549_v12, %v696_v13  ;;  %v88_v10 = vld [vmem:[%s2046_s0 + $0x250] sm:$0xff] }
  0xc7   :  { %v933_v17 = vmax.f32 %v835_v11, %v884_v14 }
  0xc8   :  { %v258_v18 = vpop.f32.mrf.mxu0  ;;  %v405_v19 = vpop.f32.mrf.mxu1 }
  0xc9   :  { %v986_v22 = vadd.f32 %v1458_v26, %v933_v17  ;;  %599 = vmatmul.f32.gmra.mxu2 %v133_v15  ;;  %746 = vmatmul.f32.gmra.mxu3 %v182_v16  ;;  %v836_v24 = vmax.f32 %v258_v18, %v405_v19  ;;  %v138_v17 = vld [vmem:[%s2046_s0 + $0x3e0] sm:$0xff]  ;;  %v187_v18 = vld [vmem:[%s2046_s0 + $0x568] sm:$0xff] }
  0xcb   :  { %v1035_v23 = vmax.f32 %v986_v22, 0.0  ;;  %305 = vmatmul.f32.gmra.mxu0 %v35_v20  ;;  %452 = vmatmul.f32.gmra.mxu1 %v84_v21  ;;  %v40_v22 = vld [vmem:[%s2046_s0 + $0xd0] sm:$0xff] }
  0xcc   :  { %v552_v25 = vpop.f32.mrf.mxu2  ;;  %v699_v27 = vpop.f32.mrf.mxu3 }
  0xcd   :  { %1084 = vst [vmem:[%s2048_s3 + $0x20] sm:$0xff] %v1035_v23  ;;  %v885_v28 = vmax.f32 %v552_v25, %v699_v27  ;;  %v89_v23 = vld [vmem:[%s2046_s0 + $0x258] sm:$0xff] }
  0xcf   :  { %v934_v31 = vmax.f32 %v836_v24, %v885_v28 }
  0xd0   :  { %v261_v32 = vpop.f32.mrf.mxu0  ;;  %v408_v33 = vpop.f32.mrf.mxu1 }
  0xd1   :  { %v987_v36 = vadd.f32 %v1458_v26, %v934_v31  ;;  %602 = vmatmul.f32.gmra.mxu2 %v134_v29  ;;  %749 = vmatmul.f32.gmra.mxu3 %v183_v30  ;;  %v837_v38 = vmax.f32 %v261_v32, %v408_v33  ;;  %v139_v31 = vld [vmem:[%s2046_s0 + $0x3e8] sm:$0xff]  ;;  %v188_v32 = vld [vmem:[%s2046_s0 + $0x570] sm:$0xff] }
  0xd3   :  { %v1036_v37 = vmax.f32 %v987_v36, 0.0  ;;  %308 = vmatmul.f32.gmra.mxu0 %v36_v34  ;;  %455 = vmatmul.f32.gmra.mxu1 %v85_v35  ;;  %v41_v36 = vld [vmem:[%s2046_s0 + $0xd8] sm:$0xff] }
  0xd4   :  { %v555_v39 = vpop.f32.mrf.mxu2  ;;  %v702_v40 = vpop.f32.mrf.mxu3 }
  0xd5   :  { %1085 = vst [vmem:[%s2048_s3 + $0x28] sm:$0xff] %v1036_v37  ;;  %v886_v41 = vmax.f32 %v555_v39, %v702_v40  ;;  %v90_v37 = vld [vmem:[%s2046_s0 + $0x260] sm:$0xff] }
  0xd7   :  { %v935_v44 = vmax.f32 %v837_v38, %v886_v41 }
  0xd8   :  { %v264_v45 = vpop.f32.mrf.mxu0  ;;  %v411_v46 = vpop.f32.mrf.mxu1 }
  0xd9   :  { %v988_v49 = vadd.f32 %v1458_v26, %v935_v44  ;;  %605 = vmatmul.f32.gmra.mxu2 %v135_v42  ;;  %752 = vmatmul.f32.gmra.mxu3 %v184_v43  ;;  %v838_v51 = vmax.f32 %v264_v45, %v411_v46  ;;  %v140_v44 = vld [vmem:[%s2046_s0 + $0x3f0] sm:$0xff]  ;;  %v189_v45 = vld [vmem:[%s2046_s0 + $0x578] sm:$0xff] }
  0xdb   :  { %v1037_v50 = vmax.f32 %v988_v49, 0.0  ;;  %311 = vmatmul.f32.gmra.mxu0 %v37_v47  ;;  %458 = vmatmul.f32.gmra.mxu1 %v86_v48  ;;  %v42_v49 = vld [vmem:[%s2046_s0 + $0xe0] sm:$0xff] }
  0xdc   :  { %v558_v52 = vpop.f32.mrf.mxu2  ;;  %v705_v53 = vpop.f32.mrf.mxu3 }
  0xdd   :  { %1086 = vst [vmem:[%s2048_s3 + $0x30] sm:$0xff] %v1037_v50  ;;  %v887_v54 = vmax.f32 %v558_v52, %v705_v53  ;;  %v91_v50 = vld [vmem:[%s2046_s0 + $0x268] sm:$0xff] }
  0xdf   :  { %v936_v57 = vmax.f32 %v838_v51, %v887_v54 }
  0xe0   :  { %v267_v58 = vpop.f32.mrf.mxu0  ;;  %v414_v59 = vpop.f32.mrf.mxu1 }
  0xe1   :  { %v989_v62 = vadd.f32 %v1458_v26, %v936_v57  ;;  %608 = vmatmul.f32.gmra.mxu2 %v136_v55  ;;  %755 = vmatmul.f32.gmra.mxu3 %v185_v56  ;;  %v839_v0 = vmax.f32 %v267_v58, %v414_v59  ;;  %v141_v57 = vld [vmem:[%s2046_s0 + $0x3f8] sm:$0xff]  ;;  %v190_v58 = vld [vmem:[%s2046_s0 + $0x580] sm:$0xff] }
  0xe3   :  { %v1038_v63 = vmax.f32 %v989_v62, 0.0  ;;  %314 = vmatmul.f32.gmra.mxu0 %v38_v60  ;;  %461 = vmatmul.f32.gmra.mxu1 %v87_v61  ;;  %v43_v62 = vld [vmem:[%s2046_s0 + $0xe8] sm:$0xff] }
  0xe4   :  { %v561_v1 = vpop.f32.mrf.mxu2  ;;  %v708_v2 = vpop.f32.mrf.mxu3 }
  0xe5   :  { %1087 = vst [vmem:[%s2048_s3 + $0x38] sm:$0xff] %v1038_v63  ;;  %v888_v3 = vmax.f32 %v561_v1, %v708_v2  ;;  %v92_v63 = vld [vmem:[%s2046_s0 + $0x270] sm:$0xff] }
  0xe7   :  { %v937_v6 = vmax.f32 %v839_v0, %v888_v3 }
  0xe8   :  { %v270_v7 = vpop.f32.mrf.mxu0  ;;  %v417_v8 = vpop.f32.mrf.mxu1 }
  0xe9   :  { %v990_v11 = vadd.f32 %v1458_v26, %v937_v6  ;;  %611 = vmatmul.f32.gmra.mxu2 %v137_v4  ;;  %758 = vmatmul.f32.gmra.mxu3 %v186_v5  ;;  %v840_v13 = vmax.f32 %v270_v7, %v417_v8  ;;  %v142_v6 = vld [vmem:[%s2046_s0 + $0x400] sm:$0xff]  ;;  %v191_v7 = vld [vmem:[%s2046_s0 + $0x588] sm:$0xff] }
  0xeb   :  { %v1039_v12 = vmax.f32 %v990_v11, 0.0  ;;  %317 = vmatmul.f32.gmra.mxu0 %v39_v9  ;;  %464 = vmatmul.f32.gmra.mxu1 %v88_v10  ;;  %v44_v11 = vld [vmem:[%s2046_s0 + $0xf0] sm:$0xff] }
  0xec   :  { %v564_v14 = vpop.f32.mrf.mxu2  ;;  %v711_v15 = vpop.f32.mrf.mxu3 }
  0xed   :  { %1088 = vst [vmem:[%s2048_s3 + $0x40] sm:$0xff] %v1039_v12  ;;  %v889_v16 = vmax.f32 %v564_v14, %v711_v15  ;;  %v93_v12 = vld [vmem:[%s2046_s0 + $0x278] sm:$0xff] }
  0xef   :  { %v938_v19 = vmax.f32 %v840_v13, %v889_v16 }
  0xf0   :  { %v273_v20 = vpop.f32.mrf.mxu0  ;;  %v420_v21 = vpop.f32.mrf.mxu1 }
  0xf1   :  { %v991_v24 = vadd.f32 %v1458_v26, %v938_v19  ;;  %614 = vmatmul.f32.gmra.mxu2 %v138_v17  ;;  %761 = vmatmul.f32.gmra.mxu3 %v187_v18  ;;  %v841_v27 = vmax.f32 %v273_v20, %v420_v21  ;;  %v143_v19 = vld [vmem:[%s2046_s0 + $0x408] sm:$0xff]  ;;  %v192_v20 = vld [vmem:[%s2046_s0 + $0x590] sm:$0xff] }
  0xf3   :  { %v1040_v25 = vmax.f32 %v991_v24, 0.0  ;;  %320 = vmatmul.f32.gmra.mxu0 %v40_v22  ;;  %467 = vmatmul.f32.gmra.mxu1 %v89_v23  ;;  %v45_v24 = vld [vmem:[%s2046_s0 + $0xf8] sm:$0xff] }
  0xf4   :  { %v567_v28 = vpop.f32.mrf.mxu2  ;;  %v714_v29 = vpop.f32.mrf.mxu3 }
  0xf5   :  { %1089 = vst [vmem:[%s2048_s3 + $0x48] sm:$0xff] %v1040_v25  ;;  %v890_v30 = vmax.f32 %v567_v28, %v714_v29  ;;  %v94_v25 = vld [vmem:[%s2046_s0 + $0x280] sm:$0xff] }
  0xf7   :  { %v939_v33 = vmax.f32 %v841_v27, %v890_v30 }
  0xf8   :  { %v276_v34 = vpop.f32.mrf.mxu0  ;;  %v423_v35 = vpop.f32.mrf.mxu1 }
  0xf9   :  { %v992_v38 = vadd.f32 %v1458_v26, %v939_v33  ;;  %617 = vmatmul.f32.gmra.mxu2 %v139_v31  ;;  %764 = vmatmul.f32.gmra.mxu3 %v188_v32  ;;  %v842_v40 = vmax.f32 %v276_v34, %v423_v35  ;;  %v144_v33 = vld [vmem:[%s2046_s0 + $0x410] sm:$0xff]  ;;  %v193_v34 = vld [vmem:[%s2046_s0 + $0x598] sm:$0xff] }
  0xfb   :  { %v1041_v39 = vmax.f32 %v992_v38, 0.0  ;;  %323 = vmatmul.f32.gmra.mxu0 %v41_v36  ;;  %470 = vmatmul.f32.gmra.mxu1 %v90_v37  ;;  %v46_v38 = vld [vmem:[%s2046_s0 + $0x100] sm:$0xff] }
  0xfc   :  { %v570_v41 = vpop.f32.mrf.mxu2  ;;  %v717_v42 = vpop.f32.mrf.mxu3 }
  0xfd   :  { %1090 = vst [vmem:[%s2048_s3 + $0x50] sm:$0xff] %v1041_v39  ;;  %v891_v43 = vmax.f32 %v570_v41, %v717_v42  ;;  %v95_v39 = vld [vmem:[%s2046_s0 + $0x288] sm:$0xff] }
  0xff   :  { %v940_v46 = vmax.f32 %v842_v40, %v891_v43 }
 0x100   :  { %v279_v47 = vpop.f32.mrf.mxu0  ;;  %v426_v48 = vpop.f32.mrf.mxu1 }
 0x101   :  { %v993_v51 = vadd.f32 %v1458_v26, %v940_v46  ;;  %620 = vmatmul.f32.gmra.mxu2 %v140_v44  ;;  %767 = vmatmul.f32.gmra.mxu3 %v189_v45  ;;  %v843_v53 = vmax.f32 %v279_v47, %v426_v48  ;;  %v145_v46 = vld [vmem:[%s2046_s0 + $0x418] sm:$0xff]  ;;  %v194_v47 = vld [vmem:[%s2046_s0 + $0x5a0] sm:$0xff] }
 0x103   :  { %v1042_v52 = vmax.f32 %v993_v51, 0.0  ;;  %326 = vmatmul.f32.gmra.mxu0 %v42_v49  ;;  %473 = vmatmul.f32.gmra.mxu1 %v91_v50  ;;  %v47_v51 = vld [vmem:[%s2046_s0 + $0x108] sm:$0xff] }
 0x104   :  { %v573_v54 = vpop.f32.mrf.mxu2  ;;  %v720_v55 = vpop.f32.mrf.mxu3 }
 0x105   :  { %1091 = vst [vmem:[%s2048_s3 + $0x58] sm:$0xff] %v1042_v52  ;;  %v892_v56 = vmax.f32 %v573_v54, %v720_v55  ;;  %v96_v52 = vld [vmem:[%s2046_s0 + $0x290] sm:$0xff] }
 0x107   :  { %v941_v59 = vmax.f32 %v843_v53, %v892_v56 }
 0x108   :  { %v282_v60 = vpop.f32.mrf.mxu0  ;;  %v429_v61 = vpop.f32.mrf.mxu1 }
 0x109   :  { %v994_v0 = vadd.f32 %v1458_v26, %v941_v59  ;;  %623 = vmatmul.f32.gmra.mxu2 %v141_v57  ;;  %770 = vmatmul.f32.gmra.mxu3 %v190_v58  ;;  %v844_v2 = vmax.f32 %v282_v60, %v429_v61  ;;  %v146_v59 = vld [vmem:[%s2046_s0 + $0x420] sm:$0xff]  ;;  %v195_v60 = vld [vmem:[%s2046_s0 + $0x5a8] sm:$0xff] }
 0x10b   :  { %v1043_v1 = vmax.f32 %v994_v0, 0.0  ;;  %329 = vmatmul.f32.gmra.mxu0 %v43_v62  ;;  %476 = vmatmul.f32.gmra.mxu1 %v92_v63  ;;  %v48_v0 = vld [vmem:[%s2046_s0 + $0x110] sm:$0xff] }
 0x10c   :  { %v576_v3 = vpop.f32.mrf.mxu2  ;;  %v723_v4 = vpop.f32.mrf.mxu3 }
 0x10d   :  { %1092 = vst [vmem:[%s2048_s3 + $0x60] sm:$0xff] %v1043_v1  ;;  %v893_v5 = vmax.f32 %v576_v3, %v723_v4  ;;  %v97_v1 = vld [vmem:[%s2046_s0 + $0x298] sm:$0xff] }
 0x10f   :  { %v942_v8 = vmax.f32 %v844_v2, %v893_v5 }
 0x110   :  { %v285_v9 = vpop.f32.mrf.mxu0  ;;  %v432_v10 = vpop.f32.mrf.mxu1 }
 0x111   :  { %v995_v13 = vadd.f32 %v1458_v26, %v942_v8  ;;  %626 = vmatmul.f32.gmra.mxu2 %v142_v6  ;;  %773 = vmatmul.f32.gmra.mxu3 %v191_v7  ;;  %v845_v15 = vmax.f32 %v285_v9, %v432_v10  ;;  %v147_v8 = vld [vmem:[%s2046_s0 + $0x428] sm:$0xff]  ;;  %v196_v9 = vld [vmem:[%s2046_s0 + $0x5b0] sm:$0xff] }
 0x113   :  { %v1044_v14 = vmax.f32 %v995_v13, 0.0  ;;  %332 = vmatmul.f32.gmra.mxu0 %v44_v11  ;;  %479 = vmatmul.f32.gmra.mxu1 %v93_v12  ;;  %v49_v13 = vld [vmem:[%s2046_s0 + $0x118] sm:$0xff] }
 0x114   :  { %v579_v16 = vpop.f32.mrf.mxu2  ;;  %v726_v17 = vpop.f32.mrf.mxu3 }
 0x115   :  { %1093 = vst [vmem:[%s2048_s3 + $0x68] sm:$0xff] %v1044_v14  ;;  %v894_v18 = vmax.f32 %v579_v16, %v726_v17  ;;  %v98_v14 = vld [vmem:[%s2046_s0 + $0x2a0] sm:$0xff] }
 0x117   :  { %v943_v21 = vmax.f32 %v845_v15, %v894_v18 }
 0x118   :  { %v288_v22 = vpop.f32.mrf.mxu0  ;;  %v435_v23 = vpop.f32.mrf.mxu1 }
 0x119   :  { %v996_v27 = vadd.f32 %v1458_v26, %v943_v21  ;;  %629 = vmatmul.f32.gmra.mxu2 %v143_v19  ;;  %776 = vmatmul.f32.gmra.mxu3 %v192_v20  ;;  %v846_v29 = vmax.f32 %v288_v22, %v435_v23  ;;  %v148_v21 = vld [vmem:[%s2046_s0 + $0x430] sm:$0xff]  ;;  %v197_v22 = vld [vmem:[%s2046_s0 + $0x5b8] sm:$0xff] }
 0x11b   :  { %v1045_v28 = vmax.f32 %v996_v27, 0.0  ;;  %335 = vmatmul.f32.gmra.mxu0 %v45_v24  ;;  %482 = vmatmul.f32.gmra.mxu1 %v94_v25  ;;  %v50_v27 = vld [vmem:[%s2046_s0 + $0x120] sm:$0xff] }
 0x11c   :  { %v582_v30 = vpop.f32.mrf.mxu2  ;;  %v729_v31 = vpop.f32.mrf.mxu3 }
 0x11d   :  { %1094 = vst [vmem:[%s2048_s3 + $0x70] sm:$0xff] %v1045_v28  ;;  %v895_v32 = vmax.f32 %v582_v30, %v729_v31  ;;  %v99_v28 = vld [vmem:[%s2046_s0 + $0x2a8] sm:$0xff] }
 0x11f   :  { %v944_v35 = vmax.f32 %v846_v29, %v895_v32 }
 0x120   :  { %v291_v36 = vpop.f32.mrf.mxu0  ;;  %v438_v37 = vpop.f32.mrf.mxu1 }
 0x121   :  { %v997_v40 = vadd.f32 %v1458_v26, %v944_v35  ;;  %632 = vmatmul.f32.gmra.mxu2 %v144_v33  ;;  %779 = vmatmul.f32.gmra.mxu3 %v193_v34  ;;  %v847_v42 = vmax.f32 %v291_v36, %v438_v37  ;;  %v149_v35 = vld [vmem:[%s2046_s0 + $0x438] sm:$0xff]  ;;  %v198_v36 = vld [vmem:[%s2046_s0 + $0x5c0] sm:$0xff] }
 0x123   :  { %v1046_v41 = vmax.f32 %v997_v40, 0.0  ;;  %338 = vmatmul.f32.gmra.mxu0 %v46_v38  ;;  %485 = vmatmul.f32.gmra.mxu1 %v95_v39  ;;  %v51_v40 = vld [vmem:[%s2046_s0 + $0x128] sm:$0xff] }
 0x124   :  { %v585_v43 = vpop.f32.mrf.mxu2  ;;  %v732_v44 = vpop.f32.mrf.mxu3 }
 0x125   :  { %1095 = vst [vmem:[%s2048_s3 + $0x78] sm:$0xff] %v1046_v41  ;;  %v896_v45 = vmax.f32 %v585_v43, %v732_v44  ;;  %v100_v41 = vld [vmem:[%s2046_s0 + $0x2b0] sm:$0xff] }
 0x127   :  { %v945_v48 = vmax.f32 %v847_v42, %v896_v45 }
 0x128   :  { %v294_v49 = vpop.f32.mrf.mxu0  ;;  %v441_v50 = vpop.f32.mrf.mxu1 }
 0x129   :  { %v998_v53 = vadd.f32 %v1458_v26, %v945_v48  ;;  %635 = vmatmul.f32.gmra.mxu2 %v145_v46  ;;  %782 = vmatmul.f32.gmra.mxu3 %v194_v47  ;;  %v848_v55 = vmax.f32 %v294_v49, %v441_v50  ;;  %v150_v48 = vld [vmem:[%s2046_s0 + $0x440] sm:$0xff]  ;;  %v199_v49 = vld [vmem:[%s2046_s0 + $0x5c8] sm:$0xff] }
 0x12b   :  { %v1047_v54 = vmax.f32 %v998_v53, 0.0  ;;  %341 = vmatmul.f32.gmra.mxu0 %v47_v51  ;;  %488 = vmatmul.f32.gmra.mxu1 %v96_v52  ;;  %v52_v53 = vld [vmem:[%s2046_s0 + $0x130] sm:$0xff] }
 0x12c   :  { %v588_v56 = vpop.f32.mrf.mxu2  ;;  %v735_v57 = vpop.f32.mrf.mxu3 }
 0x12d   :  { %1096 = vst [vmem:[%s2048_s3 + $0x80] sm:$0xff] %v1047_v54  ;;  %v897_v58 = vmax.f32 %v588_v56, %v735_v57  ;;  %v101_v54 = vld [vmem:[%s2046_s0 + $0x2b8] sm:$0xff] }
 0x12f   :  { %v946_v61 = vmax.f32 %v848_v55, %v897_v58 }
 0x130   :  { %v297_v62 = vpop.f32.mrf.mxu0  ;;  %v444_v63 = vpop.f32.mrf.mxu1 }
 0x131   :  { %v999_v2 = vadd.f32 %v1458_v26, %v946_v61  ;;  %638 = vmatmul.f32.gmra.mxu2 %v146_v59  ;;  %785 = vmatmul.f32.gmra.mxu3 %v195_v60  ;;  %v849_v4 = vmax.f32 %v297_v62, %v444_v63  ;;  %v151_v61 = vld [vmem:[%s2046_s0 + $0x448] sm:$0xff]  ;;  %v200_v62 = vld [vmem:[%s2046_s0 + $0x5d0] sm:$0xff] }
 0x133   :  { %v1048_v3 = vmax.f32 %v999_v2, 0.0  ;;  %344 = vmatmul.f32.gmra.mxu0 %v48_v0  ;;  %491 = vmatmul.f32.gmra.mxu1 %v97_v1  ;;  %v53_v2 = vld [vmem:[%s2046_s0 + $0x138] sm:$0xff] }
 0x134   :  { %v591_v5 = vpop.f32.mrf.mxu2  ;;  %v738_v6 = vpop.f32.mrf.mxu3 }
 0x135   :  { %1097 = vst [vmem:[%s2048_s3 + $0x88] sm:$0xff] %v1048_v3  ;;  %v898_v7 = vmax.f32 %v591_v5, %v738_v6  ;;  %v102_v3 = vld [vmem:[%s2046_s0 + $0x2c0] sm:$0xff] }
 0x137   :  { %v947_v10 = vmax.f32 %v849_v4, %v898_v7 }
 0x138   :  { %v300_v11 = vpop.f32.mrf.mxu0  ;;  %v447_v12 = vpop.f32.mrf.mxu1 }
 0x139   :  { %v1000_v15 = vadd.f32 %v1458_v26, %v947_v10  ;;  %641 = vmatmul.f32.gmra.mxu2 %v147_v8  ;;  %788 = vmatmul.f32.gmra.mxu3 %v196_v9  ;;  %v850_v17 = vmax.f32 %v300_v11, %v447_v12  ;;  %v152_v10 = vld [vmem:[%s2046_s0 + $0x450] sm:$0xff]  ;;  %v201_v11 = vld [vmem:[%s2046_s0 + $0x5d8] sm:$0xff] }
 0x13b   :  { %v1049_v16 = vmax.f32 %v1000_v15, 0.0  ;;  %347 = vmatmul.f32.gmra.mxu0 %v49_v13  ;;  %494 = vmatmul.f32.gmra.mxu1 %v98_v14  ;;  %v54_v15 = vld [vmem:[%s2046_s0 + $0x140] sm:$0xff] }
 0x13c   :  { %v594_v18 = vpop.f32.mrf.mxu2  ;;  %v741_v19 = vpop.f32.mrf.mxu3 }
 0x13d   :  { %1098 = vst [vmem:[%s2048_s3 + $0x90] sm:$0xff] %v1049_v16  ;;  %v899_v20 = vmax.f32 %v594_v18, %v741_v19  ;;  %v103_v16 = vld [vmem:[%s2046_s0 + $0x2c8] sm:$0xff] }
 0x13f   :  { %v948_v23 = vmax.f32 %v850_v17, %v899_v20 }
 0x140   :  { %v303_v24 = vpop.f32.mrf.mxu0  ;;  %v450_v25 = vpop.f32.mrf.mxu1 }
 0x141   :  { %v1001_v29 = vadd.f32 %v1458_v26, %v948_v23  ;;  %644 = vmatmul.f32.gmra.mxu2 %v148_v21  ;;  %791 = vmatmul.f32.gmra.mxu3 %v197_v22  ;;  %v851_v31 = vmax.f32 %v303_v24, %v450_v25  ;;  %v153_v23 = vld [vmem:[%s2046_s0 + $0x458] sm:$0xff]  ;;  %v202_v24 = vld [vmem:[%s2046_s0 + $0x5e0] sm:$0xff] }
 0x143   :  { %v1050_v30 = vmax.f32 %v1001_v29, 0.0  ;;  %350 = vmatmul.f32.gmra.mxu0 %v50_v27  ;;  %497 = vmatmul.f32.gmra.mxu1 %v99_v28  ;;  %v55_v29 = vld [vmem:[%s2046_s0 + $0x148] sm:$0xff] }
 0x144   :  { %v597_v32 = vpop.f32.mrf.mxu2  ;;  %v744_v33 = vpop.f32.mrf.mxu3 }
 0x145   :  { %1099 = vst [vmem:[%s2048_s3 + $0x98] sm:$0xff] %v1050_v30  ;;  %v900_v34 = vmax.f32 %v597_v32, %v744_v33  ;;  %v104_v30 = vld [vmem:[%s2046_s0 + $0x2d0] sm:$0xff] }
 0x147   :  { %v949_v37 = vmax.f32 %v851_v31, %v900_v34 }
 0x148   :  { %v306_v38 = vpop.f32.mrf.mxu0  ;;  %v453_v39 = vpop.f32.mrf.mxu1 }
 0x149   :  { %v1002_v42 = vadd.f32 %v1458_v26, %v949_v37  ;;  %647 = vmatmul.f32.gmra.mxu2 %v149_v35  ;;  %794 = vmatmul.f32.gmra.mxu3 %v198_v36  ;;  %v852_v44 = vmax.f32 %v306_v38, %v453_v39  ;;  %v154_v37 = vld [vmem:[%s2046_s0 + $0x460] sm:$0xff]  ;;  %v203_v38 = vld [vmem:[%s2046_s0 + $0x5e8] sm:$0xff] }
 0x14b   :  { %v1051_v43 = vmax.f32 %v1002_v42, 0.0  ;;  %353 = vmatmul.f32.gmra.mxu0 %v51_v40  ;;  %500 = vmatmul.f32.gmra.mxu1 %v100_v41  ;;  %v56_v42 = vld [vmem:[%s2046_s0 + $0x150] sm:$0xff] }
 0x14c   :  { %v600_v45 = vpop.f32.mrf.mxu2  ;;  %v747_v46 = vpop.f32.mrf.mxu3 }
 0x14d   :  { %1100 = vst [vmem:[%s2048_s3 + $0xa0] sm:$0xff] %v1051_v43  ;;  %v901_v47 = vmax.f32 %v600_v45, %v747_v46  ;;  %v105_v43 = vld [vmem:[%s2046_s0 + $0x2d8] sm:$0xff] }
 0x14f   :  { %v950_v50 = vmax.f32 %v852_v44, %v901_v47 }
 0x150   :  { %v309_v51 = vpop.f32.mrf.mxu0  ;;  %v456_v52 = vpop.f32.mrf.mxu1 }
 0x151   :  { %v1003_v55 = vadd.f32 %v1458_v26, %v950_v50  ;;  %650 = vmatmul.f32.gmra.mxu2 %v150_v48  ;;  %797 = vmatmul.f32.gmra.mxu3 %v199_v49  ;;  %v853_v57 = vmax.f32 %v309_v51, %v456_v52  ;;  %v155_v50 = vld [vmem:[%s2046_s0 + $0x468] sm:$0xff]  ;;  %v204_v51 = vld [vmem:[%s2046_s0 + $0x5f0] sm:$0xff] }
 0x153   :  { %v1052_v56 = vmax.f32 %v1003_v55, 0.0  ;;  %356 = vmatmul.f32.gmra.mxu0 %v52_v53  ;;  %503 = vmatmul.f32.gmra.mxu1 %v101_v54  ;;  %v57_v55 = vld [vmem:[%s2046_s0 + $0x158] sm:$0xff] }
 0x154   :  { %v603_v58 = vpop.f32.mrf.mxu2  ;;  %v750_v59 = vpop.f32.mrf.mxu3 }
 0x155   :  { %1101 = vst [vmem:[%s2048_s3 + $0xa8] sm:$0xff] %v1052_v56  ;;  %v902_v60 = vmax.f32 %v603_v58, %v750_v59  ;;  %v106_v56 = vld [vmem:[%s2046_s0 + $0x2e0] sm:$0xff] }
 0x157   :  { %v951_v63 = vmax.f32 %v853_v57, %v902_v60 }
 0x158   :  { %v312_v0 = vpop.f32.mrf.mxu0  ;;  %v459_v1 = vpop.f32.mrf.mxu1 }
 0x159   :  { %v1004_v4 = vadd.f32 %v1458_v26, %v951_v63  ;;  %653 = vmatmul.f32.gmra.mxu2 %v151_v61  ;;  %800 = vmatmul.f32.gmra.mxu3 %v200_v62  ;;  %v854_v6 = vmax.f32 %v312_v0, %v459_v1  ;;  %v156_v63 = vld [vmem:[%s2046_s0 + $0x470] sm:$0xff]  ;;  %v205_v0 = vld [vmem:[%s2046_s0 + $0x5f8] sm:$0xff] }
 0x15b   :  { %v1053_v5 = vmax.f32 %v1004_v4, 0.0  ;;  %359 = vmatmul.f32.gmra.mxu0 %v53_v2  ;;  %506 = vmatmul.f32.gmra.mxu1 %v102_v3  ;;  %v58_v4 = vld [vmem:[%s2046_s0 + $0x160] sm:$0xff] }
 0x15c   :  { %v606_v7 = vpop.f32.mrf.mxu2  ;;  %v753_v8 = vpop.f32.mrf.mxu3 }
 0x15d   :  { %1102 = vst [vmem:[%s2048_s3 + $0xb0] sm:$0xff] %v1053_v5  ;;  %v903_v9 = vmax.f32 %v606_v7, %v753_v8  ;;  %v107_v5 = vld [vmem:[%s2046_s0 + $0x2e8] sm:$0xff] }
 0x15f   :  { %v952_v12 = vmax.f32 %v854_v6, %v903_v9 }
 0x160   :  { %v315_v13 = vpop.f32.mrf.mxu0  ;;  %v462_v14 = vpop.f32.mrf.mxu1 }
 0x161   :  { %v1005_v17 = vadd.f32 %v1458_v26, %v952_v12  ;;  %656 = vmatmul.f32.gmra.mxu2 %v152_v10  ;;  %803 = vmatmul.f32.gmra.mxu3 %v201_v11  ;;  %v855_v19 = vmax.f32 %v315_v13, %v462_v14  ;;  %v157_v12 = vld [vmem:[%s2046_s0 + $0x478] sm:$0xff] }
 0x163   :  { %v1054_v18 = vmax.f32 %v1005_v17, 0.0  ;;  %362 = vmatmul.f32.gmra.mxu0 %v54_v15  ;;  %509 = vmatmul.f32.gmra.mxu1 %v103_v16  ;;  %v59_v16 = vld [vmem:[%s2046_s0 + $0x168] sm:$0xff]  ;;  %v108_v17 = vld [vmem:[%s2046_s0 + $0x2f0] sm:$0xff] }
 0x164   :  { %v609_v20 = vpop.f32.mrf.mxu2  ;;  %v756_v21 = vpop.f32.mrf.mxu3 }
 0x165   :  { %1103 = vst [vmem:[%s2048_s3 + $0xb8] sm:$0xff] %v1054_v18  ;;  %v904_v22 = vmax.f32 %v609_v20, %v756_v21  ;;  %v1923_v18 = vld [vmem:[%s2047_s2] ss:$0 sm:$0xff] }
 0x167   :  { %v953_v25 = vmax.f32 %v855_v19, %v904_v22 }
 0x168   :  { %v318_v27 = vpop.f32.mrf.mxu0  ;;  %v465_v28 = vpop.f32.mrf.mxu1 }
 0x169   :  { %v1006_v31 = vadd.f32 %v1458_v26, %v953_v25  ;;  %659 = vmatmul.f32.gmra.mxu2 %v153_v23  ;;  %806 = vmatmul.f32.gmra.mxu3 %v202_v24  ;;  %v856_v33 = vmax.f32 %v318_v27, %v465_v28  ;;  %v158_v25 = vld [vmem:[%s2046_s0 + $0x480] sm:$0xff]  ;;  %v207_v27 = vld [vmem:[%s2046_s0 + $0x608] sm:$0xff] }
 0x16b   :  { %v1055_v32 = vmax.f32 %v1006_v31, 0.0  ;;  %365 = vmatmul.f32.gmra.mxu0 %v55_v29  ;;  %512 = vmatmul.f32.gmra.mxu1 %v104_v30  ;;  %v60_v31 = vld [vmem:[%s2046_s0 + $0x170] sm:$0xff] }
 0x16c   :  { %v612_v34 = vpop.f32.mrf.mxu2  ;;  %v759_v35 = vpop.f32.mrf.mxu3 }
 0x16d   :  { %1104 = vst [vmem:[%s2048_s3 + $0xc0] sm:$0xff] %v1055_v32  ;;  %v905_v36 = vmax.f32 %v612_v34, %v759_v35  ;;  %v109_v32 = vld [vmem:[%s2046_s0 + $0x2f8] sm:$0xff] }
 0x16f   :  { %v954_v39 = vmax.f32 %v856_v33, %v905_v36 }
 0x170   :  { %v321_v40 = vpop.f32.mrf.mxu0  ;;  %v468_v41 = vpop.f32.mrf.mxu1 }
 0x171   :  { %v1007_v44 = vadd.f32 %v1458_v26, %v954_v39  ;;  %662 = vmatmul.f32.gmra.mxu2 %v154_v37  ;;  %809 = vmatmul.f32.gmra.mxu3 %v203_v38  ;;  %v857_v46 = vmax.f32 %v321_v40, %v468_v41  ;;  %v159_v39 = vld [vmem:[%s2046_s0 + $0x488] sm:$0xff]  ;;  %v208_v40 = vld [vmem:[%s2046_s0 + $0x610] sm:$0xff] }
 0x173   :  { %v1056_v45 = vmax.f32 %v1007_v44, 0.0  ;;  %368 = vmatmul.f32.gmra.mxu0 %v56_v42  ;;  %515 = vmatmul.f32.gmra.mxu1 %v105_v43  ;;  %v61_v44 = vld [vmem:[%s2046_s0 + $0x178] sm:$0xff] }
 0x174   :  { %v615_v47 = vpop.f32.mrf.mxu2  ;;  %v762_v48 = vpop.f32.mrf.mxu3 }
 0x175   :  { %1105 = vst [vmem:[%s2048_s3 + $0xc8] sm:$0xff] %v1056_v45  ;;  %v906_v49 = vmax.f32 %v615_v47, %v762_v48  ;;  %v110_v45 = vld [vmem:[%s2046_s0 + $0x300] sm:$0xff] }
 0x177   :  { %v955_v52 = vmax.f32 %v857_v46, %v906_v49 }
 0x178   :  { %v324_v53 = vpop.f32.mrf.mxu0  ;;  %v471_v54 = vpop.f32.mrf.mxu1 }
 0x179   :  { %v1008_v57 = vadd.f32 %v1458_v26, %v955_v52  ;;  %665 = vmatmul.f32.gmra.mxu2 %v155_v50  ;;  %812 = vmatmul.f32.gmra.mxu3 %v204_v51  ;;  %v858_v59 = vmax.f32 %v324_v53, %v471_v54  ;;  %v160_v52 = vld [vmem:[%s2046_s0 + $0x490] sm:$0xff]  ;;  %v209_v53 = vld [vmem:[%s2046_s0 + $0x618] sm:$0xff] }
 0x17b   :  { %v1057_v58 = vmax.f32 %v1008_v57, 0.0  ;;  %371 = vmatmul.f32.gmra.mxu0 %v57_v55  ;;  %518 = vmatmul.f32.gmra.mxu1 %v106_v56  ;;  %v62_v57 = vld [vmem:[%s2046_s0 + $0x180] sm:$0xff] }
 0x17c   :  { %v618_v60 = vpop.f32.mrf.mxu2  ;;  %v765_v61 = vpop.f32.mrf.mxu3 }
 0x17d   :  { %1106 = vst [vmem:[%s2048_s3 + $0xd0] sm:$0xff] %v1057_v58  ;;  %v907_v62 = vmax.f32 %v618_v60, %v765_v61  ;;  %v111_v58 = vld [vmem:[%s2046_s0 + $0x308] sm:$0xff] }
 0x17f   :  { %v956_v1 = vmax.f32 %v858_v59, %v907_v62 }
 0x180   :  { %v327_v2 = vpop.f32.mrf.mxu0  ;;  %v474_v3 = vpop.f32.mrf.mxu1 }
 0x181   :  { %v1009_v6 = vadd.f32 %v1458_v26, %v956_v1  ;;  %668 = vmatmul.f32.gmra.mxu2 %v156_v63  ;;  %815 = vmatmul.f32.gmra.mxu3 %v205_v0  ;;  %v859_v8 = vmax.f32 %v327_v2, %v474_v3  ;;  %v206_v26 = vld [vmem:[%s2046_s0 + $0x600] sm:$0xff] }
 0x183   :  { %v1058_v7 = vmax.f32 %v1009_v6, 0.0  ;;  %374 = vmatmul.f32.gmra.mxu0 %v58_v4  ;;  %521 = vmatmul.f32.gmra.mxu1 %v107_v5 }
 0x184   :  { %v621_v9 = vpop.f32.mrf.mxu2  ;;  %v768_v10 = vpop.f32.mrf.mxu3 }
 0x185   :  { %1107 = vst [vmem:[%s2048_s3 + $0xd8] sm:$0xff] %v1058_v7  ;;  %v908_v11 = vmax.f32 %v621_v9, %v768_v10 }
 0x187   :  { %v957_v13 = vmax.f32 %v859_v8, %v908_v11 }
 0x188   :  { %v330_v14 = vpop.f32.mrf.mxu0  ;;  %v477_v15 = vpop.f32.mrf.mxu1 }
 0x189   :  { %v1010_v19 = vadd.f32 %v1923_v18, %v957_v13  ;;  %671 = vmatmul.f32.gmra.mxu2 %v157_v12  ;;  %818 = vmatmul.f32.gmra.mxu3 %v206_v26  ;;  %v860_v21 = vmax.f32 %v330_v14, %v477_v15 }
 0x18b   :  { %v1059_v20 = vmax.f32 %v1010_v19, 0.0  ;;  %377 = vmatmul.f32.gmra.mxu0 %v59_v16  ;;  %524 = vmatmul.f32.gmra.mxu1 %v108_v17 }
 0x18c   :  { %v624_v22 = vpop.f32.mrf.mxu2  ;;  %v771_v23 = vpop.f32.mrf.mxu3 }
 0x18d   :  { %1108 = vst [vmem:[%s2048_s3 + $0xe0] sm:$0xff] %v1059_v20  ;;  %v909_v24 = vmax.f32 %v624_v22, %v771_v23 }
 0x18f   :  { %v958_v28 = vmax.f32 %v860_v21, %v909_v24 }
 0x190   :  { %v333_v29 = vpop.f32.mrf.mxu0  ;;  %v480_v30 = vpop.f32.mrf.mxu1 }
 0x191   :  { %v1011_v33 = vadd.f32 %v1923_v18, %v958_v28  ;;  %674 = vmatmul.f32.gmra.mxu2 %v158_v25  ;;  %821 = vmatmul.f32.gmra.mxu3 %v207_v27  ;;  %v861_v35 = vmax.f32 %v333_v29, %v480_v30 }
 0x193   :  { %v1060_v34 = vmax.f32 %v1011_v33, 0.0  ;;  %380 = vmatmul.f32.gmra.mxu0 %v60_v31  ;;  %527 = vmatmul.f32.gmra.mxu1 %v109_v32 }
 0x194   :  { %v627_v36 = vpop.f32.mrf.mxu2  ;;  %v774_v37 = vpop.f32.mrf.mxu3 }
 0x195   :  { %1109 = vst [vmem:[%s2048_s3 + $0xe8] sm:$0xff] %v1060_v34  ;;  %v910_v38 = vmax.f32 %v627_v36, %v774_v37 }
 0x197   :  { %v959_v41 = vmax.f32 %v861_v35, %v910_v38 }
 0x198   :  { %v336_v42 = vpop.f32.mrf.mxu0  ;;  %v483_v43 = vpop.f32.mrf.mxu1 }
 0x199   :  { %v1012_v46 = vadd.f32 %v1923_v18, %v959_v41  ;;  %677 = vmatmul.f32.gmra.mxu2 %v159_v39  ;;  %824 = vmatmul.f32.gmra.mxu3 %v208_v40  ;;  %v862_v48 = vmax.f32 %v336_v42, %v483_v43 }
 0x19b   :  { %v1061_v47 = vmax.f32 %v1012_v46, 0.0  ;;  %383 = vmatmul.f32.gmra.mxu0 %v61_v44  ;;  %530 = vmatmul.f32.gmra.mxu1 %v110_v45 }
 0x19c   :  { %v630_v49 = vpop.f32.mrf.mxu2  ;;  %v777_v50 = vpop.f32.mrf.mxu3 }
 0x19d   :  { %1110 = vst [vmem:[%s2048_s3 + $0xf0] sm:$0xff] %v1061_v47  ;;  %v911_v51 = vmax.f32 %v630_v49, %v777_v50 }
 0x19f   :  { %v960_v54 = vmax.f32 %v862_v48, %v911_v51 }
 0x1a0   :  { %v339_v55 = vpop.f32.mrf.mxu0  ;;  %v486_v56 = vpop.f32.mrf.mxu1 }
 0x1a1   :  { %v1013_v59 = vadd.f32 %v1923_v18, %v960_v54  ;;  %680 = vmatmul.f32.gmra.mxu2 %v160_v52  ;;  %827 = vmatmul.f32.gmra.mxu3 %v209_v53  ;;  %v863_v61 = vmax.f32 %v339_v55, %v486_v56 }
 0x1a3   :  { %v1062_v60 = vmax.f32 %v1013_v59, 0.0  ;;  %386 = vmatmul.f32.gmra.mxu0 %v62_v57  ;;  %533 = vmatmul.f32.gmra.mxu1 %v111_v58 }
 0x1a4   :  { %v633_v62 = vpop.f32.mrf.mxu2  ;;  %v780_v63 = vpop.f32.mrf.mxu3 }
 0x1a5   :  { %1111 = vst [vmem:[%s2048_s3 + $0xf8] sm:$0xff] %v1062_v60  ;;  %v912_v0 = vmax.f32 %v633_v62, %v780_v63 }
 0x1a7   :  { %v961_v1 = vmax.f32 %v863_v61, %v912_v0 }
 0x1a8   :  { %v342_v2 = vpop.f32.mrf.mxu0  ;;  %v489_v3 = vpop.f32.mrf.mxu1 }
 0x1a9   :  { %v1014_v4 = vadd.f32 %v1923_v18, %v961_v1  ;;  %v864_v6 = vmax.f32 %v342_v2, %v489_v3 }
 0x1ab   :  { %v1063_v5 = vmax.f32 %v1014_v4, 0.0 }
 0x1ac   :  { %v636_v7 = vpop.f32.mrf.mxu2  ;;  %v783_v8 = vpop.f32.mrf.mxu3 }
 0x1ad   :  { %1112 = vst [vmem:[%s2048_s3 + $0x100] sm:$0xff] %v1063_v5  ;;  %v913_v9 = vmax.f32 %v636_v7, %v783_v8 }
 0x1af   :  { %v962_v10 = vmax.f32 %v864_v6, %v913_v9 }
 0x1b0   :  { %v345_v11 = vpop.f32.mrf.mxu0  ;;  %v492_v12 = vpop.f32.mrf.mxu1 }
 0x1b1   :  { %v1015_v26 = vadd.f32 %v1923_v18, %v962_v10  ;;  %v865_v14 = vmax.f32 %v345_v11, %v492_v12 }
 0x1b3   :  { %v1064_v13 = vmax.f32 %v1015_v26, 0.0 }
 0x1b4   :  { %v639_v15 = vpop.f32.mrf.mxu2  ;;  %v786_v16 = vpop.f32.mrf.mxu3 }
 0x1b5   :  { %1113 = vst [vmem:[%s2048_s3 + $0x108] sm:$0xff] %v1064_v13  ;;  %v914_v17 = vmax.f32 %v639_v15, %v786_v16 }
 0x1b7   :  { %v963_v19 = vmax.f32 %v865_v14, %v914_v17 }
 0x1b8   :  { %v348_v20 = vpop.f32.mrf.mxu0  ;;  %v495_v21 = vpop.f32.mrf.mxu1 }
 0x1b9   :  { %v1016_v22 = vadd.f32 %v1923_v18, %v963_v19  ;;  %v866_v24 = vmax.f32 %v348_v20, %v495_v21 }
 0x1bb   :  { %v1065_v23 = vmax.f32 %v1016_v22, 0.0 }
 0x1bc   :  { %v642_v25 = vpop.f32.mrf.mxu2  ;;  %v789_v27 = vpop.f32.mrf.mxu3 }
 0x1bd   :  { %1114 = vst [vmem:[%s2048_s3 + $0x110] sm:$0xff] %v1065_v23  ;;  %v915_v28 = vmax.f32 %v642_v25, %v789_v27 }
 0x1bf   :  { %v964_v29 = vmax.f32 %v866_v24, %v915_v28 }
 0x1c0   :  { %v351_v30 = vpop.f32.mrf.mxu0  ;;  %v498_v31 = vpop.f32.mrf.mxu1 }
 0x1c1   :  { %v1017_v32 = vadd.f32 %v1923_v18, %v964_v29  ;;  %v867_v34 = vmax.f32 %v351_v30, %v498_v31 }
 0x1c3   :  { %v1066_v33 = vmax.f32 %v1017_v32, 0.0 }
 0x1c4   :  { %v645_v35 = vpop.f32.mrf.mxu2  ;;  %v792_v36 = vpop.f32.mrf.mxu3 }
 0x1c5   :  { %1115 = vst [vmem:[%s2048_s3 + $0x118] sm:$0xff] %v1066_v33  ;;  %v916_v37 = vmax.f32 %v645_v35, %v792_v36 }
 0x1c7   :  { %v965_v38 = vmax.f32 %v867_v34, %v916_v37 }
 0x1c8   :  { %v354_v39 = vpop.f32.mrf.mxu0  ;;  %v501_v40 = vpop.f32.mrf.mxu1 }
 0x1c9   :  { %v1018_v41 = vadd.f32 %v1923_v18, %v965_v38  ;;  %v868_v43 = vmax.f32 %v354_v39, %v501_v40 }
 0x1cb   :  { %v1067_v42 = vmax.f32 %v1018_v41, 0.0 }
 0x1cc   :  { %v648_v44 = vpop.f32.mrf.mxu2  ;;  %v795_v45 = vpop.f32.mrf.mxu3 }
 0x1cd   :  { %1116 = vst [vmem:[%s2048_s3 + $0x120] sm:$0xff] %v1067_v42  ;;  %v917_v46 = vmax.f32 %v648_v44, %v795_v45 }
 0x1cf   :  { %v966_v47 = vmax.f32 %v868_v43, %v917_v46 }
 0x1d0   :  { %v357_v48 = vpop.f32.mrf.mxu0  ;;  %v504_v49 = vpop.f32.mrf.mxu1 }
 0x1d1   :  { %v1019_v50 = vadd.f32 %v1923_v18, %v966_v47  ;;  %v869_v52 = vmax.f32 %v357_v48, %v504_v49 }
 0x1d3   :  { %v1068_v51 = vmax.f32 %v1019_v50, 0.0 }
 0x1d4   :  { %v651_v53 = vpop.f32.mrf.mxu2  ;;  %v798_v54 = vpop.f32.mrf.mxu3 }
 0x1d5   :  { %1117 = vst [vmem:[%s2048_s3 + $0x128] sm:$0xff] %v1068_v51  ;;  %v918_v55 = vmax.f32 %v651_v53, %v798_v54 }
 0x1d7   :  { %v967_v56 = vmax.f32 %v869_v52, %v918_v55 }
 0x1d8   :  { %v360_v57 = vpop.f32.mrf.mxu0  ;;  %v507_v58 = vpop.f32.mrf.mxu1 }
 0x1d9   :  { %v1020_v59 = vadd.f32 %v1923_v18, %v967_v56  ;;  %v870_v61 = vmax.f32 %v360_v57, %v507_v58 }
 0x1db   :  { %v1069_v60 = vmax.f32 %v1020_v59, 0.0 }
 0x1dc   :  { %v654_v62 = vpop.f32.mrf.mxu2  ;;  %v801_v63 = vpop.f32.mrf.mxu3 }
 0x1dd   :  { %1118 = vst [vmem:[%s2048_s3 + $0x130] sm:$0xff] %v1069_v60  ;;  %v919_v0 = vmax.f32 %v654_v62, %v801_v63 }
 0x1df   :  { %v968_v1 = vmax.f32 %v870_v61, %v919_v0 }
 0x1e0   :  { %v363_v2 = vpop.f32.mrf.mxu0  ;;  %v510_v3 = vpop.f32.mrf.mxu1 }
 0x1e1   :  { %v1021_v4 = vadd.f32 %v1923_v18, %v968_v1  ;;  %v871_v6 = vmax.f32 %v363_v2, %v510_v3 }
 0x1e3   :  { %v1070_v5 = vmax.f32 %v1021_v4, 0.0 }
 0x1e4   :  { %v657_v7 = vpop.f32.mrf.mxu2  ;;  %v804_v8 = vpop.f32.mrf.mxu3 }
 0x1e5   :  { %1119 = vst [vmem:[%s2048_s3 + $0x138] sm:$0xff] %v1070_v5  ;;  %v920_v9 = vmax.f32 %v657_v7, %v804_v8 }
 0x1e7   :  { %v969_v10 = vmax.f32 %v871_v6, %v920_v9 }
 0x1e8   :  { %v366_v11 = vpop.f32.mrf.mxu0  ;;  %v513_v12 = vpop.f32.mrf.mxu1 }
 0x1e9   :  { %v1022_v26 = vadd.f32 %v1923_v18, %v969_v10  ;;  %v872_v14 = vmax.f32 %v366_v11, %v513_v12 }
 0x1eb   :  { %v1071_v13 = vmax.f32 %v1022_v26, 0.0 }
 0x1ec   :  { %v660_v15 = vpop.f32.mrf.mxu2  ;;  %v807_v16 = vpop.f32.mrf.mxu3 }
 0x1ed   :  { %1120 = vst [vmem:[%s2048_s3 + $0x140] sm:$0xff] %v1071_v13  ;;  %v921_v17 = vmax.f32 %v660_v15, %v807_v16 }
 0x1ef   :  { %v970_v19 = vmax.f32 %v872_v14, %v921_v17 }
 0x1f0   :  { %v369_v20 = vpop.f32.mrf.mxu0  ;;  %v516_v21 = vpop.f32.mrf.mxu1 }
 0x1f1   :  { %v1023_v22 = vadd.f32 %v1923_v18, %v970_v19  ;;  %v873_v24 = vmax.f32 %v369_v20, %v516_v21 }
 0x1f3   :  { %v1072_v23 = vmax.f32 %v1023_v22, 0.0 }
 0x1f4   :  { %v663_v25 = vpop.f32.mrf.mxu2  ;;  %v810_v27 = vpop.f32.mrf.mxu3 }
 0x1f5   :  { %1121 = vst [vmem:[%s2048_s3 + $0x148] sm:$0xff] %v1072_v23  ;;  %v922_v28 = vmax.f32 %v663_v25, %v810_v27 }
 0x1f7   :  { %v971_v29 = vmax.f32 %v873_v24, %v922_v28 }
 0x1f8   :  { %v372_v30 = vpop.f32.mrf.mxu0  ;;  %v519_v31 = vpop.f32.mrf.mxu1 }
 0x1f9   :  { %v1024_v32 = vadd.f32 %v1923_v18, %v971_v29  ;;  %v874_v34 = vmax.f32 %v372_v30, %v519_v31 }
 0x1fb   :  { %v1073_v33 = vmax.f32 %v1024_v32, 0.0 }
 0x1fc   :  { %v666_v35 = vpop.f32.mrf.mxu2  ;;  %v813_v36 = vpop.f32.mrf.mxu3 }
 0x1fd   :  { %1122 = vst [vmem:[%s2048_s3 + $0x150] sm:$0xff] %v1073_v33  ;;  %v923_v37 = vmax.f32 %v666_v35, %v813_v36 }
 0x1ff   :  { %v972_v38 = vmax.f32 %v874_v34, %v923_v37 }
 0x200   :  { %v375_v39 = vpop.f32.mrf.mxu0  ;;  %v522_v40 = vpop.f32.mrf.mxu1 }
 0x201   :  { %v1025_v41 = vadd.f32 %v1923_v18, %v972_v38  ;;  %v875_v43 = vmax.f32 %v375_v39, %v522_v40 }
 0x203   :  { %v1074_v42 = vmax.f32 %v1025_v41, 0.0 }
 0x204   :  { %v669_v44 = vpop.f32.mrf.mxu2  ;;  %v816_v45 = vpop.f32.mrf.mxu3 }
 0x205   :  { %1123 = vst [vmem:[%s2048_s3 + $0x158] sm:$0xff] %v1074_v42  ;;  %v924_v46 = vmax.f32 %v669_v44, %v816_v45 }
 0x207   :  { %v973_v47 = vmax.f32 %v875_v43, %v924_v46 }
 0x208   :  { %v378_v48 = vpop.f32.mrf.mxu0  ;;  %v525_v49 = vpop.f32.mrf.mxu1 }
 0x209   :  { %v1026_v50 = vadd.f32 %v1923_v18, %v973_v47  ;;  %v876_v52 = vmax.f32 %v378_v48, %v525_v49 }
 0x20b   :  { %v1075_v51 = vmax.f32 %v1026_v50, 0.0 }
 0x20c   :  { %v672_v53 = vpop.f32.mrf.mxu2  ;;  %v819_v54 = vpop.f32.mrf.mxu3 }
 0x20d   :  { %1124 = vst [vmem:[%s2048_s3 + $0x160] sm:$0xff] %v1075_v51  ;;  %v925_v55 = vmax.f32 %v672_v53, %v819_v54 }
 0x20f   :  { %v974_v56 = vmax.f32 %v876_v52, %v925_v55 }
 0x210   :  { %v381_v57 = vpop.f32.mrf.mxu0  ;;  %v528_v58 = vpop.f32.mrf.mxu1 }
 0x211   :  { %v1027_v59 = vadd.f32 %v1923_v18, %v974_v56  ;;  %v877_v61 = vmax.f32 %v381_v57, %v528_v58 }
 0x213   :  { %v1076_v60 = vmax.f32 %v1027_v59, 0.0 }
 0x214   :  { %v675_v62 = vpop.f32.mrf.mxu2  ;;  %v822_v63 = vpop.f32.mrf.mxu3 }
 0x215   :  { %1125 = vst [vmem:[%s2048_s3 + $0x168] sm:$0xff] %v1076_v60  ;;  %v926_v0 = vmax.f32 %v675_v62, %v822_v63 }
 0x217   :  { %v975_v1 = vmax.f32 %v877_v61, %v926_v0 }
 0x218   :  { %v384_v2 = vpop.f32.mrf.mxu0  ;;  %v531_v3 = vpop.f32.mrf.mxu1 }
 0x219   :  { %v1028_v4 = vadd.f32 %v1923_v18, %v975_v1  ;;  %v878_v6 = vmax.f32 %v384_v2, %v531_v3 }
 0x21b   :  { %v1077_v5 = vmax.f32 %v1028_v4, 0.0 }
 0x21c   :  { %v678_v7 = vpop.f32.mrf.mxu2  ;;  %v825_v8 = vpop.f32.mrf.mxu3 }
 0x21d   :  { %1126 = vst [vmem:[%s2048_s3 + $0x170] sm:$0xff] %v1077_v5  ;;  %v927_v9 = vmax.f32 %v678_v7, %v825_v8 }
 0x21f   :  { %v976_v10 = vmax.f32 %v878_v6, %v927_v9 }
 0x220   :  { %v387_v11 = vpop.f32.mrf.mxu0  ;;  %v534_v12 = vpop.f32.mrf.mxu1 }
 0x221   :  { %v1029_v26 = vadd.f32 %v1923_v18, %v976_v10  ;;  %v879_v14 = vmax.f32 %v387_v11, %v534_v12 }
 0x223   :  { %v1078_v13 = vmax.f32 %v1029_v26, 0.0 }
 0x224   :  { %v681_v15 = vpop.f32.mrf.mxu2  ;;  %v828_v16 = vpop.f32.mrf.mxu3 }
 0x225   :  { %1127 = vst [vmem:[%s2048_s3 + $0x178] sm:$0xff] %v1078_v13  ;;  %v928_v17 = vmax.f32 %v681_v15, %v828_v16 }
 0x227   :  { %v977_v19 = vmax.f32 %v879_v14, %v928_v17 }
 0x229   :  { %v1030_v20 = vadd.f32 %v1923_v18, %v977_v19 }
 0x22b   :  { %v1079_v21 = vmax.f32 %v1030_v20, 0.0 }
 0x22d   :  { %1128 = vst [vmem:[%s2048_s3 + $0x180] sm:$0xff] %v1079_v21 }

// kernel: cnn_forward.4
= control target key start
LH: loop header
LB: loop body
LE: loop exit
PB: predicated region body
PF: predicated region fallthrough
CT: control target
= control target key end

     0   :  { %s2114_s1 = inlined_call_operand.vmem [shape: f32[512,128], index: 1, kind: input, shape index: {}]   ;;  %s2115_s0 = inlined_call_operand.vmem [shape: f32[1,416,512], index: 0, kind: input, shape index: {}]   ;;  %s2116_s2 = inlined_call_operand.vmem [shape: f32[1,128], index: 2, kind: input, shape index: {}]   ;;  %s2117_s3 = inlined_call_operand.vmem [shape: f32[104,128], index: 3, kind: output, shape index: {}]  }
   0x1   :  { %v269_v0 = vld [vmem:[%s2114_s1 + $0x178] sm:$0xff]  ;;  %v268_v1 = vld [vmem:[%s2114_s1 + $0x170] sm:$0xff]  ;;  %v267_v5 = vld [vmem:[%s2114_s1 + $0x168] sm:$0xff] }
   0x2   :  { %v285_v2 = vld [vmem:[%s2114_s1 + $0x1f8] sm:$0xff]  ;;  %632 = vmatpush.msra.mxu2 %v269_v0  ;;  %v284_v6 = vld [vmem:[%s2114_s1 + $0x1f0] sm:$0xff]  ;;  %v283_v9 = vld [vmem:[%s2114_s1 + $0x1e8] sm:$0xff] }
   0x3   :  { %805 = vmatpush.msra.mxu3 %v285_v2  ;;  %v237_v3 = vld [vmem:[%s2114_s1 + $0x78] sm:$0xff]  ;;  %v236_v7 = vld [vmem:[%s2114_s1 + $0x70] sm:$0xff]  ;;  %v235_v10 = vld [vmem:[%s2114_s1 + $0x68] sm:$0xff] }
   0x4   :  { %v253_v4 = vld [vmem:[%s2114_s1 + $0xf8] sm:$0xff]  ;;  %286 = vmatpush.msra.mxu0 %v237_v3  ;;  %v252_v8 = vld [vmem:[%s2114_s1 + $0xf0] sm:$0xff]  ;;  %633 = vmatpush.msra.mxu2 %v268_v1  ;;  %v266_v11 = vld [vmem:[%s2114_s1 + $0x160] sm:$0xff] }
   0x5   :  { %459 = vmatpush.msra.mxu1 %v253_v4  ;;  %806 = vmatpush.msra.mxu3 %v284_v6  ;;  %v251_v12 = vld [vmem:[%s2114_s1 + $0xe8] sm:$0xff]  ;;  %v282_v13 = vld [vmem:[%s2114_s1 + $0x1e0] sm:$0xff]  ;;  %v265_v16 = vld [vmem:[%s2114_s1 + $0x158] sm:$0xff] }
   0x6   :  { %287 = vmatpush.msra.mxu0 %v236_v7  ;;  %634 = vmatpush.msra.mxu2 %v267_v5  ;;  %v234_v14 = vld [vmem:[%s2114_s1 + $0x60] sm:$0xff]  ;;  %v281_v17 = vld [vmem:[%s2114_s1 + $0x1d8] sm:$0xff]  ;;  %v264_v20 = vld [vmem:[%s2114_s1 + $0x150] sm:$0xff] }
   0x7   :  { %460 = vmatpush.msra.mxu1 %v252_v8  ;;  %807 = vmatpush.msra.mxu3 %v283_v9  ;;  %v250_v15 = vld [vmem:[%s2114_s1 + $0xe0] sm:$0xff]  ;;  %v233_v18 = vld [vmem:[%s2114_s1 + $0x58] sm:$0xff]  ;;  %v280_v21 = vld [vmem:[%s2114_s1 + $0x1d0] sm:$0xff] }
   0x8   :  { %288 = vmatpush.msra.mxu0 %v235_v10  ;;  %635 = vmatpush.msra.mxu2 %v266_v11  ;;  %v249_v19 = vld [vmem:[%s2114_s1 + $0xd8] sm:$0xff]  ;;  %v232_v22 = vld [vmem:[%s2114_s1 + $0x50] sm:$0xff]  ;;  %v263_v24 = vld [vmem:[%s2114_s1 + $0x148] sm:$0xff] }
   0x9   :  { %461 = vmatpush.msra.mxu1 %v251_v12  ;;  %808 = vmatpush.msra.mxu3 %v282_v13  ;;  %v248_v23 = vld [vmem:[%s2114_s1 + $0xd0] sm:$0xff]  ;;  %v279_v25 = vld [vmem:[%s2114_s1 + $0x1c8] sm:$0xff]  ;;  %v262_v28 = vld [vmem:[%s2114_s1 + $0x140] sm:$0xff] }
   0xa   :  { %289 = vmatpush.msra.mxu0 %v234_v14  ;;  %636 = vmatpush.msra.mxu2 %v265_v16  ;;  %v231_v26 = vld [vmem:[%s2114_s1 + $0x48] sm:$0xff]  ;;  %v278_v29 = vld [vmem:[%s2114_s1 + $0x1c0] sm:$0xff]  ;;  %v261_v32 = vld [vmem:[%s2114_s1 + $0x138] sm:$0xff] }
   0xb   :  { %462 = vmatpush.msra.mxu1 %v250_v15  ;;  %809 = vmatpush.msra.mxu3 %v281_v17  ;;  %v247_v27 = vld [vmem:[%s2114_s1 + $0xc8] sm:$0xff]  ;;  %v230_v30 = vld [vmem:[%s2114_s1 + $0x40] sm:$0xff]  ;;  %v277_v33 = vld [vmem:[%s2114_s1 + $0x1b8] sm:$0xff] }
   0xc   :  { %290 = vmatpush.msra.mxu0 %v233_v18  ;;  %637 = vmatpush.msra.mxu2 %v264_v20  ;;  %v246_v31 = vld [vmem:[%s2114_s1 + $0xc0] sm:$0xff]  ;;  %v229_v34 = vld [vmem:[%s2114_s1 + $0x38] sm:$0xff]  ;;  %v260_v36 = vld [vmem:[%s2114_s1 + $0x130] sm:$0xff] }
   0xd   :  { %463 = vmatpush.msra.mxu1 %v249_v19  ;;  %810 = vmatpush.msra.mxu3 %v280_v21  ;;  %v245_v35 = vld [vmem:[%s2114_s1 + $0xb8] sm:$0xff]  ;;  %v276_v37 = vld [vmem:[%s2114_s1 + $0x1b0] sm:$0xff]  ;;  %v259_v40 = vld [vmem:[%s2114_s1 + $0x128] sm:$0xff] }
   0xe   :  { %291 = vmatpush.msra.mxu0 %v232_v22  ;;  %638 = vmatpush.msra.mxu2 %v263_v24  ;;  %v228_v38 = vld [vmem:[%s2114_s1 + $0x30] sm:$0xff]  ;;  %v275_v41 = vld [vmem:[%s2114_s1 + $0x1a8] sm:$0xff]  ;;  %v258_v44 = vld [vmem:[%s2114_s1 + $0x120] sm:$0xff] }
   0xf   :  { %464 = vmatpush.msra.mxu1 %v248_v23  ;;  %811 = vmatpush.msra.mxu3 %v279_v25  ;;  %v244_v39 = vld [vmem:[%s2114_s1 + $0xb0] sm:$0xff]  ;;  %v227_v42 = vld [vmem:[%s2114_s1 + $0x28] sm:$0xff]  ;;  %v274_v45 = vld [vmem:[%s2114_s1 + $0x1a0] sm:$0xff] }
  0x10   :  { %292 = vmatpush.msra.mxu0 %v231_v26  ;;  %639 = vmatpush.msra.mxu2 %v262_v28  ;;  %v243_v43 = vld [vmem:[%s2114_s1 + $0xa8] sm:$0xff]  ;;  %v226_v46 = vld [vmem:[%s2114_s1 + $0x20] sm:$0xff]  ;;  %v257_v48 = vld [vmem:[%s2114_s1 + $0x118] sm:$0xff] }
  0x11   :  { %465 = vmatpush.msra.mxu1 %v247_v27  ;;  %812 = vmatpush.msra.mxu3 %v278_v29  ;;  %v242_v47 = vld [vmem:[%s2114_s1 + $0xa0] sm:$0xff]  ;;  %v273_v49 = vld [vmem:[%s2114_s1 + $0x198] sm:$0xff]  ;;  %v256_v52 = vld [vmem:[%s2114_s1 + $0x110] sm:$0xff] }
  0x12   :  { %293 = vmatpush.msra.mxu0 %v230_v30  ;;  %640 = vmatpush.msra.mxu2 %v261_v32  ;;  %v225_v50 = vld [vmem:[%s2114_s1 + $0x18] sm:$0xff]  ;;  %v272_v53 = vld [vmem:[%s2114_s1 + $0x190] sm:$0xff]  ;;  %v255_v56 = vld [vmem:[%s2114_s1 + $0x108] sm:$0xff] }
  0x13   :  { %466 = vmatpush.msra.mxu1 %v246_v31  ;;  %813 = vmatpush.msra.mxu3 %v277_v33  ;;  %v241_v51 = vld [vmem:[%s2114_s1 + $0x98] sm:$0xff]  ;;  %v224_v54 = vld [vmem:[%s2114_s1 + $0x10] sm:$0xff]  ;;  %v271_v57 = vld [vmem:[%s2114_s1 + $0x188] sm:$0xff] }
  0x14   :  { %294 = vmatpush.msra.mxu0 %v229_v34  ;;  %641 = vmatpush.msra.mxu2 %v260_v36  ;;  %v240_v55 = vld [vmem:[%s2114_s1 + $0x90] sm:$0xff]  ;;  %v223_v58 = vld [vmem:[%s2114_s1 + $0x8] sm:$0xff]  ;;  %v254_v60 = vld [vmem:[%s2114_s1 + $0x100] sm:$0xff] }
  0x15   :  { %467 = vmatpush.msra.mxu1 %v245_v35  ;;  %814 = vmatpush.msra.mxu3 %v276_v37  ;;  %v239_v59 = vld [vmem:[%s2114_s1 + $0x88] sm:$0xff]  ;;  %v270_v61 = vld [vmem:[%s2114_s1 + $0x180] sm:$0xff]  ;;  %v16_v62 = vld [vmem:[%s2115_s0 + $0x10] sm:$0xff] }
  0x16   :  { %295 = vmatpush.msra.mxu0 %v228_v38  ;;  %642 = vmatpush.msra.mxu2 %v259_v40  ;;  %v17_v63 = vld [vmem:[%s2115_s0 + $0x18] sm:$0xff]  ;;  %v222_v0 = vld [vmem:[%s2114_s1] sm:$0xff]  ;;  %v15_v3 = vld [vmem:[%s2115_s0 + $0x8] sm:$0xff] }
  0x17   :  { %468 = vmatpush.msra.mxu1 %v244_v39  ;;  %815 = vmatpush.msra.mxu3 %v275_v41  ;;  %v238_v1 = vld [vmem:[%s2114_s1 + $0x80] sm:$0xff]  ;;  %v20_v4 = vld [vmem:[%s2115_s0 + $0x30] sm:$0xff]  ;;  %v21_v5 = vld [vmem:[%s2115_s0 + $0x38] sm:$0xff] }
  0x18   :  { %296 = vmatpush.msra.mxu0 %v227_v42  ;;  %643 = vmatpush.msra.mxu2 %v258_v44  ;;  %v14_v2 = vld [vmem:[%s2115_s0] sm:$0xff]  ;;  %v19_v7 = vld [vmem:[%s2115_s0 + $0x28] sm:$0xff]  ;;  %v24_v8 = vld [vmem:[%s2115_s0 + $0x50] sm:$0xff] }
  0x19   :  { %469 = vmatpush.msra.mxu1 %v243_v43  ;;  %816 = vmatpush.msra.mxu3 %v274_v45  ;;  %v18_v6 = vld [vmem:[%s2115_s0 + $0x20] sm:$0xff]  ;;  %v25_v9 = vld [vmem:[%s2115_s0 + $0x58] sm:$0xff]  ;;  %v23_v11 = vld [vmem:[%s2115_s0 + $0x48] sm:$0xff] }
  0x1a   :  { %297 = vmatpush.msra.mxu0 %v226_v46  ;;  %644 = vmatpush.msra.mxu2 %v257_v48  ;;  %v22_v10 = vld [vmem:[%s2115_s0 + $0x40] sm:$0xff]  ;;  %v28_v12 = vld [vmem:[%s2115_s0 + $0x70] sm:$0xff]  ;;  %v29_v13 = vld [vmem:[%s2115_s0 + $0x78] sm:$0xff] }
  0x1b   :  { %470 = vmatpush.msra.mxu1 %v242_v47  ;;  %817 = vmatpush.msra.mxu3 %v273_v49  ;;  %v26_v14 = vld [vmem:[%s2115_s0 + $0x60] sm:$0xff]  ;;  %v27_v15 = vld [vmem:[%s2115_s0 + $0x68] sm:$0xff]  ;;  %v32_v16 = vld [vmem:[%s2115_s0 + $0x90] sm:$0xff] }
  0x1c   :  { %298 = vmatpush.msra.mxu0 %v225_v50  ;;  %645 = vmatpush.msra.mxu2 %v256_v52  ;;  %v33_v17 = vld [vmem:[%s2115_s0 + $0x98] sm:$0xff]  ;;  %v30_v18 = vld [vmem:[%s2115_s0 + $0x80] sm:$0xff]  ;;  %v31_v19 = vld [vmem:[%s2115_s0 + $0x88] sm:$0xff] }
  0x1d   :  { %471 = vmatpush.msra.mxu1 %v241_v51  ;;  %818 = vmatpush.msra.mxu3 %v272_v53  ;;  %v36_v20 = vld [vmem:[%s2115_s0 + $0xb0] sm:$0xff]  ;;  %v37_v21 = vld [vmem:[%s2115_s0 + $0xb8] sm:$0xff]  ;;  %v34_v22 = vld [vmem:[%s2115_s0 + $0xa0] sm:$0xff] }
  0x1e   :  { %299 = vmatpush.msra.mxu0 %v224_v54  ;;  %646 = vmatpush.msra.mxu2 %v255_v56  ;;  %v35_v23 = vld [vmem:[%s2115_s0 + $0xa8] sm:$0xff]  ;;  %v40_v24 = vld [vmem:[%s2115_s0 + $0xd0] sm:$0xff]  ;;  %v41_v25 = vld [vmem:[%s2115_s0 + $0xd8] sm:$0xff] }
  0x1f   :  { %472 = vmatpush.msra.mxu1 %v240_v55  ;;  %819 = vmatpush.msra.mxu3 %v271_v57  ;;  %v38_v26 = vld [vmem:[%s2115_s0 + $0xc0] sm:$0xff]  ;;  %v39_v27 = vld [vmem:[%s2115_s0 + $0xc8] sm:$0xff]  ;;  %v44_v28 = vld [vmem:[%s2115_s0 + $0xf0] sm:$0xff] }
  0x20   :  { %300 = vmatpush.msra.mxu0 %v223_v58  ;;  %647 = vmatpush.msra.mxu2 %v254_v60  ;;  %v45_v29 = vld [vmem:[%s2115_s0 + $0xf8] sm:$0xff]  ;;  %v42_v30 = vld [vmem:[%s2115_s0 + $0xe0] sm:$0xff]  ;;  %v43_v31 = vld [vmem:[%s2115_s0 + $0xe8] sm:$0xff] }
  0x21   :  { %473 = vmatpush.msra.mxu1 %v239_v59  ;;  %820 = vmatpush.msra.mxu3 %v270_v61  ;;  %v48_v32 = vld [vmem:[%s2115_s0 + $0x110] sm:$0xff]  ;;  %v49_v33 = vld [vmem:[%s2115_s0 + $0x118] sm:$0xff]  ;;  %v46_v34 = vld [vmem:[%s2115_s0 + $0x100] sm:$0xff] }
  0x22   :  { %648 = vmatmul.f32.vlgmr.msra.gmra.mxu2 %v16_v62  ;;  %821 = vmatmul.f32.vlgmr.msra.gmra.mxu3 %v17_v63  ;;  %v47_v35 = vld [vmem:[%s2115_s0 + $0x108] sm:$0xff]  ;;  %v52_v36 = vld [vmem:[%s2115_s0 + $0x130] sm:$0xff]  ;;  %v53_v37 = vld [vmem:[%s2115_s0 + $0x138] sm:$0xff] }
  0x23   :  { %301 = vmatpush.msra.mxu0 %v222_v0  ;;  %474 = vmatpush.msra.mxu1 %v238_v1  ;;  %v50_v38 = vld [vmem:[%s2115_s0 + $0x120] sm:$0xff]  ;;  %v51_v39 = vld [vmem:[%s2115_s0 + $0x128] sm:$0xff]  ;;  %v56_v40 = vld [vmem:[%s2115_s0 + $0x150] sm:$0xff] }
  0x24   :  { %302 = vmatmul.f32.vlgmr.msra.gmra.mxu0 %v14_v2  ;;  %475 = vmatmul.f32.vlgmr.msra.gmra.mxu1 %v15_v3  ;;  %v57_v41 = vld [vmem:[%s2115_s0 + $0x158] sm:$0xff]  ;;  %v54_v42 = vld [vmem:[%s2115_s0 + $0x140] sm:$0xff]  ;;  %v55_v43 = vld [vmem:[%s2115_s0 + $0x148] sm:$0xff] }
  0x25   :  { %v60_v44 = vld [vmem:[%s2115_s0 + $0x170] sm:$0xff]  ;;  %v61_v45 = vld [vmem:[%s2115_s0 + $0x178] sm:$0xff]  ;;  %v58_v46 = vld [vmem:[%s2115_s0 + $0x160] sm:$0xff] }
  0x26   :  { %v59_v47 = vld [vmem:[%s2115_s0 + $0x168] sm:$0xff]  ;;  %v64_v48 = vld [vmem:[%s2115_s0 + $0x190] sm:$0xff]  ;;  %v65_v49 = vld [vmem:[%s2115_s0 + $0x198] sm:$0xff] }
  0x27   :  { %v62_v50 = vld [vmem:[%s2115_s0 + $0x180] sm:$0xff]  ;;  %v63_v51 = vld [vmem:[%s2115_s0 + $0x188] sm:$0xff]  ;;  %v68_v52 = vld [vmem:[%s2115_s0 + $0x1b0] sm:$0xff] }
  0x28   :  { %v69_v53 = vld [vmem:[%s2115_s0 + $0x1b8] sm:$0xff]  ;;  %v66_v54 = vld [vmem:[%s2115_s0 + $0x1a0] sm:$0xff]  ;;  %v67_v55 = vld [vmem:[%s2115_s0 + $0x1a8] sm:$0xff] }
  0x29   :  { %v72_v56 = vld [vmem:[%s2115_s0 + $0x1d0] sm:$0xff]  ;;  %v73_v57 = vld [vmem:[%s2115_s0 + $0x1d8] sm:$0xff]  ;;  %v70_v58 = vld [vmem:[%s2115_s0 + $0x1c0] sm:$0xff] }
  0x2a   :  { %651 = vmatmul.f32.gmra.mxu2 %v20_v4  ;;  %824 = vmatmul.f32.gmra.mxu3 %v21_v5  ;;  %v71_v59 = vld [vmem:[%s2115_s0 + $0x1c8] sm:$0xff]  ;;  %v76_v60 = vld [vmem:[%s2115_s0 + $0x1f0] sm:$0xff]  ;;  %v77_v61 = vld [vmem:[%s2115_s0 + $0x1f8] sm:$0xff] }
  0x2b   :  { %v74_v62 = vld [vmem:[%s2115_s0 + $0x1e0] sm:$0xff]  ;;  %v75_v63 = vld [vmem:[%s2115_s0 + $0x1e8] sm:$0xff]  ;;  %v80_v0 = vld [vmem:[%s2115_s0 + $0x210] sm:$0xff] }
  0x2c   :  { %305 = vmatmul.f32.gmra.mxu0 %v18_v6  ;;  %478 = vmatmul.f32.gmra.mxu1 %v19_v7  ;;  %v81_v1 = vld [vmem:[%s2115_s0 + $0x218] sm:$0xff]  ;;  %v78_v4 = vld [vmem:[%s2115_s0 + $0x200] sm:$0xff]  ;;  %v79_v5 = vld [vmem:[%s2115_s0 + $0x208] sm:$0xff] }
  0x32   :  { %654 = vmatmul.f32.gmra.mxu2 %v24_v8  ;;  %827 = vmatmul.f32.gmra.mxu3 %v25_v9 }
  0x34   :  { %308 = vmatmul.f32.gmra.mxu0 %v22_v10  ;;  %481 = vmatmul.f32.gmra.mxu1 %v23_v11  ;;  %v84_v10 = vld [vmem:[%s2115_s0 + $0x230] sm:$0xff]  ;;  %v85_v11 = vld [vmem:[%s2115_s0 + $0x238] sm:$0xff] }
  0x3a   :  { %657 = vmatmul.f32.gmra.mxu2 %v28_v12  ;;  %830 = vmatmul.f32.gmra.mxu3 %v29_v13 }
  0x3c   :  { %311 = vmatmul.f32.gmra.mxu0 %v26_v14  ;;  %484 = vmatmul.f32.gmra.mxu1 %v27_v15  ;;  %v82_v15 = vld [vmem:[%s2115_s0 + $0x220] sm:$0xff] }
  0x42   :  { %660 = vmatmul.f32.gmra.mxu2 %v32_v16  ;;  %833 = vmatmul.f32.gmra.mxu3 %v33_v17  ;;  %v83_v16 = vld [vmem:[%s2115_s0 + $0x228] sm:$0xff] }
  0x44   :  { %314 = vmatmul.f32.gmra.mxu0 %v30_v18  ;;  %487 = vmatmul.f32.gmra.mxu1 %v31_v19 }
  0x4a   :  { %663 = vmatmul.f32.gmra.mxu2 %v36_v20  ;;  %836 = vmatmul.f32.gmra.mxu3 %v37_v21  ;;  %v88_v21 = vld [vmem:[%s2115_s0 + $0x250] sm:$0xff] }
  0x4c   :  { %317 = vmatmul.f32.gmra.mxu0 %v34_v22  ;;  %490 = vmatmul.f32.gmra.mxu1 %v35_v23  ;;  %v89_v22 = vld [vmem:[%s2115_s0 + $0x258] sm:$0xff] }
  0x52   :  { %666 = vmatmul.f32.gmra.mxu2 %v40_v24  ;;  %839 = vmatmul.f32.gmra.mxu3 %v41_v25 }
  0x54   :  { %320 = vmatmul.f32.gmra.mxu0 %v38_v26  ;;  %493 = vmatmul.f32.gmra.mxu1 %v39_v27  ;;  %v86_v26 = vld [vmem:[%s2115_s0 + $0x240] sm:$0xff]  ;;  %v87_v27 = vld [vmem:[%s2115_s0 + $0x248] sm:$0xff] }
  0x5a   :  { %669 = vmatmul.f32.gmra.mxu2 %v44_v28  ;;  %842 = vmatmul.f32.gmra.mxu3 %v45_v29 }
  0x5c   :  { %323 = vmatmul.f32.gmra.mxu0 %v42_v30  ;;  %496 = vmatmul.f32.gmra.mxu1 %v43_v31 }
  0x62   :  { %672 = vmatmul.f32.gmra.mxu2 %v48_v32  ;;  %845 = vmatmul.f32.gmra.mxu3 %v49_v33  ;;  %v92_v32 = vld [vmem:[%s2115_s0 + $0x270] sm:$0xff]  ;;  %v93_v33 = vld [vmem:[%s2115_s0 + $0x278] sm:$0xff] }
  0x64   :  { %326 = vmatmul.f32.gmra.mxu0 %v46_v34  ;;  %499 = vmatmul.f32.gmra.mxu1 %v47_v35 }
  0x6a   :  { %675 = vmatmul.f32.gmra.mxu2 %v52_v36  ;;  %848 = vmatmul.f32.gmra.mxu3 %v53_v37  ;;  %v90_v37 = vld [vmem:[%s2115_s0 + $0x260] sm:$0xff] }
  0x6c   :  { %329 = vmatmul.f32.gmra.mxu0 %v50_v38  ;;  %502 = vmatmul.f32.gmra.mxu1 %v51_v39  ;;  %v91_v38 = vld [vmem:[%s2115_s0 + $0x268] sm:$0xff] }
  0x72   :  { %678 = vmatmul.f32.gmra.mxu2 %v56_v40  ;;  %851 = vmatmul.f32.gmra.mxu3 %v57_v41 }
  0x74   :  { %332 = vmatmul.f32.gmra.mxu0 %v54_v42  ;;  %505 = vmatmul.f32.gmra.mxu1 %v55_v43  ;;  %v96_v43 = vld [vmem:[%s2115_s0 + $0x290] sm:$0xff] }
  0x7a   :  { %681 = vmatmul.f32.gmra.mxu2 %v60_v44  ;;  %854 = vmatmul.f32.gmra.mxu3 %v61_v45  ;;  %v97_v44 = vld [vmem:[%s2115_s0 + $0x298] sm:$0xff] }
  0x7c   :  { %335 = vmatmul.f32.gmra.mxu0 %v58_v46  ;;  %508 = vmatmul.f32.gmra.mxu1 %v59_v47 }
  0x82   :  { %684 = vmatmul.f32.gmra.mxu2 %v64_v48  ;;  %857 = vmatmul.f32.gmra.mxu3 %v65_v49  ;;  %v94_v48 = vld [vmem:[%s2115_s0 + $0x280] sm:$0xff]  ;;  %v95_v49 = vld [vmem:[%s2115_s0 + $0x288] sm:$0xff] }
  0x84   :  { %338 = vmatmul.f32.gmra.mxu0 %v62_v50  ;;  %511 = vmatmul.f32.gmra.mxu1 %v63_v51 }
  0x8a   :  { %687 = vmatmul.f32.gmra.mxu2 %v68_v52  ;;  %860 = vmatmul.f32.gmra.mxu3 %v69_v53 }
  0x8c   :  { %341 = vmatmul.f32.gmra.mxu0 %v66_v54  ;;  %514 = vmatmul.f32.gmra.mxu1 %v67_v55  ;;  %v100_v54 = vld [vmem:[%s2115_s0 + $0x2b0] sm:$0xff]  ;;  %v101_v55 = vld [vmem:[%s2115_s0 + $0x2b8] sm:$0xff] }
  0x92   :  { %690 = vmatmul.f32.gmra.mxu2 %v72_v56  ;;  %863 = vmatmul.f32.gmra.mxu3 %v73_v57 }
  0x94   :  { %344 = vmatmul.f32.gmra.mxu0 %v70_v58  ;;  %517 = vmatmul.f32.gmra.mxu1 %v71_v59  ;;  %v98_v59 = vld [vmem:[%s2115_s0 + $0x2a0] sm:$0xff] }
  0x9a   :  { %693 = vmatmul.f32.gmra.mxu2 %v76_v60  ;;  %866 = vmatmul.f32.gmra.mxu3 %v77_v61  ;;  %v99_v60 = vld [vmem:[%s2115_s0 + $0x2a8] sm:$0xff] }
  0x9c   :  { %347 = vmatmul.f32.gmra.mxu0 %v74_v62  ;;  %520 = vmatmul.f32.gmra.mxu1 %v75_v63 }
  0xa1   :  { %v303_v2 = vpop.f32.mrf.mxu0  ;;  %v476_v3 = vpop.f32.mrf.mxu1 }
  0xa2   :  { %696 = vmatmul.f32.gmra.mxu2 %v80_v0  ;;  %v477_v6 = vadd.f32 %v476_v3, %v303_v2  ;;  %869 = vmatmul.f32.gmra.mxu3 %v81_v1  ;;  %v104_v1 = vld [vmem:[%s2115_s0 + $0x2d0] sm:$0xff]  ;;  %v105_v2 = vld [vmem:[%s2115_s0 + $0x2d8] sm:$0xff] }
  0xa4   :  { %350 = vmatmul.f32.gmra.mxu0 %v78_v4  ;;  %523 = vmatmul.f32.gmra.mxu1 %v79_v5 }
  0xa5   :  { %v649_v7 = vpop.f32.mrf.mxu2  ;;  %v822_v8 = vpop.f32.mrf.mxu3 }
  0xa6   :  { %v650_v9 = vadd.f32 %v649_v7, %v477_v6  ;;  %v102_v6 = vld [vmem:[%s2115_s0 + $0x2c0] sm:$0xff]  ;;  %v103_v7 = vld [vmem:[%s2115_s0 + $0x2c8] sm:$0xff] }
  0xa8   :  { %v1487_v12 = vadd.f32 %v822_v8, %v650_v9 }
  0xa9   :  { %v306_v13 = vpop.f32.mrf.mxu0  ;;  %v479_v14 = vpop.f32.mrf.mxu1 }
  0xaa   :  { %699 = vmatmul.f32.gmra.mxu2 %v84_v10  ;;  %v480_v17 = vadd.f32 %v479_v14, %v306_v13  ;;  %872 = vmatmul.f32.gmra.mxu3 %v85_v11  ;;  %v108_v13 = vld [vmem:[%s2115_s0 + $0x2f0] sm:$0xff]  ;;  %v109_v14 = vld [vmem:[%s2115_s0 + $0x2f8] sm:$0xff] }
  0xac   :  { %353 = vmatmul.f32.gmra.mxu0 %v82_v15  ;;  %526 = vmatmul.f32.gmra.mxu1 %v83_v16 }
  0xad   :  { %v652_v18 = vpop.f32.mrf.mxu2  ;;  %v825_v19 = vpop.f32.mrf.mxu3 }
  0xae   :  { %v653_v20 = vadd.f32 %v652_v18, %v480_v17  ;;  %v106_v18 = vld [vmem:[%s2115_s0 + $0x2e0] sm:$0xff] }
  0xb0   :  { %v1501_v23 = vadd.f32 %v825_v19, %v653_v20  ;;  %v107_v19 = vld [vmem:[%s2115_s0 + $0x2e8] sm:$0xff] }
  0xb1   :  { %v309_v24 = vpop.f32.mrf.mxu0  ;;  %v482_v25 = vpop.f32.mrf.mxu1 }
  0xb2   :  { %702 = vmatmul.f32.gmra.mxu2 %v88_v21  ;;  %v483_v28 = vadd.f32 %v482_v25, %v309_v24  ;;  %875 = vmatmul.f32.gmra.mxu3 %v89_v22  ;;  %v112_v25 = vld [vmem:[%s2115_s0 + $0x310] sm:$0xff] }
  0xb4   :  { %356 = vmatmul.f32.gmra.mxu0 %v86_v26  ;;  %529 = vmatmul.f32.gmra.mxu1 %v87_v27  ;;  %v113_v26 = vld [vmem:[%s2115_s0 + $0x318] sm:$0xff] }
  0xb5   :  { %v655_v29 = vpop.f32.mrf.mxu2  ;;  %v828_v30 = vpop.f32.mrf.mxu3 }
  0xb6   :  { %v656_v31 = vadd.f32 %v655_v29, %v483_v28 }
  0xb8   :  { %v1515_v34 = vadd.f32 %v828_v30, %v656_v31  ;;  %v110_v30 = vld [vmem:[%s2115_s0 + $0x300] sm:$0xff]  ;;  %v111_v31 = vld [vmem:[%s2115_s0 + $0x308] sm:$0xff] }
  0xb9   :  { %v312_v35 = vpop.f32.mrf.mxu0  ;;  %v485_v36 = vpop.f32.mrf.mxu1 }
  0xba   :  { %705 = vmatmul.f32.gmra.mxu2 %v92_v32  ;;  %v486_v39 = vadd.f32 %v485_v36, %v312_v35  ;;  %878 = vmatmul.f32.gmra.mxu3 %v93_v33 }
  0xbc   :  { %359 = vmatmul.f32.gmra.mxu0 %v90_v37  ;;  %532 = vmatmul.f32.gmra.mxu1 %v91_v38  ;;  %v116_v37 = vld [vmem:[%s2115_s0 + $0x330] sm:$0xff]  ;;  %v117_v38 = vld [vmem:[%s2115_s0 + $0x338] sm:$0xff] }
  0xbd   :  { %v658_v40 = vpop.f32.mrf.mxu2  ;;  %v831_v41 = vpop.f32.mrf.mxu3 }
  0xbe   :  { %v659_v42 = vadd.f32 %v658_v40, %v486_v39 }
  0xc0   :  { %v1529_v45 = vadd.f32 %v831_v41, %v659_v42  ;;  %v114_v42 = vld [vmem:[%s2115_s0 + $0x320] sm:$0xff] }
  0xc1   :  { %v315_v46 = vpop.f32.mrf.mxu0  ;;  %v488_v47 = vpop.f32.mrf.mxu1 }
  0xc2   :  { %708 = vmatmul.f32.gmra.mxu2 %v96_v43  ;;  %v489_v50 = vadd.f32 %v488_v47, %v315_v46  ;;  %881 = vmatmul.f32.gmra.mxu3 %v97_v44  ;;  %v115_v43 = vld [vmem:[%s2115_s0 + $0x328] sm:$0xff] }
  0xc4   :  { %362 = vmatmul.f32.gmra.mxu0 %v94_v48  ;;  %535 = vmatmul.f32.gmra.mxu1 %v95_v49  ;;  %v120_v49 = vld [vmem:[%s2115_s0 + $0x350] sm:$0xff] }
  0xc5   :  { %v661_v51 = vpop.f32.mrf.mxu2  ;;  %v834_v52 = vpop.f32.mrf.mxu3 }
  0xc6   :  { %v662_v53 = vadd.f32 %v661_v51, %v489_v50  ;;  %v121_v50 = vld [vmem:[%s2115_s0 + $0x358] sm:$0xff] }
  0xc8   :  { %v1543_v56 = vadd.f32 %v834_v52, %v662_v53 }
  0xc9   :  { %v318_v57 = vpop.f32.mrf.mxu0  ;;  %v491_v58 = vpop.f32.mrf.mxu1 }
  0xca   :  { %711 = vmatmul.f32.gmra.mxu2 %v100_v54  ;;  %v492_v61 = vadd.f32 %v491_v58, %v318_v57  ;;  %884 = vmatmul.f32.gmra.mxu3 %v101_v55  ;;  %v118_v54 = vld [vmem:[%s2115_s0 + $0x340] sm:$0xff]  ;;  %v119_v55 = vld [vmem:[%s2115_s0 + $0x348] sm:$0xff] }
  0xcc   :  { %365 = vmatmul.f32.gmra.mxu0 %v98_v59  ;;  %538 = vmatmul.f32.gmra.mxu1 %v99_v60 }
  0xcd   :  { %v664_v62 = vpop.f32.mrf.mxu2  ;;  %v837_v63 = vpop.f32.mrf.mxu3 }
  0xce   :  { %v665_v0 = vadd.f32 %v664_v62, %v492_v61  ;;  %v124_v61 = vld [vmem:[%s2115_s0 + $0x370] sm:$0xff]  ;;  %v125_v62 = vld [vmem:[%s2115_s0 + $0x378] sm:$0xff] }
  0xd0   :  { %v1557_v3 = vadd.f32 %v837_v63, %v665_v0 }
  0xd1   :  { %v321_v4 = vpop.f32.mrf.mxu0  ;;  %v494_v5 = vpop.f32.mrf.mxu1 }
  0xd2   :  { %714 = vmatmul.f32.gmra.mxu2 %v104_v1  ;;  %v495_v8 = vadd.f32 %v494_v5, %v321_v4  ;;  %887 = vmatmul.f32.gmra.mxu3 %v105_v2  ;;  %v122_v2 = vld [vmem:[%s2115_s0 + $0x360] sm:$0xff]  ;;  %v123_v4 = vld [vmem:[%s2115_s0 + $0x368] sm:$0xff] }
  0xd4   :  { %368 = vmatmul.f32.gmra.mxu0 %v102_v6  ;;  %541 = vmatmul.f32.gmra.mxu1 %v103_v7 }
  0xd5   :  { %v667_v9 = vpop.f32.mrf.mxu2  ;;  %v840_v10 = vpop.f32.mrf.mxu3 }
  0xd6   :  { %v668_v11 = vadd.f32 %v667_v9, %v495_v8  ;;  %v128_v9 = vld [vmem:[%s2115_s0 + $0x390] sm:$0xff] }
  0xd8   :  { %v1571_v15 = vadd.f32 %v840_v10, %v668_v11  ;;  %v129_v10 = vld [vmem:[%s2115_s0 + $0x398] sm:$0xff] }
  0xd9   :  { %v324_v16 = vpop.f32.mrf.mxu0  ;;  %v497_v17 = vpop.f32.mrf.mxu1 }
  0xda   :  { %717 = vmatmul.f32.gmra.mxu2 %v108_v13  ;;  %v498_v20 = vadd.f32 %v497_v17, %v324_v16  ;;  %890 = vmatmul.f32.gmra.mxu3 %v109_v14  ;;  %v126_v16 = vld [vmem:[%s2115_s0 + $0x380] sm:$0xff]  ;;  %v127_v17 = vld [vmem:[%s2115_s0 + $0x388] sm:$0xff] }
  0xdc   :  { %371 = vmatmul.f32.gmra.mxu0 %v106_v18  ;;  %544 = vmatmul.f32.gmra.mxu1 %v107_v19 }
  0xdd   :  { %v670_v21 = vpop.f32.mrf.mxu2  ;;  %v843_v22 = vpop.f32.mrf.mxu3 }
  0xde   :  { %v671_v24 = vadd.f32 %v670_v21, %v498_v20 }
  0xe0   :  { %v1585_v27 = vadd.f32 %v843_v22, %v671_v24  ;;  %v132_v22 = vld [vmem:[%s2115_s0 + $0x3b0] sm:$0xff]  ;;  %v133_v24 = vld [vmem:[%s2115_s0 + $0x3b8] sm:$0xff] }
  0xe1   :  { %v327_v28 = vpop.f32.mrf.mxu0  ;;  %v500_v29 = vpop.f32.mrf.mxu1 }
  0xe2   :  { %720 = vmatmul.f32.gmra.mxu2 %v112_v25  ;;  %v501_v32 = vadd.f32 %v500_v29, %v327_v28  ;;  %893 = vmatmul.f32.gmra.mxu3 %v113_v26  ;;  %v130_v29 = vld [vmem:[%s2115_s0 + $0x3a0] sm:$0xff] }
  0xe4   :  { %374 = vmatmul.f32.gmra.mxu0 %v110_v30  ;;  %547 = vmatmul.f32.gmra.mxu1 %v111_v31  ;;  %v131_v30 = vld [vmem:[%s2115_s0 + $0x3a8] sm:$0xff] }
  0xe5   :  { %v673_v33 = vpop.f32.mrf.mxu2  ;;  %v846_v35 = vpop.f32.mrf.mxu3 }
  0xe6   :  { %v674_v36 = vadd.f32 %v673_v33, %v501_v32 }
  0xe8   :  { %v1599_v39 = vadd.f32 %v846_v35, %v674_v36  ;;  %v136_v36 = vld [vmem:[%s2115_s0 + $0x3d0] sm:$0xff] }
  0xe9   :  { %v330_v40 = vpop.f32.mrf.mxu0  ;;  %v503_v41 = vpop.f32.mrf.mxu1 }
  0xea   :  { %723 = vmatmul.f32.gmra.mxu2 %v116_v37  ;;  %v504_v44 = vadd.f32 %v503_v41, %v330_v40  ;;  %896 = vmatmul.f32.gmra.mxu3 %v117_v38  ;;  %v137_v37 = vld [vmem:[%s2115_s0 + $0x3d8] sm:$0xff] }
  0xec   :  { %377 = vmatmul.f32.gmra.mxu0 %v114_v42  ;;  %550 = vmatmul.f32.gmra.mxu1 %v115_v43  ;;  %v134_v42 = vld [vmem:[%s2115_s0 + $0x3c0] sm:$0xff]  ;;  %v135_v43 = vld [vmem:[%s2115_s0 + $0x3c8] sm:$0xff] }
  0xed   :  { %v676_v46 = vpop.f32.mrf.mxu2  ;;  %v849_v47 = vpop.f32.mrf.mxu3 }
  0xee   :  { %v677_v48 = vadd.f32 %v676_v46, %v504_v44 }
  0xf0   :  { %v1613_v51 = vadd.f32 %v849_v47, %v677_v48 }
  0xf1   :  { %v333_v52 = vpop.f32.mrf.mxu0  ;;  %v506_v53 = vpop.f32.mrf.mxu1 }
  0xf2   :  { %726 = vmatmul.f32.gmra.mxu2 %v120_v49  ;;  %v507_v57 = vadd.f32 %v506_v53, %v333_v52  ;;  %899 = vmatmul.f32.gmra.mxu3 %v121_v50  ;;  %v140_v50 = vld [vmem:[%s2115_s0 + $0x3f0] sm:$0xff]  ;;  %v141_v52 = vld [vmem:[%s2115_s0 + $0x3f8] sm:$0xff] }
  0xf4   :  { %380 = vmatmul.f32.gmra.mxu0 %v118_v54  ;;  %553 = vmatmul.f32.gmra.mxu1 %v119_v55 }
  0xf5   :  { %v679_v58 = vpop.f32.mrf.mxu2  ;;  %v852_v59 = vpop.f32.mrf.mxu3 }
  0xf6   :  { %v680_v60 = vadd.f32 %v679_v58, %v507_v57  ;;  %v138_v57 = vld [vmem:[%s2115_s0 + $0x3e0] sm:$0xff]  ;;  %v139_v58 = vld [vmem:[%s2115_s0 + $0x3e8] sm:$0xff] }
  0xf8   :  { %v1627_v63 = vadd.f32 %v852_v59, %v680_v60 }
  0xf9   :  { %v336_v0 = vpop.f32.mrf.mxu0  ;;  %v509_v1 = vpop.f32.mrf.mxu1 }
  0xfa   :  { %729 = vmatmul.f32.gmra.mxu2 %v124_v61  ;;  %v510_v5 = vadd.f32 %v509_v1, %v336_v0  ;;  %902 = vmatmul.f32.gmra.mxu3 %v125_v62  ;;  %v144_v1 = vld [vmem:[%s2115_s0 + $0x410] sm:$0xff] }
  0xfc   :  { %383 = vmatmul.f32.gmra.mxu0 %v122_v2  ;;  %556 = vmatmul.f32.gmra.mxu1 %v123_v4  ;;  %v145_v2 = vld [vmem:[%s2115_s0 + $0x418] sm:$0xff] }
  0xfd   :  { %v682_v6 = vpop.f32.mrf.mxu2  ;;  %v855_v7 = vpop.f32.mrf.mxu3 }
  0xfe   :  { %v683_v8 = vadd.f32 %v682_v6, %v510_v5 }
 0x100   :  { %v1641_v11 = vadd.f32 %v855_v7, %v683_v8  ;;  %v142_v7 = vld [vmem:[%s2115_s0 + $0x400] sm:$0xff]  ;;  %v143_v8 = vld [vmem:[%s2115_s0 + $0x408] sm:$0xff] }
 0x101   :  { %v339_v13 = vpop.f32.mrf.mxu0  ;;  %v512_v14 = vpop.f32.mrf.mxu1 }
 0x102   :  { %732 = vmatmul.f32.gmra.mxu2 %v128_v9  ;;  %v513_v18 = vadd.f32 %v512_v14, %v339_v13  ;;  %905 = vmatmul.f32.gmra.mxu3 %v129_v10 }
 0x104   :  { %386 = vmatmul.f32.gmra.mxu0 %v126_v16  ;;  %559 = vmatmul.f32.gmra.mxu1 %v127_v17  ;;  %v148_v17 = vld [vmem:[%s2115_s0 + $0x430] sm:$0xff] }
 0x105   :  { %v685_v19 = vpop.f32.mrf.mxu2  ;;  %v858_v20 = vpop.f32.mrf.mxu3 }
 0x106   :  { %v686_v21 = vadd.f32 %v685_v19, %v513_v18  ;;  %v149_v18 = vld [vmem:[%s2115_s0 + $0x438] sm:$0xff] }
 0x108   :  { %v1655_v25 = vadd.f32 %v858_v20, %v686_v21 }
 0x109   :  { %v342_v26 = vpop.f32.mrf.mxu0  ;;  %v515_v28 = vpop.f32.mrf.mxu1 }
 0x10a   :  { %735 = vmatmul.f32.gmra.mxu2 %v132_v22  ;;  %v516_v31 = vadd.f32 %v515_v28, %v342_v26  ;;  %908 = vmatmul.f32.gmra.mxu3 %v133_v24  ;;  %v146_v22 = vld [vmem:[%s2115_s0 + $0x420] sm:$0xff]  ;;  %v147_v24 = vld [vmem:[%s2115_s0 + $0x428] sm:$0xff] }
 0x10c   :  { %389 = vmatmul.f32.gmra.mxu0 %v130_v29  ;;  %562 = vmatmul.f32.gmra.mxu1 %v131_v30 }
 0x10d   :  { %v688_v32 = vpop.f32.mrf.mxu2  ;;  %v861_v33 = vpop.f32.mrf.mxu3 }
 0x10e   :  { %v689_v35 = vadd.f32 %v688_v32, %v516_v31  ;;  %v152_v32 = vld [vmem:[%s2115_s0 + $0x450] sm:$0xff] }
 0x110   :  { %v1669_v38 = vadd.f32 %v861_v33, %v689_v35  ;;  %v153_v33 = vld [vmem:[%s2115_s0 + $0x458] sm:$0xff] }
 0x111   :  { %v345_v40 = vpop.f32.mrf.mxu0  ;;  %v518_v41 = vpop.f32.mrf.mxu1 }
 0x112   :  { %v978_v44 = vmax.f32 %v1487_v12, %v1669_v38  ;;  %738 = vmatmul.f32.gmra.mxu2 %v136_v36  ;;  %v519_v46 = vadd.f32 %v518_v41, %v345_v40  ;;  %911 = vmatmul.f32.gmra.mxu3 %v137_v37  ;;  %v150_v40 = vld [vmem:[%s2115_s0 + $0x440] sm:$0xff]  ;;  %v151_v41 = vld [vmem:[%s2115_s0 + $0x448] sm:$0xff] }
 0x114   :  { %392 = vmatmul.f32.gmra.mxu0 %v134_v42  ;;  %565 = vmatmul.f32.gmra.mxu1 %v135_v43 }
 0x115   :  { %v691_v47 = vpop.f32.mrf.mxu2  ;;  %v864_v48 = vpop.f32.mrf.mxu3 }
 0x116   :  { %v692_v49 = vadd.f32 %v691_v47, %v519_v46 }
 0x118   :  { %v1685_v53 = vadd.f32 %v864_v48, %v692_v49  ;;  %v156_v49 = vld [vmem:[%s2115_s0 + $0x470] sm:$0xff] }
 0x119   :  { %v348_v54 = vpop.f32.mrf.mxu0  ;;  %v521_v55 = vpop.f32.mrf.mxu1 }
 0x11a   :  { %v979_v59 = vmax.f32 %v1501_v23, %v1685_v53  ;;  %741 = vmatmul.f32.gmra.mxu2 %v140_v50  ;;  %v522_v60 = vadd.f32 %v521_v55, %v348_v54  ;;  %914 = vmatmul.f32.gmra.mxu3 %v141_v52  ;;  %v157_v50 = vld [vmem:[%s2115_s0 + $0x478] sm:$0xff] }
 0x11c   :  { %395 = vmatmul.f32.gmra.mxu0 %v138_v57  ;;  %568 = vmatmul.f32.gmra.mxu1 %v139_v58  ;;  %v154_v57 = vld [vmem:[%s2115_s0 + $0x460] sm:$0xff]  ;;  %v155_v58 = vld [vmem:[%s2115_s0 + $0x468] sm:$0xff] }
 0x11d   :  { %v694_v61 = vpop.f32.mrf.mxu2  ;;  %v867_v62 = vpop.f32.mrf.mxu3 }
 0x11e   :  { %v695_v0 = vadd.f32 %v694_v61, %v522_v60 }
 0x120   :  { %v1701_v4 = vadd.f32 %v867_v62, %v695_v0 }
 0x121   :  { %v351_v5 = vpop.f32.mrf.mxu0  ;;  %v524_v6 = vpop.f32.mrf.mxu1 }
 0x122   :  { %v980_v9 = vmax.f32 %v1515_v34, %v1701_v4  ;;  %744 = vmatmul.f32.gmra.mxu2 %v144_v1  ;;  %v525_v10 = vadd.f32 %v524_v6, %v351_v5  ;;  %917 = vmatmul.f32.gmra.mxu3 %v145_v2  ;;  %v160_v2 = vld [vmem:[%s2115_s0 + $0x490] sm:$0xff]  ;;  %v161_v5 = vld [vmem:[%s2115_s0 + $0x498] sm:$0xff] }
 0x124   :  { %398 = vmatmul.f32.gmra.mxu0 %v142_v7  ;;  %571 = vmatmul.f32.gmra.mxu1 %v143_v8 }
 0x125   :  { %v697_v13 = vpop.f32.mrf.mxu2  ;;  %v870_v14 = vpop.f32.mrf.mxu3 }
 0x126   :  { %v698_v16 = vadd.f32 %v697_v13, %v525_v10  ;;  %v158_v10 = vld [vmem:[%s2115_s0 + $0x480] sm:$0xff]  ;;  %v159_v13 = vld [vmem:[%s2115_s0 + $0x488] sm:$0xff] }
 0x128   :  { %v1717_v19 = vadd.f32 %v870_v14, %v698_v16 }
 0x129   :  { %v354_v20 = vpop.f32.mrf.mxu0  ;;  %v527_v21 = vpop.f32.mrf.mxu1 }
 0x12a   :  { %v981_v26 = vmax.f32 %v1529_v45, %v1717_v19  ;;  %747 = vmatmul.f32.gmra.mxu2 %v148_v17  ;;  %v528_v28 = vadd.f32 %v527_v21, %v354_v20  ;;  %920 = vmatmul.f32.gmra.mxu3 %v149_v18  ;;  %v164_v21 = vld [vmem:[%s2115_s0 + $0x4b0] sm:$0xff] }
 0x12c   :  { %401 = vmatmul.f32.gmra.mxu0 %v146_v22  ;;  %574 = vmatmul.f32.gmra.mxu1 %v147_v24  ;;  %v165_v22 = vld [vmem:[%s2115_s0 + $0x4b8] sm:$0xff] }
 0x12d   :  { %v700_v29 = vpop.f32.mrf.mxu2  ;;  %v873_v30 = vpop.f32.mrf.mxu3 }
 0x12e   :  { %v701_v31 = vadd.f32 %v700_v29, %v528_v28 }
 0x130   :  { %v1733_v35 = vadd.f32 %v873_v30, %v701_v31  ;;  %v162_v30 = vld [vmem:[%s2115_s0 + $0x4a0] sm:$0xff]  ;;  %v163_v31 = vld [vmem:[%s2115_s0 + $0x4a8] sm:$0xff] }
 0x131   :  { %v357_v36 = vpop.f32.mrf.mxu0  ;;  %v530_v37 = vpop.f32.mrf.mxu1 }
 0x132   :  { %v982_v42 = vmax.f32 %v1543_v56, %v1733_v35  ;;  %750 = vmatmul.f32.gmra.mxu2 %v152_v32  ;;  %v531_v43 = vadd.f32 %v530_v37, %v357_v36  ;;  %923 = vmatmul.f32.gmra.mxu3 %v153_v33 }
 0x134   :  { %404 = vmatmul.f32.gmra.mxu0 %v150_v40  ;;  %577 = vmatmul.f32.gmra.mxu1 %v151_v41  ;;  %v168_v41 = vld [vmem:[%s2115_s0 + $0x4d0] sm:$0xff] }
 0x135   :  { %v703_v46 = vpop.f32.mrf.mxu2  ;;  %v876_v47 = vpop.f32.mrf.mxu3 }
 0x136   :  { %v704_v48 = vadd.f32 %v703_v46, %v531_v43  ;;  %v169_v43 = vld [vmem:[%s2115_s0 + $0x4d8] sm:$0xff] }
 0x138   :  { %v1749_v52 = vadd.f32 %v876_v47, %v704_v48 }
 0x139   :  { %v360_v54 = vpop.f32.mrf.mxu0  ;;  %v533_v55 = vpop.f32.mrf.mxu1 }
 0x13a   :  { %v983_v60 = vmax.f32 %v1557_v3, %v1749_v52  ;;  %753 = vmatmul.f32.gmra.mxu2 %v156_v49  ;;  %v534_v61 = vadd.f32 %v533_v55, %v360_v54  ;;  %926 = vmatmul.f32.gmra.mxu3 %v157_v50  ;;  %v166_v49 = vld [vmem:[%s2115_s0 + $0x4c0] sm:$0xff]  ;;  %v167_v50 = vld [vmem:[%s2115_s0 + $0x4c8] sm:$0xff] }
 0x13c   :  { %407 = vmatmul.f32.gmra.mxu0 %v154_v57  ;;  %580 = vmatmul.f32.gmra.mxu1 %v155_v58 }
 0x13d   :  { %v706_v62 = vpop.f32.mrf.mxu2  ;;  %v879_v0 = vpop.f32.mrf.mxu3 }
 0x13e   :  { %v707_v1 = vadd.f32 %v706_v62, %v534_v61  ;;  %v172_v62 = vld [vmem:[%s2115_s0 + $0x4f0] sm:$0xff] }
 0x140   :  { %v1765_v6 = vadd.f32 %v879_v0, %v707_v1  ;;  %v173_v0 = vld [vmem:[%s2115_s0 + $0x4f8] sm:$0xff] }
 0x141   :  { %v363_v7 = vpop.f32.mrf.mxu0  ;;  %v536_v8 = vpop.f32.mrf.mxu1 }
 0x142   :  { %756 = vmatmul.f32.gmra.mxu2 %v160_v2  ;;  %v537_v16 = vadd.f32 %v536_v8, %v363_v7  ;;  %929 = vmatmul.f32.gmra.mxu3 %v161_v5  ;;  %v170_v7 = vld [vmem:[%s2115_s0 + $0x4e0] sm:$0xff]  ;;  %v171_v8 = vld [vmem:[%s2115_s0 + $0x4e8] sm:$0xff]  ;;  %v2118_v3 = vmax.f32 %v1571_v15, %v1765_v6 }
 0x144   :  { %410 = vmatmul.f32.gmra.mxu0 %v158_v10  ;;  %583 = vmatmul.f32.gmra.mxu1 %v159_v13 }
 0x145   :  { %v709_v17 = vpop.f32.mrf.mxu2  ;;  %v882_v18 = vpop.f32.mrf.mxu3 }
 0x146   :  { %v710_v20 = vadd.f32 %v709_v17, %v537_v16 }
 0x148   :  { %v1781_v24 = vadd.f32 %v882_v18, %v710_v20  ;;  %v176_v20 = vld [vmem:[%s2115_s0 + $0x510] sm:$0xff] }
 0x149   :  { %v366_v28 = vpop.f32.mrf.mxu0  ;;  %v539_v29 = vpop.f32.mrf.mxu1 }
 0x14a   :  { %759 = vmatmul.f32.gmra.mxu2 %v164_v21  ;;  %v540_v33 = vadd.f32 %v539_v29, %v366_v28  ;;  %932 = vmatmul.f32.gmra.mxu3 %v165_v22  ;;  %v177_v21 = vld [vmem:[%s2115_s0 + $0x518] sm:$0xff]  ;;  %v2119_v15 = vmax.f32 %v1585_v27, %v1781_v24 }
 0x14c   :  { %413 = vmatmul.f32.gmra.mxu0 %v162_v30  ;;  %586 = vmatmul.f32.gmra.mxu1 %v163_v31  ;;  %v174_v30 = vld [vmem:[%s2115_s0 + $0x500] sm:$0xff]  ;;  %v175_v31 = vld [vmem:[%s2115_s0 + $0x508] sm:$0xff] }
 0x14d   :  { %v712_v36 = vpop.f32.mrf.mxu2  ;;  %v885_v37 = vpop.f32.mrf.mxu3 }
 0x14e   :  { %v713_v40 = vadd.f32 %v712_v36, %v540_v33 }
 0x150   :  { %v1797_v46 = vadd.f32 %v885_v37, %v713_v40 }
 0x151   :  { %v369_v47 = vpop.f32.mrf.mxu0  ;;  %v542_v48 = vpop.f32.mrf.mxu1 }
 0x152   :  { %762 = vmatmul.f32.gmra.mxu2 %v168_v41  ;;  %v543_v55 = vadd.f32 %v542_v48, %v369_v47  ;;  %935 = vmatmul.f32.gmra.mxu3 %v169_v43  ;;  %v180_v43 = vld [vmem:[%s2115_s0 + $0x530] sm:$0xff]  ;;  %v181_v47 = vld [vmem:[%s2115_s0 + $0x538] sm:$0xff]  ;;  %v2120_v27 = vmax.f32 %v1599_v39, %v1797_v46 }
 0x154   :  { %416 = vmatmul.f32.gmra.mxu0 %v166_v49  ;;  %589 = vmatmul.f32.gmra.mxu1 %v167_v50 }
 0x155   :  { %v715_v57 = vpop.f32.mrf.mxu2  ;;  %v888_v58 = vpop.f32.mrf.mxu3 }
 0x156   :  { %v716_v61 = vadd.f32 %v715_v57, %v543_v55  ;;  %v178_v55 = vld [vmem:[%s2115_s0 + $0x520] sm:$0xff]  ;;  %v179_v57 = vld [vmem:[%s2115_s0 + $0x528] sm:$0xff] }
 0x158   :  { %v1813_v1 = vadd.f32 %v888_v58, %v716_v61 }
 0x159   :  { %v372_v2 = vpop.f32.mrf.mxu0  ;;  %v545_v5 = vpop.f32.mrf.mxu1 }
 0x15a   :  { %765 = vmatmul.f32.gmra.mxu2 %v172_v62  ;;  %v546_v13 = vadd.f32 %v545_v5, %v372_v2  ;;  %938 = vmatmul.f32.gmra.mxu3 %v173_v0  ;;  %v184_v5 = vld [vmem:[%s2115_s0 + $0x550] sm:$0xff]  ;;  %v2121_v39 = vmax.f32 %v1613_v51, %v1813_v1 }
 0x15c   :  { %419 = vmatmul.f32.gmra.mxu0 %v170_v7  ;;  %592 = vmatmul.f32.gmra.mxu1 %v171_v8  ;;  %v185_v7 = vld [vmem:[%s2115_s0 + $0x558] sm:$0xff] }
 0x15d   :  { %v718_v16 = vpop.f32.mrf.mxu2  ;;  %v891_v17 = vpop.f32.mrf.mxu3 }
 0x15e   :  { %v719_v18 = vadd.f32 %v718_v16, %v546_v13 }
 0x160   :  { %v1829_v22 = vadd.f32 %v891_v17, %v719_v18  ;;  %v182_v17 = vld [vmem:[%s2115_s0 + $0x540] sm:$0xff]  ;;  %v183_v18 = vld [vmem:[%s2115_s0 + $0x548] sm:$0xff] }
 0x161   :  { %v375_v28 = vpop.f32.mrf.mxu0  ;;  %v548_v29 = vpop.f32.mrf.mxu1 }
 0x162   :  { %768 = vmatmul.f32.gmra.mxu2 %v176_v20  ;;  %v549_v36 = vadd.f32 %v548_v29, %v375_v28  ;;  %941 = vmatmul.f32.gmra.mxu3 %v177_v21  ;;  %v2122_v51 = vmax.f32 %v1627_v63, %v1829_v22 }
 0x164   :  { %422 = vmatmul.f32.gmra.mxu0 %v174_v30  ;;  %595 = vmatmul.f32.gmra.mxu1 %v175_v31  ;;  %v188_v31 = vld [vmem:[%s2115_s0 + $0x570] sm:$0xff] }
 0x165   :  { %v721_v37 = vpop.f32.mrf.mxu2  ;;  %v894_v40 = vpop.f32.mrf.mxu3 }
 0x166   :  { %v722_v41 = vadd.f32 %v721_v37, %v549_v36  ;;  %v189_v36 = vld [vmem:[%s2115_s0 + $0x578] sm:$0xff] }
 0x168   :  { %v1845_v48 = vadd.f32 %v894_v40, %v722_v41 }
 0x169   :  { %v378_v49 = vpop.f32.mrf.mxu0  ;;  %v551_v50 = vpop.f32.mrf.mxu1 }
 0x16a   :  { %771 = vmatmul.f32.gmra.mxu2 %v180_v43  ;;  %v552_v61 = vadd.f32 %v551_v50, %v378_v49  ;;  %944 = vmatmul.f32.gmra.mxu3 %v181_v47  ;;  %v186_v43 = vld [vmem:[%s2115_s0 + $0x560] sm:$0xff]  ;;  %v187_v47 = vld [vmem:[%s2115_s0 + $0x568] sm:$0xff]  ;;  %v2123_v63 = vmax.f32 %v1641_v11, %v1845_v48 }
 0x16c   :  { %425 = vmatmul.f32.gmra.mxu0 %v178_v55  ;;  %598 = vmatmul.f32.gmra.mxu1 %v179_v57 }
 0x16d   :  { %v724_v62 = vpop.f32.mrf.mxu2  ;;  %v897_v0 = vpop.f32.mrf.mxu3 }
 0x16e   :  { %v725_v2 = vadd.f32 %v724_v62, %v552_v61  ;;  %v192_v61 = vld [vmem:[%s2115_s0 + $0x590] sm:$0xff]  ;;  %v193_v62 = vld [vmem:[%s2115_s0 + $0x598] sm:$0xff] }
 0x170   :  { %v1861_v8 = vadd.f32 %v897_v0, %v725_v2 }
 0x171   :  { %v381_v13 = vpop.f32.mrf.mxu0  ;;  %v554_v16 = vpop.f32.mrf.mxu1 }
 0x172   :  { %774 = vmatmul.f32.gmra.mxu2 %v184_v5  ;;  %v555_v21 = vadd.f32 %v554_v16, %v381_v13  ;;  %947 = vmatmul.f32.gmra.mxu3 %v185_v7  ;;  %v190_v7 = vld [vmem:[%s2115_s0 + $0x580] sm:$0xff]  ;;  %v191_v13 = vld [vmem:[%s2115_s0 + $0x588] sm:$0xff] }
 0x174   :  { %428 = vmatmul.f32.gmra.mxu0 %v182_v17  ;;  %601 = vmatmul.f32.gmra.mxu1 %v183_v18 }
 0x175   :  { %v727_v28 = vpop.f32.mrf.mxu2  ;;  %v900_v29 = vpop.f32.mrf.mxu3 }
 0x176   :  { %v728_v30 = vadd.f32 %v727_v28, %v555_v21  ;;  %v196_v28 = vld [vmem:[%s2115_s0 + $0x5b0] sm:$0xff] }
 0x178   :  { %v1877_v37 = vadd.f32 %v900_v29, %v728_v30  ;;  %v197_v29 = vld [vmem:[%s2115_s0 + $0x5b8] sm:$0xff] }
 0x179   :  { %v384_v40 = vpop.f32.mrf.mxu0  ;;  %v557_v41 = vpop.f32.mrf.mxu1 }
 0x17a   :  { %777 = vmatmul.f32.gmra.mxu2 %v188_v31  ;;  %v558_v49 = vadd.f32 %v557_v41, %v384_v40  ;;  %950 = vmatmul.f32.gmra.mxu3 %v189_v36  ;;  %v194_v40 = vld [vmem:[%s2115_s0 + $0x5a0] sm:$0xff]  ;;  %v195_v41 = vld [vmem:[%s2115_s0 + $0x5a8] sm:$0xff] }
 0x17c   :  { %431 = vmatmul.f32.gmra.mxu0 %v186_v43  ;;  %604 = vmatmul.f32.gmra.mxu1 %v187_v47 }
 0x17d   :  { %v730_v50 = vpop.f32.mrf.mxu2  ;;  %v903_v55 = vpop.f32.mrf.mxu3 }
 0x17e   :  { %v731_v57 = vadd.f32 %v730_v50, %v558_v49 }
 0x180   :  { %v1891_v0 = vadd.f32 %v903_v55, %v731_v57  ;;  %v200_v55 = vld [vmem:[%s2115_s0 + $0x5d0] sm:$0xff]  ;;  %v201_v57 = vld [vmem:[%s2115_s0 + $0x5d8] sm:$0xff] }
 0x181   :  { %v387_v2 = vpop.f32.mrf.mxu0  ;;  %v560_v5 = vpop.f32.mrf.mxu1 }
 0x182   :  { %780 = vmatmul.f32.gmra.mxu2 %v192_v61  ;;  %v561_v16 = vadd.f32 %v560_v5, %v387_v2  ;;  %953 = vmatmul.f32.gmra.mxu3 %v193_v62  ;;  %v198_v5 = vld [vmem:[%s2115_s0 + $0x5c0] sm:$0xff] }
 0x184   :  { %434 = vmatmul.f32.gmra.mxu0 %v190_v7  ;;  %607 = vmatmul.f32.gmra.mxu1 %v191_v13  ;;  %v199_v7 = vld [vmem:[%s2115_s0 + $0x5c8] sm:$0xff] }
 0x185   :  { %v733_v17 = vpop.f32.mrf.mxu2  ;;  %v906_v18 = vpop.f32.mrf.mxu3 }
 0x186   :  { %v734_v21 = vadd.f32 %v733_v17, %v561_v16 }
 0x188   :  { %v1905_v30 = vadd.f32 %v906_v18, %v734_v21  ;;  %v204_v21 = vld [vmem:[%s2115_s0 + $0x5f0] sm:$0xff] }
 0x189   :  { %v390_v31 = vpop.f32.mrf.mxu0  ;;  %v563_v36 = vpop.f32.mrf.mxu1 }
 0x18a   :  { %783 = vmatmul.f32.gmra.mxu2 %v196_v28  ;;  %v564_v43 = vadd.f32 %v563_v36, %v390_v31  ;;  %956 = vmatmul.f32.gmra.mxu3 %v197_v29  ;;  %v205_v28 = vld [vmem:[%s2115_s0 + $0x5f8] sm:$0xff] }
 0x18c   :  { %437 = vmatmul.f32.gmra.mxu0 %v194_v40  ;;  %610 = vmatmul.f32.gmra.mxu1 %v195_v41  ;;  %v202_v40 = vld [vmem:[%s2115_s0 + $0x5e0] sm:$0xff]  ;;  %v203_v41 = vld [vmem:[%s2115_s0 + $0x5e8] sm:$0xff] }
 0x18d   :  { %v736_v47 = vpop.f32.mrf.mxu2  ;;  %v909_v49 = vpop.f32.mrf.mxu3 }
 0x18e   :  { %v737_v50 = vadd.f32 %v736_v47, %v564_v43 }
 0x190   :  { %v1919_v61 = vadd.f32 %v909_v49, %v737_v50 }
 0x191   :  { %v393_v62 = vpop.f32.mrf.mxu0  ;;  %v566_v2 = vpop.f32.mrf.mxu1 }
 0x192   :  { %786 = vmatmul.f32.gmra.mxu2 %v200_v55  ;;  %v567_v13 = vadd.f32 %v566_v2, %v393_v62  ;;  %959 = vmatmul.f32.gmra.mxu3 %v201_v57  ;;  %v208_v55 = vld [vmem:[%s2115_s0 + $0x610] sm:$0xff]  ;;  %v209_v57 = vld [vmem:[%s2115_s0 + $0x618] sm:$0xff] }
 0x194   :  { %440 = vmatmul.f32.gmra.mxu0 %v198_v5  ;;  %613 = vmatmul.f32.gmra.mxu1 %v199_v7  ;;  %v206_v7 = vld [vmem:[%s2115_s0 + $0x600] sm:$0xff] }
 0x195   :  { %v739_v16 = vpop.f32.mrf.mxu2  ;;  %v912_v17 = vpop.f32.mrf.mxu3 }
 0x196   :  { %v740_v18 = vadd.f32 %v739_v16, %v567_v13  ;;  %v207_v13 = vld [vmem:[%s2115_s0 + $0x608] sm:$0xff] }
 0x198   :  { %v1933_v29 = vadd.f32 %v912_v17, %v740_v18 }
 0x199   :  { %v396_v31 = vpop.f32.mrf.mxu0  ;;  %v569_v36 = vpop.f32.mrf.mxu1 }
 0x19a   :  { %789 = vmatmul.f32.gmra.mxu2 %v204_v21  ;;  %v570_v43 = vadd.f32 %v569_v36, %v396_v31  ;;  %962 = vmatmul.f32.gmra.mxu3 %v205_v28  ;;  %v212_v28 = vld [vmem:[%s2115_s0 + $0x630] sm:$0xff]  ;;  %v213_v31 = vld [vmem:[%s2115_s0 + $0x638] sm:$0xff] }
 0x19c   :  { %443 = vmatmul.f32.gmra.mxu0 %v202_v40  ;;  %616 = vmatmul.f32.gmra.mxu1 %v203_v41 }
 0x19d   :  { %v742_v47 = vpop.f32.mrf.mxu2  ;;  %v915_v49 = vpop.f32.mrf.mxu3 }
 0x19e   :  { %v743_v50 = vadd.f32 %v742_v47, %v570_v43  ;;  %v210_v43 = vld [vmem:[%s2115_s0 + $0x620] sm:$0xff]  ;;  %v211_v47 = vld [vmem:[%s2115_s0 + $0x628] sm:$0xff] }
 0x1a0   :  { %v1947_v62 = vadd.f32 %v915_v49, %v743_v50 }
 0x1a1   :  { %v399_v2 = vpop.f32.mrf.mxu0  ;;  %v572_v5 = vpop.f32.mrf.mxu1 }
 0x1a2   :  { %792 = vmatmul.f32.gmra.mxu2 %v208_v55  ;;  %v573_v16 = vadd.f32 %v572_v5, %v399_v2  ;;  %965 = vmatmul.f32.gmra.mxu3 %v209_v57  ;;  %v216_v2 = vld [vmem:[%s2115_s0 + $0x650] sm:$0xff]  ;;  %v217_v5 = vld [vmem:[%s2115_s0 + $0x658] sm:$0xff] }
 0x1a4   :  { %446 = vmatmul.f32.gmra.mxu0 %v206_v7  ;;  %619 = vmatmul.f32.gmra.mxu1 %v207_v13 }
 0x1a5   :  { %v745_v17 = vpop.f32.mrf.mxu2  ;;  %v918_v18 = vpop.f32.mrf.mxu3 }
 0x1a6   :  { %v746_v21 = vadd.f32 %v745_v17, %v573_v16  ;;  %v214_v17 = vld [vmem:[%s2115_s0 + $0x640] sm:$0xff] }
 0x1a8   :  { %v1961_v36 = vadd.f32 %v918_v18, %v746_v21  ;;  %v215_v18 = vld [vmem:[%s2115_s0 + $0x648] sm:$0xff] }
 0x1a9   :  { %v402_v40 = vpop.f32.mrf.mxu0  ;;  %v575_v41 = vpop.f32.mrf.mxu1 }
 0x1aa   :  { %795 = vmatmul.f32.gmra.mxu2 %v212_v28  ;;  %v576_v49 = vadd.f32 %v575_v41, %v402_v40  ;;  %968 = vmatmul.f32.gmra.mxu3 %v213_v31  ;;  %v220_v41 = vld [vmem:[%s2115_s0 + $0x670] sm:$0xff] }
 0x1ac   :  { %449 = vmatmul.f32.gmra.mxu0 %v210_v43  ;;  %622 = vmatmul.f32.gmra.mxu1 %v211_v47  ;;  %v221_v43 = vld [vmem:[%s2115_s0 + $0x678] sm:$0xff] }
 0x1ad   :  { %v748_v50 = vpop.f32.mrf.mxu2  ;;  %v921_v55 = vpop.f32.mrf.mxu3 }
 0x1ae   :  { %v749_v57 = vadd.f32 %v748_v50, %v576_v49 }
 0x1b0   :  { %v1975_v7 = vadd.f32 %v921_v55, %v749_v57  ;;  %v218_v55 = vld [vmem:[%s2115_s0 + $0x660] sm:$0xff]  ;;  %v219_v57 = vld [vmem:[%s2115_s0 + $0x668] sm:$0xff] }
 0x1b1   :  { %v405_v13 = vpop.f32.mrf.mxu0  ;;  %v578_v16 = vpop.f32.mrf.mxu1 }
 0x1b2   :  { %798 = vmatmul.f32.gmra.mxu2 %v216_v2  ;;  %v579_v21 = vadd.f32 %v578_v16, %v405_v13  ;;  %971 = vmatmul.f32.gmra.mxu3 %v217_v5 }
 0x1b4   :  { %452 = vmatmul.f32.gmra.mxu0 %v214_v17  ;;  %625 = vmatmul.f32.gmra.mxu1 %v215_v18 }
 0x1b5   :  { %v751_v28 = vpop.f32.mrf.mxu2  ;;  %v924_v31 = vpop.f32.mrf.mxu3 }
 0x1b6   :  { %v752_v40 = vadd.f32 %v751_v28, %v579_v21 }
 0x1b8   :  { %v1989_v47 = vadd.f32 %v924_v31, %v752_v40 }
 0x1b9   :  { %v408_v49 = vpop.f32.mrf.mxu0  ;;  %v581_v50 = vpop.f32.mrf.mxu1 }
 0x1ba   :  { %801 = vmatmul.f32.gmra.mxu2 %v220_v41  ;;  %v582_v2 = vadd.f32 %v581_v50, %v408_v49  ;;  %974 = vmatmul.f32.gmra.mxu3 %v221_v43 }
 0x1bc   :  { %455 = vmatmul.f32.gmra.mxu0 %v218_v55  ;;  %628 = vmatmul.f32.gmra.mxu1 %v219_v57 }
 0x1bd   :  { %v754_v5 = vpop.f32.mrf.mxu2  ;;  %v927_v13 = vpop.f32.mrf.mxu3 }
 0x1be   :  { %v755_v16 = vadd.f32 %v754_v5, %v582_v2 }
 0x1c0   :  { %v1997_v17 = vadd.f32 %v927_v13, %v755_v16 }
 0x1c1   :  { %v411_v18 = vpop.f32.mrf.mxu0  ;;  %v584_v21 = vpop.f32.mrf.mxu1 }
 0x1c2   :  { %v585_v28 = vadd.f32 %v584_v21, %v411_v18 }
 0x1c5   :  { %v757_v31 = vpop.f32.mrf.mxu2  ;;  %v930_v40 = vpop.f32.mrf.mxu3 }
 0x1c6   :  { %v758_v20 = vadd.f32 %v757_v31, %v585_v28 }
 0x1c8   :  { %v1999_v58 = vadd.f32 %v930_v40, %v758_v20 }
 0x1c9   :  { %v414_v33 = vpop.f32.mrf.mxu0  ;;  %v587_v10 = vpop.f32.mrf.mxu1 }
 0x1ca   :  { %v588_v41 = vadd.f32 %v587_v10, %v414_v33 }
 0x1cd   :  { %v760_v49 = vpop.f32.mrf.mxu2  ;;  %v933_v43 = vpop.f32.mrf.mxu3 }
 0x1ce   :  { %v761_v50 = vadd.f32 %v760_v49, %v588_v41  ;;  %v2009_v49 = vld [vmem:[%s2116_s2] ss:$0 sm:$0xff] }
 0x1d0   :  { %v2001_v55 = vadd.f32 %v933_v43, %v761_v50 }
 0x1d1   :  { %v417_v57 = vpop.f32.mrf.mxu0  ;;  %v590_v2 = vpop.f32.mrf.mxu1 }
 0x1d2   :  { %v591_v5 = vadd.f32 %v590_v2, %v417_v57 }
 0x1d5   :  { %v763_v13 = vpop.f32.mrf.mxu2  ;;  %v936_v16 = vpop.f32.mrf.mxu3 }
 0x1d6   :  { %v764_v54 = vadd.f32 %v763_v13, %v591_v5 }
 0x1d8   :  { %v2003_v18 = vadd.f32 %v936_v16, %v764_v54 }
 0x1d9   :  { %v420_v21 = vpop.f32.mrf.mxu0  ;;  %v593_v28 = vpop.f32.mrf.mxu1 }
 0x1da   :  { %v594_v20 = vadd.f32 %v593_v28, %v420_v21 }
 0x1dd   :  { %v766_v31 = vpop.f32.mrf.mxu2  ;;  %v939_v40 = vpop.f32.mrf.mxu3 }
 0x1de   :  { %v767_v32 = vadd.f32 %v766_v31, %v594_v20 }
 0x1e0   :  { %v940_v10 = vadd.f32 %v939_v40, %v767_v32 }
 0x1e1   :  { %v423_v33 = vpop.f32.mrf.mxu0  ;;  %v596_v14 = vpop.f32.mrf.mxu1 }
 0x1e2   :  { %v991_v41 = vmax.f32 %v1877_v37, %v940_v10  ;;  %v597_v43 = vadd.f32 %v596_v14, %v423_v33 }
 0x1e4   :  { %v1004_v54 = vmax.f32 %v978_v44, %v991_v41 }
 0x1e5   :  { %v769_v50 = vpop.f32.mrf.mxu2  ;;  %v942_v57 = vpop.f32.mrf.mxu3 }
 0x1e6   :  { %v1021_v2 = vadd.f32 %v2009_v49, %v1004_v54  ;;  %v770_v5 = vadd.f32 %v769_v50, %v597_v43 }
 0x1e8   :  { %v1034_v32 = vmax.f32 %v1021_v2, 0.0  ;;  %v943_v13 = vadd.f32 %v942_v57, %v770_v5 }
 0x1e9   :  { %v426_v16 = vpop.f32.mrf.mxu0  ;;  %v599_v21 = vpop.f32.mrf.mxu1 }
 0x1ea   :  { %1047 = vst [vmem:[%s2117_s3] sm:$0xff] %v1034_v32  ;;  %v992_v37 = vmax.f32 %v1891_v0, %v943_v13  ;;  %v600_v14 = vadd.f32 %v599_v21, %v426_v16 }
 0x1ec   :  { %v1005_v12 = vmax.f32 %v979_v59, %v992_v37 }
 0x1ed   :  { %v772_v38 = vpop.f32.mrf.mxu2  ;;  %v945_v44 = vpop.f32.mrf.mxu3 }
 0x1ee   :  { %v1022_v28 = vadd.f32 %v2009_v49, %v1005_v12  ;;  %v773_v20 = vadd.f32 %v772_v38, %v600_v14 }
 0x1f0   :  { %v1035_v31 = vmax.f32 %v1022_v28, 0.0  ;;  %v946_v40 = vadd.f32 %v945_v44, %v773_v20 }
 0x1f1   :  { %v429_v10 = vpop.f32.mrf.mxu0  ;;  %v602_v33 = vpop.f32.mrf.mxu1 }
 0x1f2   :  { %1048 = vst [vmem:[%s2117_s3 + $0x8] sm:$0xff] %v1035_v31  ;;  %v993_v0 = vmax.f32 %v1905_v30, %v946_v40  ;;  %v603_v41 = vadd.f32 %v602_v33, %v429_v10 }
 0x1f4   :  { %v1006_v23 = vmax.f32 %v980_v9, %v993_v0 }
 0x1f5   :  { %v775_v53 = vpop.f32.mrf.mxu2  ;;  %v948_v59 = vpop.f32.mrf.mxu3 }
 0x1f6   :  { %v1023_v43 = vadd.f32 %v2009_v49, %v1006_v23  ;;  %v776_v54 = vadd.f32 %v775_v53, %v603_v41 }
 0x1f8   :  { %v1036_v50 = vmax.f32 %v1023_v43, 0.0  ;;  %v949_v57 = vadd.f32 %v948_v59, %v776_v54 }
 0x1f9   :  { %v432_v2 = vpop.f32.mrf.mxu0  ;;  %v605_v5 = vpop.f32.mrf.mxu1 }
 0x1fa   :  { %1049 = vst [vmem:[%s2117_s3 + $0x10] sm:$0xff] %v1036_v50  ;;  %v994_v30 = vmax.f32 %v1919_v61, %v949_v57  ;;  %v606_v32 = vadd.f32 %v605_v5, %v432_v2 }
 0x1fc   :  { %v1007_v34 = vmax.f32 %v981_v26, %v994_v30 }
 0x1fd   :  { %v778_v4 = vpop.f32.mrf.mxu2  ;;  %v951_v9 = vpop.f32.mrf.mxu3 }
 0x1fe   :  { %v1024_v13 = vadd.f32 %v2009_v49, %v1007_v34  ;;  %v779_v16 = vadd.f32 %v778_v4, %v606_v32 }
 0x200   :  { %v1037_v21 = vmax.f32 %v1024_v13, 0.0  ;;  %v952_v37 = vadd.f32 %v951_v9, %v779_v16 }
 0x201   :  { %v435_v14 = vpop.f32.mrf.mxu0  ;;  %v608_v12 = vpop.f32.mrf.mxu1 }
 0x202   :  { %1050 = vst [vmem:[%s2117_s3 + $0x18] sm:$0xff] %v1037_v21  ;;  %v995_v61 = vmax.f32 %v1933_v29, %v952_v37  ;;  %v609_v38 = vadd.f32 %v608_v12, %v435_v14 }
 0x204   :  { %v1008_v45 = vmax.f32 %v982_v42, %v995_v61 }
 0x205   :  { %v781_v19 = vpop.f32.mrf.mxu2  ;;  %v954_v26 = vpop.f32.mrf.mxu3 }
 0x206   :  { %v1025_v44 = vadd.f32 %v2009_v49, %v1008_v45  ;;  %v782_v28 = vadd.f32 %v781_v19, %v609_v38 }
 0x208   :  { %v1038_v20 = vmax.f32 %v1025_v44, 0.0  ;;  %v955_v31 = vadd.f32 %v954_v26, %v782_v28 }
 0x209   :  { %v438_v40 = vpop.f32.mrf.mxu0  ;;  %v611_v10 = vpop.f32.mrf.mxu1 }
 0x20a   :  { %1051 = vst [vmem:[%s2117_s3 + $0x20] sm:$0xff] %v1038_v20  ;;  %v996_v29 = vmax.f32 %v1947_v62, %v955_v31  ;;  %v612_v33 = vadd.f32 %v611_v10, %v438_v40 }
 0x20c   :  { %v1009_v56 = vmax.f32 %v983_v60, %v996_v29 }
 0x20d   :  { %v784_v35 = vpop.f32.mrf.mxu2  ;;  %v957_v42 = vpop.f32.mrf.mxu3 }
 0x20e   :  { %v1026_v0 = vadd.f32 %v2009_v49, %v1009_v56  ;;  %v785_v41 = vadd.f32 %v784_v35, %v612_v33 }
 0x210   :  { %v1039_v23 = vmax.f32 %v1026_v0, 0.0  ;;  %v958_v53 = vadd.f32 %v957_v42, %v785_v41 }
 0x211   :  { %v441_v59 = vpop.f32.mrf.mxu0  ;;  %v614_v43 = vpop.f32.mrf.mxu1 }
 0x212   :  { %1052 = vst [vmem:[%s2117_s3 + $0x28] sm:$0xff] %v1039_v23  ;;  %v997_v62 = vmax.f32 %v1961_v36, %v958_v53  ;;  %v615_v54 = vadd.f32 %v614_v43, %v441_v59 }
 0x214   :  { %v1010_v52 = vmax.f32 %v2118_v3, %v997_v62 }
 0x215   :  { %v787_v60 = vpop.f32.mrf.mxu2  ;;  %v960_v50 = vpop.f32.mrf.mxu3 }
 0x216   :  { %v1027_v57 = vadd.f32 %v2009_v49, %v1010_v52  ;;  %v788_v2 = vadd.f32 %v787_v60, %v615_v54 }
 0x218   :  { %v1040_v5 = vmax.f32 %v1027_v57, 0.0  ;;  %v961_v30 = vadd.f32 %v960_v50, %v788_v2 }
 0x219   :  { %v444_v32 = vpop.f32.mrf.mxu0  ;;  %v617_v34 = vpop.f32.mrf.mxu1 }
 0x21a   :  { %1053 = vst [vmem:[%s2117_s3 + $0x30] sm:$0xff] %v1040_v5  ;;  %v998_v36 = vmax.f32 %v1975_v7, %v961_v30  ;;  %v618_v4 = vadd.f32 %v617_v34, %v444_v32 }
 0x21c   :  { %v1011_v6 = vmax.f32 %v2119_v15, %v998_v36 }
 0x21d   :  { %v790_v9 = vpop.f32.mrf.mxu2  ;;  %v963_v13 = vpop.f32.mrf.mxu3 }
 0x21e   :  { %v1028_v16 = vadd.f32 %v2009_v49, %v1011_v6  ;;  %v791_v21 = vadd.f32 %v790_v9, %v618_v4 }
 0x220   :  { %v1041_v37 = vmax.f32 %v1028_v16, 0.0  ;;  %v964_v14 = vadd.f32 %v963_v13, %v791_v21 }
 0x221   :  { %v447_v12 = vpop.f32.mrf.mxu0  ;;  %v620_v61 = vpop.f32.mrf.mxu1 }
 0x222   :  { %1054 = vst [vmem:[%s2117_s3 + $0x38] sm:$0xff] %v1041_v37  ;;  %v999_v7 = vmax.f32 %v1989_v47, %v964_v14  ;;  %v621_v38 = vadd.f32 %v620_v61, %v447_v12 }
 0x224   :  { %v1012_v24 = vmax.f32 %v2120_v27, %v999_v7 }
 0x225   :  { %v793_v45 = vpop.f32.mrf.mxu2  ;;  %v966_v19 = vpop.f32.mrf.mxu3 }
 0x226   :  { %v1029_v26 = vadd.f32 %v2009_v49, %v1012_v24  ;;  %v794_v44 = vadd.f32 %v793_v45, %v621_v38 }
 0x228   :  { %v1042_v28 = vmax.f32 %v1029_v26, 0.0  ;;  %v967_v20 = vadd.f32 %v966_v19, %v794_v44 }
 0x229   :  { %v450_v31 = vpop.f32.mrf.mxu0  ;;  %v623_v40 = vpop.f32.mrf.mxu1 }
 0x22a   :  { %1055 = vst [vmem:[%s2117_s3 + $0x40] sm:$0xff] %v1042_v28  ;;  %v1000_v47 = vmax.f32 %v1997_v17, %v967_v20  ;;  %v624_v10 = vadd.f32 %v623_v40, %v450_v31 }
 0x22c   :  { %v1013_v46 = vmax.f32 %v2121_v39, %v1000_v47 }
 0x22d   :  { %v796_v29 = vpop.f32.mrf.mxu2  ;;  %v969_v33 = vpop.f32.mrf.mxu3 }
 0x22e   :  { %v1030_v56 = vadd.f32 %v2009_v49, %v1013_v46  ;;  %v797_v35 = vadd.f32 %v796_v29, %v624_v10 }
 0x230   :  { %v1043_v42 = vmax.f32 %v1030_v56, 0.0  ;;  %v970_v0 = vadd.f32 %v969_v33, %v797_v35 }
 0x231   :  { %v453_v41 = vpop.f32.mrf.mxu0  ;;  %v626_v23 = vpop.f32.mrf.mxu1 }
 0x232   :  { %1056 = vst [vmem:[%s2117_s3 + $0x48] sm:$0xff] %v1043_v42  ;;  %v1001_v17 = vmax.f32 %v1999_v58, %v970_v0  ;;  %v627_v53 = vadd.f32 %v626_v23, %v453_v41 }
 0x234   :  { %v1014_v1 = vmax.f32 %v2122_v51, %v1001_v17 }
 0x235   :  { %v799_v59 = vpop.f32.mrf.mxu2  ;;  %v972_v43 = vpop.f32.mrf.mxu3 }
 0x236   :  { %v1031_v62 = vadd.f32 %v2009_v49, %v1014_v1  ;;  %v800_v54 = vadd.f32 %v799_v59, %v627_v53 }
 0x238   :  { %v1044_v3 = vmax.f32 %v1031_v62, 0.0  ;;  %v973_v52 = vadd.f32 %v972_v43, %v800_v54 }
 0x239   :  { %v456_v60 = vpop.f32.mrf.mxu0  ;;  %v629_v50 = vpop.f32.mrf.mxu1 }
 0x23a   :  { %1057 = vst [vmem:[%s2117_s3 + $0x50] sm:$0xff] %v1044_v3  ;;  %v1002_v58 = vmax.f32 %v2001_v55, %v973_v52  ;;  %v630_v57 = vadd.f32 %v629_v50, %v456_v60  ;;  %v2124_v55 = vmax.f32 %v1655_v25, %v1861_v8 }
 0x23c   :  { %v1015_v22 = vmax.f32 %v2123_v63, %v1002_v58 }
 0x23d   :  { %v802_v2 = vpop.f32.mrf.mxu2  ;;  %v975_v5 = vpop.f32.mrf.mxu3 }
 0x23e   :  { %v1032_v30 = vadd.f32 %v2009_v49, %v1015_v22  ;;  %v803_v32 = vadd.f32 %v802_v2, %v630_v57 }
 0x240   :  { %v1045_v34 = vmax.f32 %v1032_v30, 0.0  ;;  %v976_v36 = vadd.f32 %v975_v5, %v803_v32 }
 0x242   :  { %1058 = vst [vmem:[%s2117_s3 + $0x58] sm:$0xff] %v1045_v34  ;;  %v1003_v4 = vmax.f32 %v2003_v18, %v976_v36 }
 0x244   :  { %v1016_v15 = vmax.f32 %v2124_v55, %v1003_v4 }
 0x246   :  { %v1033_v11 = vadd.f32 %v2009_v49, %v1016_v15 }
 0x248   :  { %v1046_v48 = vmax.f32 %v1033_v11, 0.0 }
 0x24a   :  { %1059 = vst [vmem:[%s2117_s3 + $0x60] sm:$0xff] %v1046_v48 }

// kernel: cnn_forward.5
= control target key start
LH: loop header
LB: loop body
LE: loop exit
PB: predicated region body
PF: predicated region fallthrough
CT: control target
= control target key end

     0   :  { %s1194_s1 = inlined_call_operand.vmem [shape: f32[1664,128], index: 1, kind: input, shape index: {}]   ;;  %s1195_s0 = inlined_call_operand.vmem [shape: f32[8,1664], index: 0, kind: input, shape index: {}]   ;;  %s1196_s2 = inlined_call_operand.vmem [shape: f32[1,128], index: 2, kind: input, shape index: {}]   ;;  %s1197_s3 = inlined_call_operand.vmem [shape: f32[8,128], index: 3, kind: output, shape index: {}]  }
   0x1   :  { %v42_v0 = vld [vmem:[%s1194_s1 + $0x78] sm:$0xff]  ;;  %v41_v2 = vld [vmem:[%s1194_s1 + $0x70] sm:$0xff]  ;;  %v40_v6 = vld [vmem:[%s1194_s1 + $0x68] sm:$0xff] }
   0x2   :  { %v74_v1 = vld [vmem:[%s1194_s1 + $0x178] sm:$0xff]  ;;  %239 = vmatpush.msra.mxu0 %v42_v0  ;;  %v73_v4 = vld [vmem:[%s1194_s1 + $0x170] sm:$0xff]  ;;  %v72_v8 = vld [vmem:[%s1194_s1 + $0x168] sm:$0xff] }
   0x3   :  { %279 = vmatpush.msra.mxu2 %v74_v1  ;;  %v58_v3 = vld [vmem:[%s1194_s1 + $0xf8] sm:$0xff]  ;;  %v57_v7 = vld [vmem:[%s1194_s1 + $0xf0] sm:$0xff]  ;;  %v56_v10 = vld [vmem:[%s1194_s1 + $0xe8] sm:$0xff] }
   0x4   :  { %v90_v5 = vld [vmem:[%s1194_s1 + $0x1f8] sm:$0xff]  ;;  %259 = vmatpush.msra.mxu1 %v58_v3  ;;  %240 = vmatpush.msra.mxu0 %v41_v2  ;;  %v89_v9 = vld [vmem:[%s1194_s1 + $0x1f0] sm:$0xff]  ;;  %v39_v11 = vld [vmem:[%s1194_s1 + $0x60] sm:$0xff] }
   0x5   :  { %299 = vmatpush.msra.mxu3 %v90_v5  ;;  %280 = vmatpush.msra.mxu2 %v73_v4  ;;  %v71_v12 = vld [vmem:[%s1194_s1 + $0x160] sm:$0xff]  ;;  %v88_v13 = vld [vmem:[%s1194_s1 + $0x1e8] sm:$0xff]  ;;  %v38_v16 = vld [vmem:[%s1194_s1 + $0x58] sm:$0xff] }
   0x6   :  { %260 = vmatpush.msra.mxu1 %v57_v7  ;;  %241 = vmatpush.msra.mxu0 %v40_v6  ;;  %v55_v14 = vld [vmem:[%s1194_s1 + $0xe0] sm:$0xff]  ;;  %v70_v17 = vld [vmem:[%s1194_s1 + $0x158] sm:$0xff]  ;;  %v37_v20 = vld [vmem:[%s1194_s1 + $0x50] sm:$0xff] }
   0x7   :  { %300 = vmatpush.msra.mxu3 %v89_v9  ;;  %281 = vmatpush.msra.mxu2 %v72_v8  ;;  %v87_v15 = vld [vmem:[%s1194_s1 + $0x1e0] sm:$0xff]  ;;  %v54_v18 = vld [vmem:[%s1194_s1 + $0xd8] sm:$0xff]  ;;  %v69_v21 = vld [vmem:[%s1194_s1 + $0x150] sm:$0xff] }
   0x8   :  { %261 = vmatpush.msra.mxu1 %v56_v10  ;;  %242 = vmatpush.msra.mxu0 %v39_v11  ;;  %v86_v19 = vld [vmem:[%s1194_s1 + $0x1d8] sm:$0xff]  ;;  %v53_v22 = vld [vmem:[%s1194_s1 + $0xd0] sm:$0xff]  ;;  %v36_v24 = vld [vmem:[%s1194_s1 + $0x48] sm:$0xff] }
   0x9   :  { %301 = vmatpush.msra.mxu3 %v88_v13  ;;  %282 = vmatpush.msra.mxu2 %v71_v12  ;;  %v85_v23 = vld [vmem:[%s1194_s1 + $0x1d0] sm:$0xff]  ;;  %v68_v25 = vld [vmem:[%s1194_s1 + $0x148] sm:$0xff]  ;;  %v35_v28 = vld [vmem:[%s1194_s1 + $0x40] sm:$0xff] }
   0xa   :  { %262 = vmatpush.msra.mxu1 %v55_v14  ;;  %243 = vmatpush.msra.mxu0 %v38_v16  ;;  %v52_v26 = vld [vmem:[%s1194_s1 + $0xc8] sm:$0xff]  ;;  %v67_v29 = vld [vmem:[%s1194_s1 + $0x140] sm:$0xff]  ;;  %v34_v32 = vld [vmem:[%s1194_s1 + $0x38] sm:$0xff] }
   0xb   :  { %302 = vmatpush.msra.mxu3 %v87_v15  ;;  %283 = vmatpush.msra.mxu2 %v70_v17  ;;  %v84_v27 = vld [vmem:[%s1194_s1 + $0x1c8] sm:$0xff]  ;;  %v51_v30 = vld [vmem:[%s1194_s1 + $0xc0] sm:$0xff]  ;;  %v66_v33 = vld [vmem:[%s1194_s1 + $0x138] sm:$0xff] }
   0xc   :  { %263 = vmatpush.msra.mxu1 %v54_v18  ;;  %244 = vmatpush.msra.mxu0 %v37_v20  ;;  %v83_v31 = vld [vmem:[%s1194_s1 + $0x1c0] sm:$0xff]  ;;  %v50_v34 = vld [vmem:[%s1194_s1 + $0xb8] sm:$0xff]  ;;  %v33_v36 = vld [vmem:[%s1194_s1 + $0x30] sm:$0xff] }
   0xd   :  { %303 = vmatpush.msra.mxu3 %v86_v19  ;;  %284 = vmatpush.msra.mxu2 %v69_v21  ;;  %v82_v35 = vld [vmem:[%s1194_s1 + $0x1b8] sm:$0xff]  ;;  %v65_v37 = vld [vmem:[%s1194_s1 + $0x130] sm:$0xff]  ;;  %v32_v40 = vld [vmem:[%s1194_s1 + $0x28] sm:$0xff] }
   0xe   :  { %264 = vmatpush.msra.mxu1 %v53_v22  ;;  %245 = vmatpush.msra.mxu0 %v36_v24  ;;  %v49_v38 = vld [vmem:[%s1194_s1 + $0xb0] sm:$0xff]  ;;  %v64_v41 = vld [vmem:[%s1194_s1 + $0x128] sm:$0xff]  ;;  %v31_v44 = vld [vmem:[%s1194_s1 + $0x20] sm:$0xff] }
   0xf   :  { %304 = vmatpush.msra.mxu3 %v85_v23  ;;  %285 = vmatpush.msra.mxu2 %v68_v25  ;;  %v81_v39 = vld [vmem:[%s1194_s1 + $0x1b0] sm:$0xff]  ;;  %v48_v42 = vld [vmem:[%s1194_s1 + $0xa8] sm:$0xff]  ;;  %v63_v45 = vld [vmem:[%s1194_s1 + $0x120] sm:$0xff] }
  0x10   :  { %265 = vmatpush.msra.mxu1 %v52_v26  ;;  %246 = vmatpush.msra.mxu0 %v35_v28  ;;  %v80_v43 = vld [vmem:[%s1194_s1 + $0x1a8] sm:$0xff]  ;;  %v47_v46 = vld [vmem:[%s1194_s1 + $0xa0] sm:$0xff]  ;;  %v30_v48 = vld [vmem:[%s1194_s1 + $0x18] sm:$0xff] }
  0x11   :  { %305 = vmatpush.msra.mxu3 %v84_v27  ;;  %286 = vmatpush.msra.mxu2 %v67_v29  ;;  %v79_v47 = vld [vmem:[%s1194_s1 + $0x1a0] sm:$0xff]  ;;  %v62_v49 = vld [vmem:[%s1194_s1 + $0x118] sm:$0xff]  ;;  %v29_v52 = vld [vmem:[%s1194_s1 + $0x10] sm:$0xff] }
  0x12   :  { %266 = vmatpush.msra.mxu1 %v51_v30  ;;  %247 = vmatpush.msra.mxu0 %v34_v32  ;;  %v46_v50 = vld [vmem:[%s1194_s1 + $0x98] sm:$0xff]  ;;  %v61_v53 = vld [vmem:[%s1194_s1 + $0x110] sm:$0xff]  ;;  %v28_v56 = vld [vmem:[%s1194_s1 + $0x8] sm:$0xff] }
  0x13   :  { %306 = vmatpush.msra.mxu3 %v83_v31  ;;  %287 = vmatpush.msra.mxu2 %v66_v33  ;;  %v78_v51 = vld [vmem:[%s1194_s1 + $0x198] sm:$0xff]  ;;  %v45_v54 = vld [vmem:[%s1194_s1 + $0x90] sm:$0xff]  ;;  %v60_v57 = vld [vmem:[%s1194_s1 + $0x108] sm:$0xff] }
  0x14   :  { %267 = vmatpush.msra.mxu1 %v50_v34  ;;  %248 = vmatpush.msra.mxu0 %v33_v36  ;;  %v77_v55 = vld [vmem:[%s1194_s1 + $0x190] sm:$0xff]  ;;  %v44_v58 = vld [vmem:[%s1194_s1 + $0x88] sm:$0xff]  ;;  %v27_v60 = vld [vmem:[%s1194_s1] sm:$0xff] }
  0x15   :  { %307 = vmatpush.msra.mxu3 %v82_v35  ;;  %288 = vmatpush.msra.mxu2 %v65_v37  ;;  %v76_v59 = vld [vmem:[%s1194_s1 + $0x188] sm:$0xff]  ;;  %v59_v61 = vld [vmem:[%s1194_s1 + $0x100] sm:$0xff]  ;;  %v106_v62 = vld [vmem:[%s1194_s1 + $0x278] sm:$0xff] }
  0x16   :  { %268 = vmatpush.msra.mxu1 %v49_v38  ;;  %249 = vmatpush.msra.mxu0 %v32_v40  ;;  %v138_v63 = vld [vmem:[%s1194_s1 + $0x378] sm:$0xff]  ;;  %v43_v0 = vld [vmem:[%s1194_s1 + $0x80] sm:$0xff]  ;;  %v105_v2 = vld [vmem:[%s1194_s1 + $0x270] sm:$0xff] }
  0x17   :  { %308 = vmatpush.msra.mxu3 %v81_v39  ;;  %289 = vmatpush.msra.mxu2 %v64_v41  ;;  %v75_v1 = vld [vmem:[%s1194_s1 + $0x180] sm:$0xff]  ;;  %v122_v3 = vld [vmem:[%s1194_s1 + $0x2f8] sm:$0xff]  ;;  %v137_v4 = vld [vmem:[%s1194_s1 + $0x370] sm:$0xff] }
  0x18   :  { %269 = vmatpush.msra.mxu1 %v48_v42  ;;  %250 = vmatpush.msra.mxu0 %v31_v44  ;;  %v154_v5 = vld [vmem:[%s1194_s1 + $0x3f8] sm:$0xff]  ;;  %v104_v6 = vld [vmem:[%s1194_s1 + $0x268] sm:$0xff]  ;;  %v121_v7 = vld [vmem:[%s1194_s1 + $0x2f0] sm:$0xff] }
  0x19   :  { %309 = vmatpush.msra.mxu3 %v80_v43  ;;  %290 = vmatpush.msra.mxu2 %v63_v45  ;;  %v136_v8 = vld [vmem:[%s1194_s1 + $0x368] sm:$0xff]  ;;  %v153_v9 = vld [vmem:[%s1194_s1 + $0x3f0] sm:$0xff]  ;;  %v103_v10 = vld [vmem:[%s1194_s1 + $0x260] sm:$0xff] }
  0x1a   :  { %270 = vmatpush.msra.mxu1 %v47_v46  ;;  %251 = vmatpush.msra.mxu0 %v30_v48  ;;  %v120_v11 = vld [vmem:[%s1194_s1 + $0x2e8] sm:$0xff]  ;;  %v135_v12 = vld [vmem:[%s1194_s1 + $0x360] sm:$0xff]  ;;  %v102_v14 = vld [vmem:[%s1194_s1 + $0x258] sm:$0xff] }
  0x1b   :  { %310 = vmatpush.msra.mxu3 %v79_v47  ;;  %291 = vmatpush.msra.mxu2 %v62_v49  ;;  %v152_v13 = vld [vmem:[%s1194_s1 + $0x3e8] sm:$0xff]  ;;  %v119_v15 = vld [vmem:[%s1194_s1 + $0x2e0] sm:$0xff]  ;;  %v134_v16 = vld [vmem:[%s1194_s1 + $0x358] sm:$0xff] }
  0x1c   :  { %271 = vmatpush.msra.mxu1 %v46_v50  ;;  %252 = vmatpush.msra.mxu0 %v29_v52  ;;  %v151_v17 = vld [vmem:[%s1194_s1 + $0x3e0] sm:$0xff]  ;;  %v101_v18 = vld [vmem:[%s1194_s1 + $0x250] sm:$0xff]  ;;  %v118_v19 = vld [vmem:[%s1194_s1 + $0x2d8] sm:$0xff] }
  0x1d   :  { %311 = vmatpush.msra.mxu3 %v78_v51  ;;  %292 = vmatpush.msra.mxu2 %v61_v53  ;;  %v133_v20 = vld [vmem:[%s1194_s1 + $0x350] sm:$0xff]  ;;  %v150_v21 = vld [vmem:[%s1194_s1 + $0x3d8] sm:$0xff]  ;;  %v100_v22 = vld [vmem:[%s1194_s1 + $0x248] sm:$0xff] }
  0x1e   :  { %272 = vmatpush.msra.mxu1 %v45_v54  ;;  %253 = vmatpush.msra.mxu0 %v28_v56  ;;  %v117_v23 = vld [vmem:[%s1194_s1 + $0x2d0] sm:$0xff]  ;;  %v132_v24 = vld [vmem:[%s1194_s1 + $0x348] sm:$0xff]  ;;  %v99_v26 = vld [vmem:[%s1194_s1 + $0x240] sm:$0xff] }
  0x1f   :  { %312 = vmatpush.msra.mxu3 %v77_v55  ;;  %293 = vmatpush.msra.mxu2 %v60_v57  ;;  %v149_v25 = vld [vmem:[%s1194_s1 + $0x3d0] sm:$0xff]  ;;  %v116_v27 = vld [vmem:[%s1194_s1 + $0x2c8] sm:$0xff]  ;;  %v131_v28 = vld [vmem:[%s1194_s1 + $0x340] sm:$0xff] }
  0x20   :  { %273 = vmatpush.msra.mxu1 %v44_v58  ;;  %254 = vmatpush.msra.mxu0 %v27_v60  ;;  %v148_v29 = vld [vmem:[%s1194_s1 + $0x3c8] sm:$0xff]  ;;  %v98_v30 = vld [vmem:[%s1194_s1 + $0x238] sm:$0xff]  ;;  %v115_v31 = vld [vmem:[%s1194_s1 + $0x2c0] sm:$0xff] }
  0x21   :  { %313 = vmatpush.msra.mxu3 %v76_v59  ;;  %294 = vmatpush.msra.mxu2 %v59_v61  ;;  %v130_v32 = vld [vmem:[%s1194_s1 + $0x338] sm:$0xff]  ;;  %v147_v33 = vld [vmem:[%s1194_s1 + $0x3c0] sm:$0xff]  ;;  %v97_v34 = vld [vmem:[%s1194_s1 + $0x230] sm:$0xff] }
  0x22   :  { %319 = vmatpush.msrb.mxu0 %v106_v62  ;;  %274 = vmatpush.msra.mxu1 %v43_v0  ;;  %v114_v35 = vld [vmem:[%s1194_s1 + $0x2b8] sm:$0xff]  ;;  %v129_v36 = vld [vmem:[%s1194_s1 + $0x330] sm:$0xff]  ;;  %v96_v38 = vld [vmem:[%s1194_s1 + $0x228] sm:$0xff] }
  0x23   :  { %359 = vmatpush.msrb.mxu2 %v138_v63  ;;  %314 = vmatpush.msra.mxu3 %v75_v1  ;;  %v146_v37 = vld [vmem:[%s1194_s1 + $0x3b8] sm:$0xff]  ;;  %v113_v39 = vld [vmem:[%s1194_s1 + $0x2b0] sm:$0xff]  ;;  %v128_v40 = vld [vmem:[%s1194_s1 + $0x328] sm:$0xff] }
  0x24   :  { %320 = vmatpush.msrb.mxu0 %v105_v2  ;;  %339 = vmatpush.msrb.mxu1 %v122_v3  ;;  %v145_v41 = vld [vmem:[%s1194_s1 + $0x3b0] sm:$0xff]  ;;  %v95_v42 = vld [vmem:[%s1194_s1 + $0x220] sm:$0xff]  ;;  %v112_v43 = vld [vmem:[%s1194_s1 + $0x2a8] sm:$0xff] }
  0x25   :  { %360 = vmatpush.msrb.mxu2 %v137_v4  ;;  %379 = vmatpush.msrb.mxu3 %v154_v5  ;;  %v127_v44 = vld [vmem:[%s1194_s1 + $0x320] sm:$0xff]  ;;  %v144_v45 = vld [vmem:[%s1194_s1 + $0x3a8] sm:$0xff]  ;;  %v94_v46 = vld [vmem:[%s1194_s1 + $0x218] sm:$0xff] }
  0x26   :  { %321 = vmatpush.msrb.mxu0 %v104_v6  ;;  %340 = vmatpush.msrb.mxu1 %v121_v7  ;;  %v111_v47 = vld [vmem:[%s1194_s1 + $0x2a0] sm:$0xff]  ;;  %v126_v48 = vld [vmem:[%s1194_s1 + $0x318] sm:$0xff]  ;;  %v93_v50 = vld [vmem:[%s1194_s1 + $0x210] sm:$0xff] }
  0x27   :  { %361 = vmatpush.msrb.mxu2 %v136_v8  ;;  %380 = vmatpush.msrb.mxu3 %v153_v9  ;;  %v143_v49 = vld [vmem:[%s1194_s1 + $0x3a0] sm:$0xff]  ;;  %v110_v51 = vld [vmem:[%s1194_s1 + $0x298] sm:$0xff]  ;;  %v125_v52 = vld [vmem:[%s1194_s1 + $0x310] sm:$0xff] }
  0x28   :  { %322 = vmatpush.msrb.mxu0 %v103_v10  ;;  %341 = vmatpush.msrb.mxu1 %v120_v11  ;;  %v142_v53 = vld [vmem:[%s1194_s1 + $0x398] sm:$0xff]  ;;  %v92_v54 = vld [vmem:[%s1194_s1 + $0x208] sm:$0xff]  ;;  %v109_v55 = vld [vmem:[%s1194_s1 + $0x290] sm:$0xff] }
  0x29   :  { %362 = vmatpush.msrb.mxu2 %v135_v12  ;;  %381 = vmatpush.msrb.mxu3 %v152_v13  ;;  %v124_v56 = vld [vmem:[%s1194_s1 + $0x308] sm:$0xff]  ;;  %v141_v57 = vld [vmem:[%s1194_s1 + $0x390] sm:$0xff]  ;;  %v91_v59 = vld [vmem:[%s1194_s1 + $0x200] sm:$0xff] }
  0x2a   :  { %323 = vmatpush.msrb.mxu0 %v102_v14  ;;  %342 = vmatpush.msrb.mxu1 %v119_v15  ;;  %v16_v58 = vld [vmem:[%s1195_s0 + $0x10] sm:$0xff]  ;;  %v108_v60 = vld [vmem:[%s1194_s1 + $0x288] sm:$0xff]  ;;  %v123_v61 = vld [vmem:[%s1194_s1 + $0x300] sm:$0xff] }
  0x2b   :  { %363 = vmatpush.msrb.mxu2 %v134_v16  ;;  %382 = vmatpush.msrb.mxu3 %v151_v17  ;;  %v140_v62 = vld [vmem:[%s1194_s1 + $0x388] sm:$0xff]  ;;  %v14_v63 = vld [vmem:[%s1195_s0] sm:$0xff]  ;;  %v17_v0 = vld [vmem:[%s1195_s0 + $0x18] sm:$0xff] }
  0x2c   :  { %324 = vmatpush.msrb.mxu0 %v101_v18  ;;  %343 = vmatpush.msrb.mxu1 %v118_v19  ;;  %v170_v1 = vld [vmem:[%s1194_s1 + $0x478] sm:$0xff]  ;;  %v107_v3 = vld [vmem:[%s1194_s1 + $0x280] sm:$0xff]  ;;  %v15_v5 = vld [vmem:[%s1195_s0 + $0x8] sm:$0xff] }
  0x2d   :  { %364 = vmatpush.msrb.mxu2 %v133_v20  ;;  %383 = vmatpush.msrb.mxu3 %v150_v21  ;;  %v202_v2 = vld [vmem:[%s1194_s1 + $0x578] sm:$0xff]  ;;  %v139_v4 = vld [vmem:[%s1194_s1 + $0x380] sm:$0xff]  ;;  %v169_v6 = vld [vmem:[%s1194_s1 + $0x470] sm:$0xff] }
  0x2e   :  { %325 = vmatpush.msrb.mxu0 %v100_v22  ;;  %344 = vmatpush.msrb.mxu1 %v117_v23  ;;  %v186_v7 = vld [vmem:[%s1194_s1 + $0x4f8] sm:$0xff]  ;;  %v201_v8 = vld [vmem:[%s1194_s1 + $0x570] sm:$0xff]  ;;  %v168_v10 = vld [vmem:[%s1194_s1 + $0x468] sm:$0xff] }
  0x2f   :  { %365 = vmatpush.msrb.mxu2 %v132_v24  ;;  %384 = vmatpush.msrb.mxu3 %v149_v25  ;;  %v218_v9 = vld [vmem:[%s1194_s1 + $0x5f8] sm:$0xff]  ;;  %v185_v11 = vld [vmem:[%s1194_s1 + $0x4f0] sm:$0xff]  ;;  %v200_v12 = vld [vmem:[%s1194_s1 + $0x568] sm:$0xff] }
  0x30   :  { %326 = vmatpush.msrb.mxu0 %v99_v26  ;;  %345 = vmatpush.msrb.mxu1 %v116_v27  ;;  %v217_v13 = vld [vmem:[%s1194_s1 + $0x5f0] sm:$0xff]  ;;  %v167_v15 = vld [vmem:[%s1194_s1 + $0x460] sm:$0xff]  ;;  %v184_v16 = vld [vmem:[%s1194_s1 + $0x4e8] sm:$0xff] }
  0x31   :  { %366 = vmatpush.msrb.mxu2 %v131_v28  ;;  %385 = vmatpush.msrb.mxu3 %v148_v29  ;;  %v20_v14 = vld [vmem:[%s1195_s0 + $0x30] sm:$0xff]  ;;  %v199_v17 = vld [vmem:[%s1194_s1 + $0x560] sm:$0xff]  ;;  %v216_v18 = vld [vmem:[%s1194_s1 + $0x5e8] sm:$0xff] }
  0x32   :  { %327 = vmatpush.msrb.mxu0 %v98_v30  ;;  %346 = vmatpush.msrb.mxu1 %v115_v31  ;;  %v18_v19 = vld [vmem:[%s1195_s0 + $0x20] sm:$0xff]  ;;  %v21_v20 = vld [vmem:[%s1195_s0 + $0x38] sm:$0xff]  ;;  %v19_v25 = vld [vmem:[%s1195_s0 + $0x28] sm:$0xff] }
  0x33   :  { %367 = vmatpush.msrb.mxu2 %v130_v32  ;;  %386 = vmatpush.msrb.mxu3 %v147_v33  ;;  %v166_v21 = vld [vmem:[%s1194_s1 + $0x458] sm:$0xff]  ;;  %v183_v22 = vld [vmem:[%s1194_s1 + $0x4e0] sm:$0xff]  ;;  %v165_v26 = vld [vmem:[%s1194_s1 + $0x450] sm:$0xff] }
  0x34   :  { %328 = vmatpush.msrb.mxu0 %v97_v34  ;;  %347 = vmatpush.msrb.mxu1 %v114_v35  ;;  %v198_v23 = vld [vmem:[%s1194_s1 + $0x558] sm:$0xff]  ;;  %v215_v24 = vld [vmem:[%s1194_s1 + $0x5e0] sm:$0xff]  ;;  %v197_v28 = vld [vmem:[%s1194_s1 + $0x550] sm:$0xff] }
  0x35   :  { %368 = vmatpush.msrb.mxu2 %v129_v36  ;;  %387 = vmatpush.msrb.mxu3 %v146_v37  ;;  %v182_v27 = vld [vmem:[%s1194_s1 + $0x4d8] sm:$0xff]  ;;  %v164_v30 = vld [vmem:[%s1194_s1 + $0x448] sm:$0xff]  ;;  %v181_v31 = vld [vmem:[%s1194_s1 + $0x4d0] sm:$0xff] }
  0x36   :  { %329 = vmatpush.msrb.mxu0 %v96_v38  ;;  %348 = vmatpush.msrb.mxu1 %v113_v39  ;;  %v214_v29 = vld [vmem:[%s1194_s1 + $0x5d8] sm:$0xff]  ;;  %v196_v32 = vld [vmem:[%s1194_s1 + $0x548] sm:$0xff]  ;;  %v213_v33 = vld [vmem:[%s1194_s1 + $0x5d0] sm:$0xff] }
  0x37   :  { %369 = vmatpush.msrb.mxu2 %v128_v40  ;;  %388 = vmatpush.msrb.mxu3 %v145_v41  ;;  %v163_v34 = vld [vmem:[%s1194_s1 + $0x440] sm:$0xff]  ;;  %v180_v35 = vld [vmem:[%s1194_s1 + $0x4c8] sm:$0xff]  ;;  %v162_v38 = vld [vmem:[%s1194_s1 + $0x438] sm:$0xff] }
  0x38   :  { %330 = vmatpush.msrb.mxu0 %v95_v42  ;;  %349 = vmatpush.msrb.mxu1 %v112_v43  ;;  %v195_v36 = vld [vmem:[%s1194_s1 + $0x540] sm:$0xff]  ;;  %v212_v37 = vld [vmem:[%s1194_s1 + $0x5c8] sm:$0xff]  ;;  %v194_v40 = vld [vmem:[%s1194_s1 + $0x538] sm:$0xff] }
  0x39   :  { %370 = vmatpush.msrb.mxu2 %v127_v44  ;;  %389 = vmatpush.msrb.mxu3 %v144_v45  ;;  %v179_v39 = vld [vmem:[%s1194_s1 + $0x4c0] sm:$0xff]  ;;  %v161_v42 = vld [vmem:[%s1194_s1 + $0x430] sm:$0xff]  ;;  %v178_v43 = vld [vmem:[%s1194_s1 + $0x4b8] sm:$0xff] }
  0x3a   :  { %331 = vmatpush.msrb.mxu0 %v94_v46  ;;  %350 = vmatpush.msrb.mxu1 %v111_v47  ;;  %v211_v41 = vld [vmem:[%s1194_s1 + $0x5c0] sm:$0xff]  ;;  %v193_v44 = vld [vmem:[%s1194_s1 + $0x530] sm:$0xff]  ;;  %v210_v45 = vld [vmem:[%s1194_s1 + $0x5b8] sm:$0xff] }
  0x3b   :  { %371 = vmatpush.msrb.mxu2 %v126_v48  ;;  %390 = vmatpush.msrb.mxu3 %v143_v49  ;;  %v160_v46 = vld [vmem:[%s1194_s1 + $0x428] sm:$0xff]  ;;  %v177_v47 = vld [vmem:[%s1194_s1 + $0x4b0] sm:$0xff] }
  0x3c   :  { %332 = vmatpush.msrb.mxu0 %v93_v50  ;;  %351 = vmatpush.msrb.mxu1 %v110_v51  ;;  %v192_v48 = vld [vmem:[%s1194_s1 + $0x528] sm:$0xff]  ;;  %v209_v49 = vld [vmem:[%s1194_s1 + $0x5b0] sm:$0xff]  ;;  %v159_v50 = vld [vmem:[%s1194_s1 + $0x420] sm:$0xff] }
  0x3d   :  { %372 = vmatpush.msrb.mxu2 %v125_v52  ;;  %391 = vmatpush.msrb.mxu3 %v142_v53  ;;  %v176_v51 = vld [vmem:[%s1194_s1 + $0x4a8] sm:$0xff]  ;;  %v191_v52 = vld [vmem:[%s1194_s1 + $0x520] sm:$0xff] }
  0x3e   :  { %333 = vmatpush.msrb.mxu0 %v92_v54  ;;  %352 = vmatpush.msrb.mxu1 %v109_v55  ;;  %v208_v53 = vld [vmem:[%s1194_s1 + $0x5a8] sm:$0xff]  ;;  %v158_v54 = vld [vmem:[%s1194_s1 + $0x418] sm:$0xff]  ;;  %v175_v55 = vld [vmem:[%s1194_s1 + $0x4a0] sm:$0xff] }
  0x3f   :  { %373 = vmatpush.msrb.mxu2 %v124_v56  ;;  %392 = vmatpush.msrb.mxu3 %v141_v57  ;;  %v190_v56 = vld [vmem:[%s1194_s1 + $0x518] sm:$0xff]  ;;  %v207_v57 = vld [vmem:[%s1194_s1 + $0x5a0] sm:$0xff] }
  0x40   :  { %295 = vmatmul.f32.vlgmr.msra.gmra.mxu2 %v16_v58  ;;  %334 = vmatpush.msrb.mxu0 %v91_v59  ;;  %v157_v58 = vld [vmem:[%s1194_s1 + $0x410] sm:$0xff]  ;;  %v174_v59 = vld [vmem:[%s1194_s1 + $0x498] sm:$0xff] }
  0x41   :  { %353 = vmatpush.msrb.mxu1 %v108_v60  ;;  %374 = vmatpush.msrb.mxu2 %v123_v61  ;;  %v189_v60 = vld [vmem:[%s1194_s1 + $0x510] sm:$0xff]  ;;  %v206_v61 = vld [vmem:[%s1194_s1 + $0x598] sm:$0xff] }
  0x42   :  { %393 = vmatpush.msrb.mxu3 %v140_v62  ;;  %255 = vmatmul.f32.vlgmr.msra.gmra.mxu0 %v14_v63  ;;  %v156_v62 = vld [vmem:[%s1194_s1 + $0x408] sm:$0xff]  ;;  %v173_v63 = vld [vmem:[%s1194_s1 + $0x490] sm:$0xff] }
  0x43   :  { %315 = vmatmul.f32.vlgmr.msra.gmra.mxu3 %v17_v0  ;;  %399 = vmatpush.msra.mxu0 %v170_v1  ;;  %v188_v0 = vld [vmem:[%s1194_s1 + $0x508] sm:$0xff]  ;;  %v205_v1 = vld [vmem:[%s1194_s1 + $0x590] sm:$0xff] }
  0x44   :  { %439 = vmatpush.msra.mxu2 %v202_v2  ;;  %354 = vmatpush.msrb.mxu1 %v107_v3  ;;  %v155_v2 = vld [vmem:[%s1194_s1 + $0x400] sm:$0xff]  ;;  %v172_v3 = vld [vmem:[%s1194_s1 + $0x488] sm:$0xff] }
  0x45   :  { %394 = vmatpush.msrb.mxu3 %v139_v4  ;;  %275 = vmatmul.f32.vlgmr.msra.gmra.mxu1 %v15_v5  ;;  %v187_v4 = vld [vmem:[%s1194_s1 + $0x500] sm:$0xff]  ;;  %v204_v5 = vld [vmem:[%s1194_s1 + $0x588] sm:$0xff] }
  0x46   :  { %400 = vmatpush.msra.mxu0 %v169_v6  ;;  %419 = vmatpush.msra.mxu1 %v186_v7  ;;  %v22_v6 = vld [vmem:[%s1195_s0 + $0x40] sm:$0xff]  ;;  %v24_v7 = vld [vmem:[%s1195_s0 + $0x50] sm:$0xff] }
  0x47   :  { %440 = vmatpush.msra.mxu2 %v201_v8  ;;  %459 = vmatpush.msra.mxu3 %v218_v9  ;;  %v234_v8 = vld [vmem:[%s1194_s1 + $0x678] sm:$0xff]  ;;  %v171_v9 = vld [vmem:[%s1194_s1 + $0x480] sm:$0xff] }
  0x48   :  { %401 = vmatpush.msra.mxu0 %v168_v10  ;;  %420 = vmatpush.msra.mxu1 %v185_v11  ;;  %v203_v10 = vld [vmem:[%s1194_s1 + $0x580] sm:$0xff]  ;;  %v23_v11 = vld [vmem:[%s1195_s0 + $0x48] sm:$0xff] }
  0x49   :  { %441 = vmatpush.msra.mxu2 %v200_v12  ;;  %460 = vmatpush.msra.mxu3 %v217_v13  ;;  %v25_v12 = vld [vmem:[%s1195_s0 + $0x58] sm:$0xff]  ;;  %v233_v13 = vld [vmem:[%s1194_s1 + $0x670] sm:$0xff] }
  0x4a   :  { %375 = vmatmul.f32.vlgmr.msrb.gmra.mxu2 %v20_v14  ;;  %402 = vmatpush.msra.mxu0 %v167_v15  ;;  %v232_v14 = vld [vmem:[%s1194_s1 + $0x668] sm:$0xff]  ;;  %v231_v15 = vld [vmem:[%s1194_s1 + $0x660] sm:$0xff] }
  0x4b   :  { %421 = vmatpush.msra.mxu1 %v184_v16  ;;  %442 = vmatpush.msra.mxu2 %v199_v17  ;;  %v230_v16 = vld [vmem:[%s1194_s1 + $0x658] sm:$0xff]  ;;  %v229_v17 = vld [vmem:[%s1194_s1 + $0x650] sm:$0xff] }
  0x4c   :  { %461 = vmatpush.msra.mxu3 %v216_v18  ;;  %335 = vmatmul.f32.vlgmr.msrb.gmra.mxu0 %v18_v19  ;;  %v228_v18 = vld [vmem:[%s1194_s1 + $0x648] sm:$0xff]  ;;  %v227_v19 = vld [vmem:[%s1194_s1 + $0x640] sm:$0xff] }
  0x4d   :  { %395 = vmatmul.f32.vlgmr.msrb.gmra.mxu3 %v21_v20  ;;  %403 = vmatpush.msra.mxu0 %v166_v21  ;;  %v226_v20 = vld [vmem:[%s1194_s1 + $0x638] sm:$0xff]  ;;  %v225_v21 = vld [vmem:[%s1194_s1 + $0x630] sm:$0xff] }
  0x4e   :  { %422 = vmatpush.msra.mxu1 %v183_v22  ;;  %443 = vmatpush.msra.mxu2 %v198_v23  ;;  %v224_v22 = vld [vmem:[%s1194_s1 + $0x628] sm:$0xff]  ;;  %v223_v23 = vld [vmem:[%s1194_s1 + $0x620] sm:$0xff] }
  0x4f   :  { %462 = vmatpush.msra.mxu3 %v215_v24  ;;  %355 = vmatmul.f32.vlgmr.msrb.gmra.mxu1 %v19_v25  ;;  %v222_v24 = vld [vmem:[%s1194_s1 + $0x618] sm:$0xff]  ;;  %v221_v25 = vld [vmem:[%s1194_s1 + $0x610] sm:$0xff] }
  0x50   :  { %404 = vmatpush.msra.mxu0 %v165_v26  ;;  %423 = vmatpush.msra.mxu1 %v182_v27  ;;  %v220_v26 = vld [vmem:[%s1194_s1 + $0x608] sm:$0xff]  ;;  %v219_v27 = vld [vmem:[%s1194_s1 + $0x600] sm:$0xff] }
  0x51   :  { %444 = vmatpush.msra.mxu2 %v197_v28  ;;  %463 = vmatpush.msra.mxu3 %v214_v29  ;;  %v26_v28 = vld [vmem:[%s1195_s0 + $0x60] sm:$0xff] }
  0x52   :  { %405 = vmatpush.msra.mxu0 %v164_v30  ;;  %424 = vmatpush.msra.mxu1 %v181_v31  ;;  %v504_v29 = vld [vmem:[%s1196_s2] ss:$0 sm:$0xff] }
  0x53   :  { %445 = vmatpush.msra.mxu2 %v196_v32  ;;  %464 = vmatpush.msra.mxu3 %v213_v33 }
  0x54   :  { %406 = vmatpush.msra.mxu0 %v163_v34  ;;  %425 = vmatpush.msra.mxu1 %v180_v35 }
  0x55   :  { %446 = vmatpush.msra.mxu2 %v195_v36  ;;  %465 = vmatpush.msra.mxu3 %v212_v37 }
  0x56   :  { %407 = vmatpush.msra.mxu0 %v162_v38  ;;  %426 = vmatpush.msra.mxu1 %v179_v39 }
  0x57   :  { %447 = vmatpush.msra.mxu2 %v194_v40  ;;  %466 = vmatpush.msra.mxu3 %v211_v41 }
  0x58   :  { %408 = vmatpush.msra.mxu0 %v161_v42  ;;  %427 = vmatpush.msra.mxu1 %v178_v43 }
  0x59   :  { %448 = vmatpush.msra.mxu2 %v193_v44  ;;  %467 = vmatpush.msra.mxu3 %v210_v45 }
  0x5a   :  { %409 = vmatpush.msra.mxu0 %v160_v46  ;;  %428 = vmatpush.msra.mxu1 %v177_v47 }
  0x5b   :  { %449 = vmatpush.msra.mxu2 %v192_v48  ;;  %468 = vmatpush.msra.mxu3 %v209_v49 }
  0x5c   :  { %410 = vmatpush.msra.mxu0 %v159_v50  ;;  %429 = vmatpush.msra.mxu1 %v176_v51 }
  0x5d   :  { %450 = vmatpush.msra.mxu2 %v191_v52  ;;  %469 = vmatpush.msra.mxu3 %v208_v53 }
  0x5e   :  { %411 = vmatpush.msra.mxu0 %v158_v54  ;;  %430 = vmatpush.msra.mxu1 %v175_v55 }
  0x5f   :  { %451 = vmatpush.msra.mxu2 %v190_v56  ;;  %470 = vmatpush.msra.mxu3 %v207_v57 }
  0x60   :  { %412 = vmatpush.msra.mxu0 %v157_v58  ;;  %431 = vmatpush.msra.mxu1 %v174_v59 }
  0x61   :  { %452 = vmatpush.msra.mxu2 %v189_v60  ;;  %471 = vmatpush.msra.mxu3 %v206_v61 }
  0x62   :  { %413 = vmatpush.msra.mxu0 %v156_v62  ;;  %432 = vmatpush.msra.mxu1 %v173_v63 }
  0x63   :  { %453 = vmatpush.msra.mxu2 %v188_v0  ;;  %472 = vmatpush.msra.mxu3 %v205_v1 }
  0x64   :  { %414 = vmatpush.msra.mxu0 %v155_v2  ;;  %433 = vmatpush.msra.mxu1 %v172_v3 }
  0x65   :  { %454 = vmatpush.msra.mxu2 %v187_v4  ;;  %473 = vmatpush.msra.mxu3 %v204_v5 }
  0x66   :  { %415 = vmatmul.f32.vlgmr.msra.gmra.mxu0 %v22_v6  ;;  %455 = vmatmul.f32.vlgmr.msra.gmra.mxu2 %v24_v7 }
  0x67   :  { %479 = vmatpush.msrb.mxu0 %v234_v8  ;;  %434 = vmatpush.msra.mxu1 %v171_v9 }
  0x68   :  { %474 = vmatpush.msra.mxu3 %v203_v10  ;;  %435 = vmatmul.f32.vlgmr.msra.gmra.mxu1 %v23_v11 }
  0x69   :  { %475 = vmatmul.f32.vlgmr.msra.gmra.mxu3 %v25_v12  ;;  %480 = vmatpush.msrb.mxu0 %v233_v13 }
  0x6b   :  { %481 = vmatpush.msrb.mxu0 %v232_v14 }
  0x6d   :  { %482 = vmatpush.msrb.mxu0 %v231_v15 }
  0x6f   :  { %483 = vmatpush.msrb.mxu0 %v230_v16 }
  0x71   :  { %484 = vmatpush.msrb.mxu0 %v229_v17 }
  0x73   :  { %485 = vmatpush.msrb.mxu0 %v228_v18 }
  0x75   :  { %486 = vmatpush.msrb.mxu0 %v227_v19 }
  0x77   :  { %487 = vmatpush.msrb.mxu0 %v226_v20 }
  0x79   :  { %488 = vmatpush.msrb.mxu0 %v225_v21 }
  0x7b   :  { %489 = vmatpush.msrb.mxu0 %v224_v22 }
  0x7d   :  { %490 = vmatpush.msrb.mxu0 %v223_v23 }
  0x7f   :  { %491 = vmatpush.msrb.mxu0 %v222_v24 }
  0x81   :  { %492 = vmatpush.msrb.mxu0 %v221_v25 }
  0x83   :  { %493 = vmatpush.msrb.mxu0 %v220_v26 }
  0x85   :  { %494 = vmatpush.msrb.mxu0 %v219_v27 }
  0x86   :  { %495 = vmatmul.f32.vlgmr.msrb.gmra.mxu0 %v26_v28 }
  0xbf   :  { %v256_v30 = vpop.f32.mrf.mxu0 }
  0xc0   :  { %v257_v31 = vadd.f32 %v504_v29, %v256_v30 }
  0xc2   :  { %v276_v32 = vpop.f32.mrf.mxu1 }
  0xc3   :  { %v277_v33 = vadd.f32 %v276_v32, %v257_v31  ;;  %v296_v34 = vpop.f32.mrf.mxu2 }
  0xc5   :  { %v297_v35 = vadd.f32 %v296_v34, %v277_v33 }
  0xc6   :  { %v316_v36 = vpop.f32.mrf.mxu3 }
  0xc7   :  { %v317_v37 = vadd.f32 %v316_v36, %v297_v35 }
  0xc9   :  { %v336_v38 = vpop.f32.mrf.mxu0 }
  0xca   :  { %v337_v39 = vadd.f32 %v336_v38, %v317_v37 }
  0xcc   :  { %v356_v40 = vpop.f32.mrf.mxu1 }
  0xcd   :  { %v357_v41 = vadd.f32 %v356_v40, %v337_v39  ;;  %v376_v42 = vpop.f32.mrf.mxu2 }
  0xcf   :  { %v377_v43 = vadd.f32 %v376_v42, %v357_v41 }
  0xd0   :  { %v396_v44 = vpop.f32.mrf.mxu3 }
  0xd1   :  { %v397_v46 = vadd.f32 %v396_v44, %v377_v43 }
  0xe3   :  { %v416_v45 = vpop.f32.mrf.mxu0 }
  0xe4   :  { %v417_v47 = vadd.f32 %v416_v45, %v397_v46 }
  0xe5   :  { %v436_v48 = vpop.f32.mrf.mxu1 }
  0xe6   :  { %v437_v50 = vadd.f32 %v436_v48, %v417_v47 }
  0xe9   :  { %v456_v49 = vpop.f32.mrf.mxu2 }
  0xea   :  { %v457_v51 = vadd.f32 %v456_v49, %v437_v50 }
  0xec   :  { %v476_v52 = vpop.f32.mrf.mxu3 }
  0xed   :  { %v477_v53 = vadd.f32 %v476_v52, %v457_v51 }
 0x103   :  { %v496_v54 = vpop.f32.mrf.mxu0 }
 0x104   :  { %v497_v55 = vadd.f32 %v496_v54, %v477_v53 }
 0x106   :  { %499 = vst [vmem:[%s1197_s3] sm:$0xff] %v497_v55 }

</bundles_post_ra>
